<compile_context>
chip_gen: v7x
topology: tpu7x:2x2x1
jax: 0.10.0
libtpu: 0.0.40
codegen_flags: <defaults>
</compile_context>

<pallas_src>
import jax
import jax.numpy as jnp
import numpy as np
from jax import lax
from jax.experimental import pallas as pl
from jax.experimental.pallas import tpu as pltpu

BN_EPS = 1e-5
LANE = 128            # TPU lane width; output-channel padding granularity


def _round_up(x, m):
    return (x + m - 1) // m * m


def _vmem_budget_bytes():
    """Generation-aware scoped-VMEM budget (v5e/v6e: ~96 of 128 MiB, v7x: ~48 of 64)."""
    try:
        cap = int(pltpu.get_tpu_info().vmem_capacity_bytes)
    except Exception:
        cap = 64 * 1024 * 1024            # conservative (v7x-sized) fallback
    return min(cap * 3 // 4, 100 * 1024 * 1024)


def _pick_tile_rows(H, W, per_row_bytes, avail_bytes):
    """Largest row tile under the VMEM budget; multiple of 8 for aligned sublane
    starts, with a floor so M = TH*W >= 512 keeps the MXU cadence full."""
    th = int(avail_bytes // max(per_row_bytes, 1))
    th = max(th, -(-512 // max(W, 1)))    # MXU-efficiency floor (M >= 512)
    th = min(th, H)
    if th >= 8:
        th = (th // 8) * 8
    return max(th, 1)


def _largest_divisor_leq(n, cap):
    cap = max(1, min(cap, n))
    for d in range(cap, 0, -1):
        if n % d == 0:
            return d
    return 1


def _make_conv_kernel(H, W, TH, Cpo, *, mode, Cpi=None, K0=None, fuse_bn=False):
    """3x3 'same' conv (stride 1) + bias, writing the pre-BN activation in bf16
    into the next layer's zero-halo padded layout, plus per-(n, h) BN partials.

    mode == "general": in-kernel im2col (3 matmuls, one per kh, K = 3*Cpi) over
        a resident padded (Hp, Wp, Cpi) bf16 image; if `fuse_bn`, the previous
        layer's folded BN scale/shift + ReLU is applied at band load with a
        halo/row mask so padding stays exactly zero.
    mode == "direct": layer-0 fast path; the input is a JAX-side im2col patch
        volume (H, W, K0=9*Cin) and each tile is one K0-wide MXU matmul.
    """
    HW = TH * W
    Wp = W + 2
    tail = (H % TH) != 0                  # last tile overlaps (clamped start)
    aligned = (not tail) and (TH % 8 == 0)

    def kernel(*refs):
        if mode == "general" and fuse_bn:
            x_ref, w_ref, b_ref, scale_ref, shift_ref, y_ref, sum_ref, sq_ref = refs
        else:
            x_ref, w_ref, b_ref, y_ref, sum_ref, sq_ref = refs

        h = pl.program_id(1)
        start = h * TH
        row0 = jnp.minimum(start, H - TH) if tail else start
        if aligned:
            row0 = pl.multiple_of(row0, 8)

        if mode == "direct":
            patch = x_ref[0, pl.ds(row0, TH), :, :]            # (TH, W, K0) bf16
            acc = jnp.dot(patch.reshape(HW, K0), w_ref[...],
                          preferred_element_type=jnp.float32)  # (HW, Cpo) f32
        else:
            if fuse_bn:                                        # hoisted invariants
                scale = scale_ref[...].reshape(1, 1, Cpi)
                shift = shift_ref[...].reshape(1, 1, Cpi)
                c = lax.broadcasted_iota(jnp.int32, (1, Wp, 1), 1)
                col_ok = (c >= 1) & (c <= W)
                row_iota = lax.broadcasted_iota(jnp.int32, (TH, 1, 1), 0)
            acc = None
            for kh in range(3):
                band = x_ref[0, pl.ds(row0 + kh, TH), :, :]    # (TH, Wp, Cpi) bf16
                if fuse_bn:
                    # previous layer's BN + ReLU, fused at load; halo masked to 0
                    r = row_iota + (row0 + kh)
                    ok = (r >= 1) & (r <= H) & col_ok
                    v = band.astype(jnp.float32) * scale + shift
                    band = jnp.where(ok, jnp.maximum(v, 0.0),
                                     0.0).astype(jnp.bfloat16)
                pk = jnp.concatenate(
                    [band[:, kw:kw + W, :].reshape(HW, Cpi) for kw in range(3)],
                    axis=1)                                    # (HW, 3*Cpi) bf16
                d = jnp.dot(pk, w_ref[kh], preferred_element_type=jnp.float32)
                acc = d if acc is None else acc + d

        acc = acc + b_ref[...]                                 # conv bias (f32)

        # Pre-BN activation, stored bf16 straight into the padded layout the
        # next layer consumes (halo is never read unmasked, so never written).
        y_ref[0, pl.ds(row0 + 1, TH), 1:W + 1, :] = (
            acc.reshape(TH, W, Cpo).astype(jnp.bfloat16))

        # Per-(n, h) BatchNorm partial statistics from the f32 accumulator.
        if tail:
            rid = lax.broadcasted_iota(jnp.int32, (HW, 1), 0) // W + row0
            accm = jnp.where(rid >= start, acc, 0.0)           # drop overlap rows
        else:
            accm = acc
        sum_ref[...] = jnp.sum(accm, axis=0).reshape(1, 1, 1, Cpo)
        sq_ref[...] = jnp.sum(accm * accm, axis=0).reshape(1, 1, 1, Cpo)

    return kernel


def _conv_layer(x_arr, wk, bk, scale_shift, *, N, H, W, Cpo,
                mode, Cpi=None, K0=None, vmem_limit):
    """One conv layer (optionally with the previous layer's BN+ReLU fused at load)."""
    Hp, Wp = H + 2, W + 2
    fuse_bn = scale_shift is not None

    # VMEM-budget-aware row tile (resident blocks are double-buffered over n).
    if mode == "general":
        resident = 2 * (Hp * Wp * Cpi * 2 + Hp * Wp * Cpo * 2) + 2 * wk.size * 2
        per_row = Wp * Cpi * 6 + W * (6 * Cpi + 10 * Cpo)
    else:
        resident = 2 * (H * W * K0 * 2 + Hp * Wp * Cpo * 2) + 2 * wk.size * 2
        per_row = W * (6 * K0 + 10 * Cpo)
    # TODO(synk): for images whose padded activation no longer fits VMEM as a
    # resident block, switch to row-tiled input blocks with a manual 2-row halo
    # DMA (memory_space=pl.ANY + pltpu.make_async_copy).
    avail = max(vmem_limit - resident, 256 * 1024)
    TH = _pick_tile_rows(H, W, per_row, avail)
    HB = (H + TH - 1) // TH

    kernel = _make_conv_kernel(H, W, TH, Cpo, mode=mode, Cpi=Cpi, K0=K0,
                               fuse_bn=fuse_bn)

    if mode == "general":
        in_specs = [pl.BlockSpec((1, Hp, Wp, Cpi), lambda n, h: (n, 0, 0, 0)),
                    pl.BlockSpec((3, 3 * Cpi, Cpo), lambda n, h: (0, 0, 0)),
                    pl.BlockSpec((1, Cpo), lambda n, h: (0, 0))]
        args = [x_arr, wk, bk]
        if fuse_bn:
            in_specs += [pl.BlockSpec((1, Cpi), lambda n, h: (0, 0)),
                         pl.BlockSpec((1, Cpi), lambda n, h: (0, 0))]
            args += [scale_shift[0], scale_shift[1]]
    else:
        in_specs = [pl.BlockSpec((1, H, W, K0), lambda n, h: (n, 0, 0, 0)),
                    pl.BlockSpec((K0, Cpo), lambda n, h: (0, 0)),
                    pl.BlockSpec((1, Cpo), lambda n, h: (0, 0))]
        args = [x_arr, wk, bk]

    return pl.pallas_call(
        kernel,
        out_shape=(
            jax.ShapeDtypeStruct((N, Hp, Wp, Cpo), jnp.bfloat16),   # pre-BN act
            jax.ShapeDtypeStruct((N, HB, 1, Cpo), jnp.float32),     # BN sum
            jax.ShapeDtypeStruct((N, HB, 1, Cpo), jnp.float32),     # BN sumsq
        ),
        grid_spec=pltpu.PrefetchScalarGridSpec(
            num_scalar_prefetch=0,
            grid=(N, HB),
            in_specs=in_specs,
            out_specs=(
                pl.BlockSpec((1, Hp, Wp, Cpo), lambda n, h: (n, 0, 0, 0)),
                pl.BlockSpec((1, 1, 1, Cpo), lambda n, h: (n, h, 0, 0)),
                pl.BlockSpec((1, 1, 1, Cpo), lambda n, h: (n, h, 0, 0)),
            ),
        ),
        compiler_params=pltpu.CompilerParams(
            dimension_semantics=("parallel", "arbitrary"),
            vmem_limit_bytes=vmem_limit),
    )(*args)


def _fold_bn(sum_p, sq_p, gamma, beta, count, Cout, Cpo):
    """Fold training-mode BatchNorm into per-channel scale/shift (tiny JAX reduce)."""
    s = jnp.sum(sum_p, axis=(0, 1, 2))
    q = jnp.sum(sq_p, axis=(0, 1, 2))
    mean = s / count
    # TODO(synk): E[x^2]-E[x]^2 in f32 can lose precision at very large N*H*W;
    # a shifted / two-pass variance would be more robust at production scale.
    var = jnp.maximum(q / count - mean * mean, 0.0)
    g = jnp.pad(gamma.astype(jnp.float32), (0, Cpo - Cout), constant_values=1.0)
    b = jnp.pad(beta.astype(jnp.float32), (0, Cpo - Cout))
    scale = g * lax.rsqrt(var + BN_EPS)
    shift = b - mean * scale
    return scale.reshape(1, Cpo), shift.reshape(1, Cpo)


def _make_epilogue_kernel(H, W, THe, Cpo):
    """Final-layer BN + ReLU: interior rows/cols only, no masks, f32 output."""
    def kernel(y_ref, scale_ref, shift_ref, o_ref):
        h = pl.program_id(1)
        row0 = h * THe
        y = y_ref[0, pl.ds(row0 + 1, THe), 1:W + 1, :].astype(jnp.float32)
        o_ref[0] = jnp.maximum(
            y * scale_ref[...].reshape(1, 1, Cpo) + shift_ref[...].reshape(1, 1, Cpo),
            0.0)
    return kernel


def _bn_relu_epilogue(y_pad, scale, shift, *, N, H, W, Cpo, vmem_limit):
    Hp, Wp = H + 2, W + 2
    resident = 2 * Hp * Wp * Cpo * 2                 # resident bf16 input, x2 buffers
    per_row = W * Cpo * 14                           # dbl-buffered f32 out + temps
    cap = int(max((vmem_limit - resident) // max(per_row, 1), 1))
    THe = _largest_divisor_leq(H, cap)
    kernel = _make_epilogue_kernel(H, W, THe, Cpo)
    return pl.pallas_call(
        kernel,
        out_shape=jax.ShapeDtypeStruct((N, H, W, Cpo), jnp.float32),
        grid_spec=pltpu.PrefetchScalarGridSpec(
            num_scalar_prefetch=0,
            grid=(N, H // THe),
            in_specs=[
                pl.BlockSpec((1, Hp, Wp, Cpo), lambda n, h: (n, 0, 0, 0)),
                pl.BlockSpec((1, Cpo), lambda n, h: (0, 0)),
                pl.BlockSpec((1, Cpo), lambda n, h: (0, 0)),
            ],
            out_specs=pl.BlockSpec((1, THe, W, Cpo), lambda n, h: (n, h, 0, 0)),
        ),
        compiler_params=pltpu.CompilerParams(
            dimension_semantics=("parallel", "arbitrary"),
            vmem_limit_bytes=vmem_limit),
    )(y_pad, scale, shift)


def init_conv_block_params(key, in_channels, out_channels, n_layers=2):
    """Deterministic parameter init matching the shapes of ConvBlock.__init__."""
    params = []
    c = in_channels
    for _ in range(n_layers):
        key, k_w, k_b = jax.random.split(key, 3)
        bound = 1.0 / np.sqrt(c * 3 * 3)
        w = jax.random.uniform(k_w, (out_channels, c, 3, 3), jnp.float32,
                               -bound, bound)
        b = jax.random.uniform(k_b, (out_channels,), jnp.float32, -bound, bound)
        gamma = jnp.ones((out_channels,), jnp.float32)   # BN weight init
        beta = jnp.zeros((out_channels,), jnp.float32)   # BN bias init
        params.append((w, b, gamma, beta))
        c = out_channels
    return params


def conv_block_forward(params, x_nchw):
    """ConvBlock.forward: X is (batch, n_channels, height, width)."""
    # TODO(synk): initial_stride != (1, 1) is not implemented; the default
    # ConvBlock configuration (stride 1, padding='same') is what is modeled.
    N, Cin, H, W = x_nchw.shape
    vmem_limit = _vmem_budget_bytes()
    x = jnp.transpose(x_nchw, (0, 2, 3, 1)).astype(jnp.float32)   # NCHW -> NHWC

    scale_shift = None
    y_pad = None
    for li, (w, b, gamma, beta) in enumerate(params):
        Cout, Ci = w.shape[0], w.shape[1]
        Cpo = _round_up(Cout, LANE)
        wt = jnp.transpose(w, (2, 3, 1, 0)).astype(jnp.float32)   # (3,3,Cin,Cout)
        bk = jnp.pad(b.astype(jnp.float32), (0, Cpo - Cout)).reshape(1, Cpo)

        if li == 0:
            if 9 * Ci <= LANE:
                # Layer-0 fast path: JAX-side im2col -> K = 9*Cin (not 9*128).
                K0 = 9 * Ci
                xp = jnp.pad(x, ((0, 0), (1, 1), (1, 1), (0, 0)))
                patches = jnp.concatenate(
                    [xp[:, kh:kh + H, kw:kw + W, :]
                     for kh in range(3) for kw in range(3)],
                    axis=-1).astype(jnp.bfloat16)                 # (N,H,W,9*Cin)
                wk = jnp.pad(wt.reshape(K0, Cout),
                             ((0, 0), (0, Cpo - Cout))).astype(jnp.bfloat16)
                y_pad, s_p, q_p = _conv_layer(
                    patches, wk, bk, None, N=N, H=H, W=W, Cpo=Cpo,
                    mode="direct", K0=K0, vmem_limit=vmem_limit)
            else:
                Cpi = _round_up(Ci, LANE)
                xp = jnp.pad(x, ((0, 0), (1, 1), (1, 1),
                                 (0, Cpi - Ci))).astype(jnp.bfloat16)
                wk = jnp.pad(wt, ((0, 0), (0, 0), (0, Cpi - Ci), (0, Cpo - Cout)))
                wk = wk.reshape(3, 3 * Cpi, Cpo).astype(jnp.bfloat16)
                y_pad, s_p, q_p = _conv_layer(
                    xp, wk, bk, None, N=N, H=H, W=W, Cpo=Cpo,
                    mode="general", Cpi=Cpi, vmem_limit=vmem_limit)
        else:
            Cpi = _round_up(Ci, LANE)          # == previous layer's Cpo
            wk = jnp.pad(wt, ((0, 0), (0, 0), (0, Cpi - Ci), (0, Cpo - Cout)))
            wk = wk.reshape(3, 3 * Cpi, Cpo).astype(jnp.bfloat16)
            y_pad, s_p, q_p = _conv_layer(
                y_pad, wk, bk, scale_shift, N=N, H=H, W=W, Cpo=Cpo,
                mode="general", Cpi=Cpi, vmem_limit=vmem_limit)

        scale_shift = _fold_bn(s_p, q_p, gamma, beta, float(N * H * W), Cout, Cpo)

    Cout = params[-1][0].shape[0]
    Cpo = _round_up(Cout, LANE)
    out = _bn_relu_epilogue(y_pad, scale_shift[0], scale_shift[1],
                            N=N, H=H, W=W, Cpo=Cpo, vmem_limit=vmem_limit)
    out = out[:, :, :, :Cout]
    return jnp.transpose(out, (0, 3, 1, 2))                       # NHWC -> NCHW


def _reference(params, x_nchw):
    """Pure-JAX reference of the PyTorch forward (training-mode BatchNorm).
    Precision matched to the kernel: bf16 conv operands with f32 accumulation,
    and the pre-BN activation rounded to bf16 (as stored between layers)."""
    x = x_nchw.astype(jnp.float32)
    for (w, b, gamma, beta) in params:
        y = lax.conv_general_dilated(
            x.astype(jnp.bfloat16), w.astype(jnp.bfloat16),
            window_strides=(1, 1), padding="SAME",
            dimension_numbers=("NCHW", "OIHW", "NCHW"),
            preferred_element_type=jnp.float32)
        y = y + b.reshape(1, -1, 1, 1)
        mean = jnp.mean(y, axis=(0, 2, 3), keepdims=True)
        var = jnp.mean((y - mean) ** 2, axis=(0, 2, 3), keepdims=True)
        yq = y.astype(jnp.bfloat16).astype(jnp.float32)     # bf16 inter-layer store
        yn = (yq - mean) / jnp.sqrt(var + BN_EPS)
        yn = yn * gamma.reshape(1, -1, 1, 1) + beta.reshape(1, -1, 1, 1)
        x = jnp.maximum(yn, 0.0)
    return x


if __name__ == "__main__":
    key = jax.random.PRNGKey(0)
    k_x, k_p = jax.random.split(key)

    N, Cin, H, W = 2, 4, 16, 16
    Cout = 8

    x = jax.random.normal(k_x, (N, Cin, H, W), jnp.float32)
    params = init_conv_block_params(k_p, Cin, Cout, n_layers=2)

    fwd = jax.jit(conv_block_forward)
    out = jax.block_until_ready(fwd(params, x))

    ref = _reference(params, x)
    np.testing.assert_allclose(np.asarray(out), np.asarray(ref),
                               rtol=5e-3, atol=5e-3)
    print("KERNEL_OK")
</pallas_src>

<mosaic_0001>
module attributes {stable_mosaic.version = 11 : i64} {
  func.func @kernel(%arg0: i32, %arg1: i32, %arg2: memref<1x16x16x36xbf16, #tpu.memory_space<vmem>>, %arg3: memref<36x128xbf16, #tpu.memory_space<vmem>>, %arg4: memref<1x128xf32, #tpu.memory_space<vmem>>, %arg5: memref<1x18x18x128xbf16, #tpu.memory_space<vmem>>, %arg6: memref<1x1x1x128xf32, #tpu.memory_space<vmem>>, %arg7: memref<1x1x1x128xf32, #tpu.memory_space<vmem>>) attributes {dimension_semantics = [#tpu.dimension_semantics<parallel>, #tpu.dimension_semantics<arbitrary>], iteration_bounds = array<i64: 2, 1>, scalar_prefetch = 0 : i64, scratch_operands = 0 : i64, tpu.core_type = #tpu.core_type<tc>, window_params = [{transform_indices = @transform_0, window_bounds = array<i64: 1, 16, 16, 36>}, {pipeline_mode = #tpu.pipeline_mode<synchronous>, transform_indices = @transform_1, window_bounds = array<i64: 36, 128>}, {pipeline_mode = #tpu.pipeline_mode<synchronous>, transform_indices = @transform_2, window_bounds = array<i64: 1, 128>}, {transform_indices = @transform_3, window_bounds = array<i64: 1, 18, 18, 128>}, {transform_indices = @transform_4, window_bounds = array<i64: 1, 1, 1, 128>}, {transform_indices = @transform_5, window_bounds = array<i64: 1, 1, 1, 128>}]} {
    %c16_i32 = arith.constant 16 : i32
    %0 = arith.muli %arg1, %c16_i32 : i32
    %1 = tpu.assume_multiple %0, 8 : i32
    %c0 = arith.constant 0 : index
    %2 = arith.index_cast %1 : i32 to index
    %c0_0 = arith.constant 0 : index
    %c0_1 = arith.constant 0 : index
    %3 = vector.load %arg2[%c0, %2, %c0_0, %c0_1] : memref<1x16x16x36xbf16, #tpu.memory_space<vmem>>, vector<1x16x16x36xbf16>
    %4 = vector.shape_cast %3 : vector<1x16x16x36xbf16> to vector<16x16x36xbf16>
    %5 = vector.shape_cast %4 : vector<16x16x36xbf16> to vector<256x36xbf16>
    %c0_2 = arith.constant 0 : index
    %c0_3 = arith.constant 0 : index
    %6 = vector.load %arg3[%c0_2, %c0_3] : memref<36x128xbf16, #tpu.memory_space<vmem>>, vector<36x128xbf16>
    %cst = arith.constant dense<0.000000e+00> : vector<256x128xf32>
    %7 = tpu.matmul %5, %6, %cst {dimension_numbers = #tpu.dot_dimension_numbers<[1], [0], [0], [1], [0, 0, 1, 1], [], []>} : vector<256x36xbf16>, vector<36x128xbf16>, vector<256x128xf32> -> vector<256x128xf32>
    %c0_4 = arith.constant 0 : index
    %c0_5 = arith.constant 0 : index
    %8 = vector.load %arg4[%c0_4, %c0_5] : memref<1x128xf32, #tpu.memory_space<vmem>>, vector<1x128xf32>
    %9 = vector.broadcast %8 : vector<1x128xf32> to vector<256x128xf32>
    %10 = arith.addf %7, %9 : vector<256x128xf32>
    %11 = vector.shape_cast %10 : vector<256x128xf32> to vector<16x16x128xf32>
    %12 = arith.truncf %11 : vector<16x16x128xf32> to vector<16x16x128xbf16>
    %c1_i32 = arith.constant 1 : i32
    %13 = arith.addi %1, %c1_i32 : i32
    %c0_6 = arith.constant 0 : index
    %14 = arith.index_cast %13 : i32 to index
    %c1 = arith.constant 1 : index
    %c0_7 = arith.constant 0 : index
    %15 = vector.load %arg5[%c0_6, %14, %c1, %c0_7] : memref<1x18x18x128xbf16, #tpu.memory_space<vmem>>, vector<1x16x16x128xbf16>
    %16 = vector.shape_cast %15 : vector<1x16x16x128xbf16> to vector<16x16x128xbf16>
    %17 = vector.shape_cast %12 : vector<16x16x128xbf16> to vector<1x16x16x128xbf16>
    tpu.vector_store %arg5[%c0_6, %14, %c1, %c0_7], %17 {strides = array<i32>} : memref<1x18x18x128xbf16, #tpu.memory_space<vmem>>, vector<1x16x16x128xbf16>,
    %cst_8 = arith.constant dense<0.000000e+00> : vector<128xf32>
    %18 = vector.multi_reduction <add>, %10, %cst_8 [0] : vector<256x128xf32> to vector<128xf32>
    %19 = vector.shape_cast %18 : vector<128xf32> to vector<1x1x1x128xf32>
    %c0_9 = arith.constant 0 : index
    %c0_10 = arith.constant 0 : index
    %c0_11 = arith.constant 0 : index
    %c0_12 = arith.constant 0 : index
    %20 = vector.load %arg6[%c0_9, %c0_10, %c0_11, %c0_12] : memref<1x1x1x128xf32, #tpu.memory_space<vmem>>, vector<1x1x1x128xf32>
    tpu.vector_store %arg6[%c0_9, %c0_10, %c0_11, %c0_12], %19 {strides = array<i32>} : memref<1x1x1x128xf32, #tpu.memory_space<vmem>>, vector<1x1x1x128xf32>,
    %21 = arith.mulf %10, %10 : vector<256x128xf32>
    %cst_13 = arith.constant dense<0.000000e+00> : vector<128xf32>
    %22 = vector.multi_reduction <add>, %21, %cst_13 [0] : vector<256x128xf32> to vector<128xf32>
    %23 = vector.shape_cast %22 : vector<128xf32> to vector<1x1x1x128xf32>
    %c0_14 = arith.constant 0 : index
    %c0_15 = arith.constant 0 : index
    %c0_16 = arith.constant 0 : index
    %c0_17 = arith.constant 0 : index
    %24 = vector.load %arg7[%c0_14, %c0_15, %c0_16, %c0_17] : memref<1x1x1x128xf32, #tpu.memory_space<vmem>>, vector<1x1x1x128xf32>
    tpu.vector_store %arg7[%c0_14, %c0_15, %c0_16, %c0_17], %23 {strides = array<i32>} : memref<1x1x1x128xf32, #tpu.memory_space<vmem>>, vector<1x1x1x128xf32>,
    return
  }
  func.func @transform_0(%arg0: i32, %arg1: i32) -> (i32, i32, i32, i32) {
    %c0_i32 = arith.constant 0 : i32
    %c0_i32_0 = arith.constant 0 : i32
    %c0_i32_1 = arith.constant 0 : i32
    %c0_i32_2 = arith.constant 0 : i32
    return %arg0, %c0_i32, %c0_i32_0, %c0_i32_1 : i32, i32, i32, i32
  }
  func.func @transform_1(%arg0: i32, %arg1: i32) -> (i32, i32) {
    %c0_i32 = arith.constant 0 : i32
    %c0_i32_0 = arith.constant 0 : i32
    %c0_i32_1 = arith.constant 0 : i32
    return %c0_i32, %c0_i32_0 : i32, i32
  }
  func.func @transform_2(%arg0: i32, %arg1: i32) -> (i32, i32) {
    %c0_i32 = arith.constant 0 : i32
    %c0_i32_0 = arith.constant 0 : i32
    %c0_i32_1 = arith.constant 0 : i32
    return %c0_i32, %c0_i32_0 : i32, i32
  }
  func.func @transform_3(%arg0: i32, %arg1: i32) -> (i32, i32, i32, i32) {
    %c0_i32 = arith.constant 0 : i32
    %c0_i32_0 = arith.constant 0 : i32
    %c0_i32_1 = arith.constant 0 : i32
    %c0_i32_2 = arith.constant 0 : i32
    return %arg0, %c0_i32, %c0_i32_0, %c0_i32_1 : i32, i32, i32, i32
  }
  func.func @transform_4(%arg0: i32, %arg1: i32) -> (i32, i32, i32, i32) {
    %c0_i32 = arith.constant 0 : i32
    %c0_i32_0 = arith.constant 0 : i32
    %c0_i32_1 = arith.constant 0 : i32
    return %arg0, %arg1, %c0_i32, %c0_i32_0 : i32, i32, i32, i32
  }
  func.func @transform_5(%arg0: i32, %arg1: i32) -> (i32, i32, i32, i32) {
    %c0_i32 = arith.constant 0 : i32
    %c0_i32_0 = arith.constant 0 : i32
    %c0_i32_1 = arith.constant 0 : i32
    return %arg0, %arg1, %c0_i32, %c0_i32_0 : i32, i32, i32, i32
  }
}

module attributes {stable_mosaic.version = 11 : i64} {
  func.func @kernel(%arg0: i32, %arg1: i32, %arg2: memref<1x18x18x128xbf16, #tpu.memory_space<vmem>>, %arg3: memref<3x384x128xbf16, #tpu.memory_space<vmem>>, %arg4: memref<1x128xf32, #tpu.memory_space<vmem>>, %arg5: memref<1x128xf32, #tpu.memory_space<vmem>>, %arg6: memref<1x128xf32, #tpu.memory_space<vmem>>, %arg7: memref<1x18x18x128xbf16, #tpu.memory_space<vmem>>, %arg8: memref<1x1x1x128xf32, #tpu.memory_space<vmem>>, %arg9: memref<1x1x1x128xf32, #tpu.memory_space<vmem>>) attributes {dimension_semantics = [#tpu.dimension_semantics<parallel>, #tpu.dimension_semantics<arbitrary>], iteration_bounds = array<i64: 2, 1>, scalar_prefetch = 0 : i64, scratch_operands = 0 : i64, tpu.core_type = #tpu.core_type<tc>, window_params = [{transform_indices = @transform_0, window_bounds = array<i64: 1, 18, 18, 128>}, {pipeline_mode = #tpu.pipeline_mode<synchronous>, transform_indices = @transform_1, window_bounds = array<i64: 3, 384, 128>}, {pipeline_mode = #tpu.pipeline_mode<synchronous>, transform_indices = @transform_2, window_bounds = array<i64: 1, 128>}, {pipeline_mode = #tpu.pipeline_mode<synchronous>, transform_indices = @transform_3, window_bounds = array<i64: 1, 128>}, {pipeline_mode = #tpu.pipeline_mode<synchronous>, transform_indices = @transform_4, window_bounds = array<i64: 1, 128>}, {transform_indices = @transform_5, window_bounds = array<i64: 1, 18, 18, 128>}, {transform_indices = @transform_6, window_bounds = array<i64: 1, 1, 1, 128>}, {transform_indices = @transform_7, window_bounds = array<i64: 1, 1, 1, 128>}]} {
    %c16_i32 = arith.constant 16 : i32
    %0 = arith.muli %arg1, %c16_i32 : i32
    %1 = tpu.assume_multiple %0, 8 : i32
    %c0 = arith.constant 0 : index
    %c0_0 = arith.constant 0 : index
    %2 = vector.load %arg5[%c0, %c0_0] : memref<1x128xf32, #tpu.memory_space<vmem>>, vector<1x128xf32>
    %3 = vector.shape_cast %2 : vector<1x128xf32> to vector<1x1x128xf32>
    %c0_1 = arith.constant 0 : index
    %c0_2 = arith.constant 0 : index
    %4 = vector.load %arg6[%c0_1, %c0_2] : memref<1x128xf32, #tpu.memory_space<vmem>>, vector<1x128xf32>
    %5 = vector.shape_cast %4 : vector<1x128xf32> to vector<1x1x128xf32>
    %6 = tpu.iota {dimensions = array<i32: 1>} : vector<1x18x1xi32>
    %c1_i32 = arith.constant 1 : i32
    %7 = vector.broadcast %c1_i32 : i32 to vector<1x18x1xi32>
    %8 = arith.cmpi sge, %6, %7 : vector<1x18x1xi32>
    %c16_i32_3 = arith.constant 16 : i32
    %9 = vector.broadcast %c16_i32_3 : i32 to vector<1x18x1xi32>
    %10 = arith.cmpi sle, %6, %9 : vector<1x18x1xi32>
    %11 = arith.andi %8, %10 : vector<1x18x1xi1>
    %12 = tpu.iota {dimensions = array<i32: 0>} : vector<16x1x1xi32>
    %c0_i32 = arith.constant 0 : i32
    %13 = arith.addi %1, %c0_i32 : i32
    %c0_4 = arith.constant 0 : index
    %14 = arith.index_cast %13 : i32 to index
    %c0_5 = arith.constant 0 : index
    %c0_6 = arith.constant 0 : index
    %15 = vector.load %arg2[%c0_4, %14, %c0_5, %c0_6] : memref<1x18x18x128xbf16, #tpu.memory_space<vmem>>, vector<1x16x18x128xbf16>
    %16 = vector.shape_cast %15 : vector<1x16x18x128xbf16> to vector<16x18x128xbf16>
    %c0_i32_7 = arith.constant 0 : i32
    %17 = arith.addi %1, %c0_i32_7 : i32
    %18 = vector.broadcast %17 : i32 to vector<16x1x1xi32>
    %19 = arith.addi %12, %18 : vector<16x1x1xi32>
    %c1_i32_8 = arith.constant 1 : i32
    %20 = vector.broadcast %c1_i32_8 : i32 to vector<16x1x1xi32>
    %21 = arith.cmpi sge, %19, %20 : vector<16x1x1xi32>
    %c16_i32_9 = arith.constant 16 : i32
    %22 = vector.broadcast %c16_i32_9 : i32 to vector<16x1x1xi32>
    %23 = arith.cmpi sle, %19, %22 : vector<16x1x1xi32>
    %24 = arith.andi %21, %23 : vector<16x1x1xi1>
    %25 = vector.broadcast %24 : vector<16x1x1xi1> to vector<16x18x1xi1>
    %26 = vector.broadcast %11 : vector<1x18x1xi1> to vector<16x18x1xi1>
    %27 = arith.andi %25, %26 : vector<16x18x1xi1>
    %28 = arith.extf %16 : vector<16x18x128xbf16> to vector<16x18x128xf32>
    %29 = vector.broadcast %3 : vector<1x1x128xf32> to vector<16x18x128xf32>
    %30 = arith.mulf %28, %29 : vector<16x18x128xf32>
    %31 = vector.broadcast %5 : vector<1x1x128xf32> to vector<16x18x128xf32>
    %32 = arith.addf %30, %31 : vector<16x18x128xf32>
    %cst = arith.constant 0.000000e+00 : f32
    %33 = vector.broadcast %cst : f32 to vector<16x18x128xf32>
    %34 = arith.maximumf %32, %33 : vector<16x18x128xf32>
    %cst_10 = arith.constant 0.000000e+00 : f32
    %35 = vector.shape_cast %27 : vector<16x18x1xi1> to vector<16x18x1xi1>
    %36 = vector.broadcast %35 : vector<16x18x1xi1> to vector<16x18x128xi1>
    %37 = vector.broadcast %cst_10 : f32 to vector<16x18x128xf32>
    %38 = arith.select %36, %34, %37 : vector<16x18x128xi1>, vector<16x18x128xf32>
    %39 = arith.truncf %38 : vector<16x18x128xf32> to vector<16x18x128xbf16>
    %40 = vector.extract_strided_slice %39 {offsets = [0, 0, 0], sizes = [16, 16, 128], strides = [1, 1, 1]} : vector<16x18x128xbf16> to vector<16x16x128xbf16>
    %41 = vector.shape_cast %40 : vector<16x16x128xbf16> to vector<256x128xbf16>
    %42 = vector.extract_strided_slice %39 {offsets = [0, 1, 0], sizes = [16, 16, 128], strides = [1, 1, 1]} : vector<16x18x128xbf16> to vector<16x16x128xbf16>
    %43 = vector.shape_cast %42 : vector<16x16x128xbf16> to vector<256x128xbf16>
    %44 = vector.extract_strided_slice %39 {offsets = [0, 2, 0], sizes = [16, 16, 128], strides = [1, 1, 1]} : vector<16x18x128xbf16> to vector<16x16x128xbf16>
    %45 = vector.shape_cast %44 : vector<16x16x128xbf16> to vector<256x128xbf16>
    %46 = tpu.concatenate %41, %43, %45 in 1 : vector<256x128xbf16>, vector<256x128xbf16>, vector<256x128xbf16> -> vector<256x384xbf16>
    %c0_11 = arith.constant 0 : index
    %c0_12 = arith.constant 0 : index
    %c0_13 = arith.constant 0 : index
    %47 = vector.load %arg3[%c0_11, %c0_12, %c0_13] : memref<3x384x128xbf16, #tpu.memory_space<vmem>>, vector<1x384x128xbf16>
    %48 = vector.shape_cast %47 : vector<1x384x128xbf16> to vector<384x128xbf16>
    %cst_14 = arith.constant dense<0.000000e+00> : vector<256x128xf32>
    %49 = tpu.matmul %46, %48, %cst_14 {dimension_numbers = #tpu.dot_dimension_numbers<[1], [0], [0], [1], [0, 0, 1, 1], [], []>} : vector<256x384xbf16>, vector<384x128xbf16>, vector<256x128xf32> -> vector<256x128xf32>
    %c1_i32_15 = arith.constant 1 : i32
    %50 = arith.addi %1, %c1_i32_15 : i32
    %c0_16 = arith.constant 0 : index
    %51 = arith.index_cast %50 : i32 to index
    %c0_17 = arith.constant 0 : index
    %c0_18 = arith.constant 0 : index
    %52 = vector.load %arg2[%c0_16, %51, %c0_17, %c0_18] : memref<1x18x18x128xbf16, #tpu.memory_space<vmem>>, vector<1x16x18x128xbf16>
    %53 = vector.shape_cast %52 : vector<1x16x18x128xbf16> to vector<16x18x128xbf16>
    %c1_i32_19 = arith.constant 1 : i32
    %54 = arith.addi %1, %c1_i32_19 : i32
    %55 = vector.broadcast %54 : i32 to vector<16x1x1xi32>
    %56 = arith.addi %12, %55 : vector<16x1x1xi32>
    %c1_i32_20 = arith.constant 1 : i32
    %57 = vector.broadcast %c1_i32_20 : i32 to vector<16x1x1xi32>
    %58 = arith.cmpi sge, %56, %57 : vector<16x1x1xi32>
    %c16_i32_21 = arith.constant 16 : i32
    %59 = vector.broadcast %c16_i32_21 : i32 to vector<16x1x1xi32>
    %60 = arith.cmpi sle, %56, %59 : vector<16x1x1xi32>
    %61 = arith.andi %58, %60 : vector<16x1x1xi1>
    %62 = vector.broadcast %61 : vector<16x1x1xi1> to vector<16x18x1xi1>
    %63 = vector.broadcast %11 : vector<1x18x1xi1> to vector<16x18x1xi1>
    %64 = arith.andi %62, %63 : vector<16x18x1xi1>
    %65 = arith.extf %53 : vector<16x18x128xbf16> to vector<16x18x128xf32>
    %66 = vector.broadcast %3 : vector<1x1x128xf32> to vector<16x18x128xf32>
    %67 = arith.mulf %65, %66 : vector<16x18x128xf32>
    %68 = vector.broadcast %5 : vector<1x1x128xf32> to vector<16x18x128xf32>
    %69 = arith.addf %67, %68 : vector<16x18x128xf32>
    %cst_22 = arith.constant 0.000000e+00 : f32
    %70 = vector.broadcast %cst_22 : f32 to vector<16x18x128xf32>
    %71 = arith.maximumf %69, %70 : vector<16x18x128xf32>
    %cst_23 = arith.constant 0.000000e+00 : f32
    %72 = vector.shape_cast %64 : vector<16x18x1xi1> to vector<16x18x1xi1>
    %73 = vector.broadcast %72 : vector<16x18x1xi1> to vector<16x18x128xi1>
    %74 = vector.broadcast %cst_23 : f32 to vector<16x18x128xf32>
    %75 = arith.select %73, %71, %74 : vector<16x18x128xi1>, vector<16x18x128xf32>
    %76 = arith.truncf %75 : vector<16x18x128xf32> to vector<16x18x128xbf16>
    %77 = vector.extract_strided_slice %76 {offsets = [0, 0, 0], sizes = [16, 16, 128], strides = [1, 1, 1]} : vector<16x18x128xbf16> to vector<16x16x128xbf16>
    %78 = vector.shape_cast %77 : vector<16x16x128xbf16> to vector<256x128xbf16>
    %79 = vector.extract_strided_slice %76 {offsets = [0, 1, 0], sizes = [16, 16, 128], strides = [1, 1, 1]} : vector<16x18x128xbf16> to vector<16x16x128xbf16>
    %80 = vector.shape_cast %79 : vector<16x16x128xbf16> to vector<256x128xbf16>
    %81 = vector.extract_strided_slice %76 {offsets = [0, 2, 0], sizes = [16, 16, 128], strides = [1, 1, 1]} : vector<16x18x128xbf16> to vector<16x16x128xbf16>
    %82 = vector.shape_cast %81 : vector<16x16x128xbf16> to vector<256x128xbf16>
    %83 = tpu.concatenate %78, %80, %82 in 1 : vector<256x128xbf16>, vector<256x128xbf16>, vector<256x128xbf16> -> vector<256x384xbf16>
    %c1 = arith.constant 1 : index
    %c0_24 = arith.constant 0 : index
    %c0_25 = arith.constant 0 : index
    %84 = vector.load %arg3[%c1, %c0_24, %c0_25] : memref<3x384x128xbf16, #tpu.memory_space<vmem>>, vector<1x384x128xbf16>
    %85 = vector.shape_cast %84 : vector<1x384x128xbf16> to vector<384x128xbf16>
    %cst_26 = arith.constant dense<0.000000e+00> : vector<256x128xf32>
    %86 = tpu.matmul %83, %85, %cst_26 {dimension_numbers = #tpu.dot_dimension_numbers<[1], [0], [0], [1], [0, 0, 1, 1], [], []>} : vector<256x384xbf16>, vector<384x128xbf16>, vector<256x128xf32> -> vector<256x128xf32>
    %87 = arith.addf %49, %86 : vector<256x128xf32>
    %c2_i32 = arith.constant 2 : i32
    %88 = arith.addi %1, %c2_i32 : i32
    %c0_27 = arith.constant 0 : index
    %89 = arith.index_cast %88 : i32 to index
    %c0_28 = arith.constant 0 : index
    %c0_29 = arith.constant 0 : index
    %90 = vector.load %arg2[%c0_27, %89, %c0_28, %c0_29] : memref<1x18x18x128xbf16, #tpu.memory_space<vmem>>, vector<1x16x18x128xbf16>
    %91 = vector.shape_cast %90 : vector<1x16x18x128xbf16> to vector<16x18x128xbf16>
    %c2_i32_30 = arith.constant 2 : i32
    %92 = arith.addi %1, %c2_i32_30 : i32
    %93 = vector.broadcast %92 : i32 to vector<16x1x1xi32>
    %94 = arith.addi %12, %93 : vector<16x1x1xi32>
    %c1_i32_31 = arith.constant 1 : i32
    %95 = vector.broadcast %c1_i32_31 : i32 to vector<16x1x1xi32>
    %96 = arith.cmpi sge, %94, %95 : vector<16x1x1xi32>
    %c16_i32_32 = arith.constant 16 : i32
    %97 = vector.broadcast %c16_i32_32 : i32 to vector<16x1x1xi32>
    %98 = arith.cmpi sle, %94, %97 : vector<16x1x1xi32>
    %99 = arith.andi %96, %98 : vector<16x1x1xi1>
    %100 = vector.broadcast %99 : vector<16x1x1xi1> to vector<16x18x1xi1>
    %101 = vector.broadcast %11 : vector<1x18x1xi1> to vector<16x18x1xi1>
    %102 = arith.andi %100, %101 : vector<16x18x1xi1>
    %103 = arith.extf %91 : vector<16x18x128xbf16> to vector<16x18x128xf32>
    %104 = vector.broadcast %3 : vector<1x1x128xf32> to vector<16x18x128xf32>
    %105 = arith.mulf %103, %104 : vector<16x18x128xf32>
    %106 = vector.broadcast %5 : vector<1x1x128xf32> to vector<16x18x128xf32>
    %107 = arith.addf %105, %106 : vector<16x18x128xf32>
    %cst_33 = arith.constant 0.000000e+00 : f32
    %108 = vector.broadcast %cst_33 : f32 to vector<16x18x128xf32>
    %109 = arith.maximumf %107, %108 : vector<16x18x128xf32>
    %cst_34 = arith.constant 0.000000e+00 : f32
    %110 = vector.shape_cast %102 : vector<16x18x1xi1> to vector<16x18x1xi1>
    %111 = vector.broadcast %110 : vector<16x18x1xi1> to vector<16x18x128xi1>
    %112 = vector.broadcast %cst_34 : f32 to vector<16x18x128xf32>
    %113 = arith.select %111, %109, %112 : vector<16x18x128xi1>, vector<16x18x128xf32>
    %114 = arith.truncf %113 : vector<16x18x128xf32> to vector<16x18x128xbf16>
    %115 = vector.extract_strided_slice %114 {offsets = [0, 0, 0], sizes = [16, 16, 128], strides = [1, 1, 1]} : vector<16x18x128xbf16> to vector<16x16x128xbf16>
    %116 = vector.shape_cast %115 : vector<16x16x128xbf16> to vector<256x128xbf16>
    %117 = vector.extract_strided_slice %114 {offsets = [0, 1, 0], sizes = [16, 16, 128], strides = [1, 1, 1]} : vector<16x18x128xbf16> to vector<16x16x128xbf16>
    %118 = vector.shape_cast %117 : vector<16x16x128xbf16> to vector<256x128xbf16>
    %119 = vector.extract_strided_slice %114 {offsets = [0, 2, 0], sizes = [16, 16, 128], strides = [1, 1, 1]} : vector<16x18x128xbf16> to vector<16x16x128xbf16>
    %120 = vector.shape_cast %119 : vector<16x16x128xbf16> to vector<256x128xbf16>
    %121 = tpu.concatenate %116, %118, %120 in 1 : vector<256x128xbf16>, vector<256x128xbf16>, vector<256x128xbf16> -> vector<256x384xbf16>
    %c2 = arith.constant 2 : index
    %c0_35 = arith.constant 0 : index
    %c0_36 = arith.constant 0 : index
    %122 = vector.load %arg3[%c2, %c0_35, %c0_36] : memref<3x384x128xbf16, #tpu.memory_space<vmem>>, vector<1x384x128xbf16>
    %123 = vector.shape_cast %122 : vector<1x384x128xbf16> to vector<384x128xbf16>
    %cst_37 = arith.constant dense<0.000000e+00> : vector<256x128xf32>
    %124 = tpu.matmul %121, %123, %cst_37 {dimension_numbers = #tpu.dot_dimension_numbers<[1], [0], [0], [1], [0, 0, 1, 1], [], []>} : vector<256x384xbf16>, vector<384x128xbf16>, vector<256x128xf32> -> vector<256x128xf32>
    %125 = arith.addf %87, %124 : vector<256x128xf32>
    %c0_38 = arith.constant 0 : index
    %c0_39 = arith.constant 0 : index
    %126 = vector.load %arg4[%c0_38, %c0_39] : memref<1x128xf32, #tpu.memory_space<vmem>>, vector<1x128xf32>
    %127 = vector.broadcast %126 : vector<1x128xf32> to vector<256x128xf32>
    %128 = arith.addf %125, %127 : vector<256x128xf32>
    %129 = vector.shape_cast %128 : vector<256x128xf32> to vector<16x16x128xf32>
    %130 = arith.truncf %129 : vector<16x16x128xf32> to vector<16x16x128xbf16>
    %c1_i32_40 = arith.constant 1 : i32
    %131 = arith.addi %1, %c1_i32_40 : i32
    %c0_41 = arith.constant 0 : index
    %132 = arith.index_cast %131 : i32 to index
    %c1_42 = arith.constant 1 : index
    %c0_43 = arith.constant 0 : index
    %133 = vector.load %arg7[%c0_41, %132, %c1_42, %c0_43] : memref<1x18x18x128xbf16, #tpu.memory_space<vmem>>, vector<1x16x16x128xbf16>
    %134 = vector.shape_cast %133 : vector<1x16x16x128xbf16> to vector<16x16x128xbf16>
    %135 = vector.shape_cast %130 : vector<16x16x128xbf16> to vector<1x16x16x128xbf16>
    tpu.vector_store %arg7[%c0_41, %132, %c1_42, %c0_43], %135 {strides = array<i32>} : memref<1x18x18x128xbf16, #tpu.memory_space<vmem>>, vector<1x16x16x128xbf16>,
    %cst_44 = arith.constant dense<0.000000e+00> : vector<128xf32>
    %136 = vector.multi_reduction <add>, %128, %cst_44 [0] : vector<256x128xf32> to vector<128xf32>
    %137 = vector.shape_cast %136 : vector<128xf32> to vector<1x1x1x128xf32>
    %c0_45 = arith.constant 0 : index
    %c0_46 = arith.constant 0 : index
    %c0_47 = arith.constant 0 : index
    %c0_48 = arith.constant 0 : index
    %138 = vector.load %arg8[%c0_45, %c0_46, %c0_47, %c0_48] : memref<1x1x1x128xf32, #tpu.memory_space<vmem>>, vector<1x1x1x128xf32>
    tpu.vector_store %arg8[%c0_45, %c0_46, %c0_47, %c0_48], %137 {strides = array<i32>} : memref<1x1x1x128xf32, #tpu.memory_space<vmem>>, vector<1x1x1x128xf32>,
    %139 = arith.mulf %128, %128 : vector<256x128xf32>
    %cst_49 = arith.constant dense<0.000000e+00> : vector<128xf32>
    %140 = vector.multi_reduction <add>, %139, %cst_49 [0] : vector<256x128xf32> to vector<128xf32>
    %141 = vector.shape_cast %140 : vector<128xf32> to vector<1x1x1x128xf32>
    %c0_50 = arith.constant 0 : index
    %c0_51 = arith.constant 0 : index
    %c0_52 = arith.constant 0 : index
    %c0_53 = arith.constant 0 : index
    %142 = vector.load %arg9[%c0_50, %c0_51, %c0_52, %c0_53] : memref<1x1x1x128xf32, #tpu.memory_space<vmem>>, vector<1x1x1x128xf32>
    tpu.vector_store %arg9[%c0_50, %c0_51, %c0_52, %c0_53], %141 {strides = array<i32>} : memref<1x1x1x128xf32, #tpu.memory_space<vmem>>, vector<1x1x1x128xf32>,
    return
  }
  func.func @transform_0(%arg0: i32, %arg1: i32) -> (i32, i32, i32, i32) {
    %c0_i32 = arith.constant 0 : i32
    %c0_i32_0 = arith.constant 0 : i32
    %c0_i32_1 = arith.constant 0 : i32
    %c0_i32_2 = arith.constant 0 : i32
    return %arg0, %c0_i32, %c0_i32_0, %c0_i32_1 : i32, i32, i32, i32
  }
  func.func @transform_1(%arg0: i32, %arg1: i32) -> (i32, i32, i32) {
    %c0_i32 = arith.constant 0 : i32
    %c0_i32_0 = arith.constant 0 : i32
    %c0_i32_1 = arith.constant 0 : i32
    %c0_i32_2 = arith.constant 0 : i32
    return %c0_i32, %c0_i32_0, %c0_i32_1 : i32, i32, i32
  }
  func.func @transform_2(%arg0: i32, %arg1: i32) -> (i32, i32) {
    %c0_i32 = arith.constant 0 : i32
    %c0_i32_0 = arith.constant 0 : i32
    %c0_i32_1 = arith.constant 0 : i32
    return %c0_i32, %c0_i32_0 : i32, i32
  }
  func.func @transform_3(%arg0: i32, %arg1: i32) -> (i32, i32) {
    %c0_i32 = arith.constant 0 : i32
    %c0_i32_0 = arith.constant 0 : i32
    %c0_i32_1 = arith.constant 0 : i32
    return %c0_i32, %c0_i32_0 : i32, i32
  }
  func.func @transform_4(%arg0: i32, %arg1: i32) -> (i32, i32) {
    %c0_i32 = arith.constant 0 : i32
    %c0_i32_0 = arith.constant 0 : i32
    %c0_i32_1 = arith.constant 0 : i32
    return %c0_i32, %c0_i32_0 : i32, i32
  }
  func.func @transform_5(%arg0: i32, %arg1: i32) -> (i32, i32, i32, i32) {
    %c0_i32 = arith.constant 0 : i32
    %c0_i32_0 = arith.constant 0 : i32
    %c0_i32_1 = arith.constant 0 : i32
    %c0_i32_2 = arith.constant 0 : i32
    return %arg0, %c0_i32, %c0_i32_0, %c0_i32_1 : i32, i32, i32, i32
  }
  func.func @transform_6(%arg0: i32, %arg1: i32) -> (i32, i32, i32, i32) {
    %c0_i32 = arith.constant 0 : i32
    %c0_i32_0 = arith.constant 0 : i32
    %c0_i32_1 = arith.constant 0 : i32
    return %arg0, %arg1, %c0_i32, %c0_i32_0 : i32, i32, i32, i32
  }
  func.func @transform_7(%arg0: i32, %arg1: i32) -> (i32, i32, i32, i32) {
    %c0_i32 = arith.constant 0 : i32
    %c0_i32_0 = arith.constant 0 : i32
    %c0_i32_1 = arith.constant 0 : i32
    return %arg0, %arg1, %c0_i32, %c0_i32_0 : i32, i32, i32, i32
  }
}

module attributes {stable_mosaic.version = 11 : i64} {
  func.func @kernel(%arg0: i32, %arg1: i32, %arg2: memref<1x18x18x128xbf16, #tpu.memory_space<vmem>>, %arg3: memref<1x128xf32, #tpu.memory_space<vmem>>, %arg4: memref<1x128xf32, #tpu.memory_space<vmem>>, %arg5: memref<1x16x16x128xf32, #tpu.memory_space<vmem>>) attributes {dimension_semantics = [#tpu.dimension_semantics<parallel>, #tpu.dimension_semantics<arbitrary>], iteration_bounds = array<i64: 2, 1>, scalar_prefetch = 0 : i64, scratch_operands = 0 : i64, tpu.core_type = #tpu.core_type<tc>, window_params = [{transform_indices = @transform_0, window_bounds = array<i64: 1, 18, 18, 128>}, {pipeline_mode = #tpu.pipeline_mode<synchronous>, transform_indices = @transform_1, window_bounds = array<i64: 1, 128>}, {pipeline_mode = #tpu.pipeline_mode<synchronous>, transform_indices = @transform_2, window_bounds = array<i64: 1, 128>}, {transform_indices = @transform_3, window_bounds = array<i64: 1, 16, 16, 128>}]} {
    %c16_i32 = arith.constant 16 : i32
    %0 = arith.muli %arg1, %c16_i32 : i32
    %c1_i32 = arith.constant 1 : i32
    %1 = arith.addi %0, %c1_i32 : i32
    %c0 = arith.constant 0 : index
    %2 = arith.index_cast %1 : i32 to index
    %c1 = arith.constant 1 : index
    %c0_0 = arith.constant 0 : index
    %3 = vector.load %arg2[%c0, %2, %c1, %c0_0] : memref<1x18x18x128xbf16, #tpu.memory_space<vmem>>, vector<1x16x16x128xbf16>
    %4 = vector.shape_cast %3 : vector<1x16x16x128xbf16> to vector<16x16x128xbf16>
    %5 = arith.extf %4 : vector<16x16x128xbf16> to vector<16x16x128xf32>
    %c0_1 = arith.constant 0 : index
    %c0_2 = arith.constant 0 : index
    %6 = vector.load %arg3[%c0_1, %c0_2] : memref<1x128xf32, #tpu.memory_space<vmem>>, vector<1x128xf32>
    %7 = vector.shape_cast %6 : vector<1x128xf32> to vector<1x1x128xf32>
    %8 = vector.broadcast %7 : vector<1x1x128xf32> to vector<16x16x128xf32>
    %9 = arith.mulf %5, %8 : vector<16x16x128xf32>
    %c0_3 = arith.constant 0 : index
    %c0_4 = arith.constant 0 : index
    %10 = vector.load %arg4[%c0_3, %c0_4] : memref<1x128xf32, #tpu.memory_space<vmem>>, vector<1x128xf32>
    %11 = vector.shape_cast %10 : vector<1x128xf32> to vector<1x1x128xf32>
    %12 = vector.broadcast %11 : vector<1x1x128xf32> to vector<16x16x128xf32>
    %13 = arith.addf %9, %12 : vector<16x16x128xf32>
    %cst = arith.constant 0.000000e+00 : f32
    %14 = vector.broadcast %cst : f32 to vector<16x16x128xf32>
    %15 = arith.maximumf %13, %14 : vector<16x16x128xf32>
    %c0_5 = arith.constant 0 : index
    %c0_6 = arith.constant 0 : index
    %c0_7 = arith.constant 0 : index
    %c0_8 = arith.constant 0 : index
    %16 = vector.load %arg5[%c0_5, %c0_6, %c0_7, %c0_8] : memref<1x16x16x128xf32, #tpu.memory_space<vmem>>, vector<1x16x16x128xf32>
    %17 = vector.shape_cast %16 : vector<1x16x16x128xf32> to vector<16x16x128xf32>
    %18 = vector.shape_cast %15 : vector<16x16x128xf32> to vector<1x16x16x128xf32>
    tpu.vector_store %arg5[%c0_5, %c0_6, %c0_7, %c0_8], %18 {strides = array<i32>} : memref<1x16x16x128xf32, #tpu.memory_space<vmem>>, vector<1x16x16x128xf32>,
    return
  }
  func.func @transform_0(%arg0: i32, %arg1: i32) -> (i32, i32, i32, i32) {
    %c0_i32 = arith.constant 0 : i32
    %c0_i32_0 = arith.constant 0 : i32
    %c0_i32_1 = arith.constant 0 : i32
    %c0_i32_2 = arith.constant 0 : i32
    return %arg0, %c0_i32, %c0_i32_0, %c0_i32_1 : i32, i32, i32, i32
  }
  func.func @transform_1(%arg0: i32, %arg1: i32) -> (i32, i32) {
    %c0_i32 = arith.constant 0 : i32
    %c0_i32_0 = arith.constant 0 : i32
    %c0_i32_1 = arith.constant 0 : i32
    return %c0_i32, %c0_i32_0 : i32, i32
  }
  func.func @transform_2(%arg0: i32, %arg1: i32) -> (i32, i32) {
    %c0_i32 = arith.constant 0 : i32
    %c0_i32_0 = arith.constant 0 : i32
    %c0_i32_1 = arith.constant 0 : i32
    return %c0_i32, %c0_i32_0 : i32, i32
  }
  func.func @transform_3(%arg0: i32, %arg1: i32) -> (i32, i32, i32, i32) {
    %c0_i32 = arith.constant 0 : i32
    %c0_i32_0 = arith.constant 0 : i32
    %c0_i32_1 = arith.constant 0 : i32
    return %arg0, %arg1, %c0_i32, %c0_i32_0 : i32, i32, i32, i32
  }
}

</mosaic_0001>

<bundles_post_ra>
// kernel: conv_block_forward.5
= control target key start
LH: loop header
LB: loop body
LE: loop exit
PB: predicated region body
PF: predicated region fallthrough
CT: control target
= control target key end

     0   :  { %s764_s12 = smov 0   ;;  %s766_s13 = smov 0   ;;  %s999_s0 = inlined_call_operand.vmem [shape: bf16[2,18,18,128], index: 0, kind: input, shape index: {}]   ;;  %s1000_s1 = inlined_call_operand.vmem [shape: f32[1,128], index: 1, kind: input, shape index: {}]   ;;  %s1001_s2 = inlined_call_operand.vmem [shape: f32[1,128], index: 2, kind: input, shape index: {}]   ;;  %s1002_s3 = inlined_call_operand.vmem [shape: f32[2,16,16,128], index: 3, kind: output, shape index: {}]  }
   0x1   :  { %s768_s14 = smov 0  }
   0x2 LB: > { %s25_s15 = sadd.s32 1, %s738_s13  ;;  %p598_p0 = scmp.ge.s32.totalorder %s742_s14, 1  ;;  %s742_s14 = sphi %s768_s14, %s13_s14   ;;  %s738_s13 = sphi %s766_s13, %s1004_s13   ;;  %s734_s12 = sphi %s764_s12, %s1003_s12  }
   0x3   : > { %p27_p1 = scmp.ge.s32.totalorder %s25_s15, 2  ;;  %p151_p2 = scmp.lt.s32.totalorder %s742_s14, 3 }
   0x5   : > { %s1006_s15 = smov (%p27_p1, %s25_s15), 0  ;;  %p152_p3 = pnand %p598_p0, %p151_p2 }
   0x6   : > { %p180_p4 = scmp.lt.s32.totalorder (!%p152_p3), %s734_s12, 1  ;;  %v793_v0 = vld [vmem:[%s1000_s1] ss:$0 sm:$0xff] (!%p152_p3) }
   0x7   : > { %155 = sbr.rel (%p152_p3) target bundleno = 71 (0x47), region = 32  ;;  %v803_v10 = vld [vmem:[%s1001_s2] ss:$0 sm:$0xff] (!%p152_p3) }
   0xe   : > { %s1008_s12 = smov (!%p180_p4, %s734_s12), 1 }
   0xf   : > { %s695_s16 = smul.u32 216, %s1008_s12  ;;  %s654_s24 = sshll.u32 %s1008_s12, 8 }
  0x10   : > { %s822_s27 = scalar_lea.vmem %s1002_s3, %s654_s24 }
  0x11   : > { %s788_s19 = scalar_lea.vmem %s999_s0, %s695_s16 }
  0x12   : > { %v602_v1 = vld [vmem:[%s788_s19 + $0xc] sm:$0xff]   ;;  %v604_v2 = vld [vmem:[%s788_s19 + $0x14] sm:$0x1]  ;;  %v687_v3 = vld [vmem:[%s788_s19 + $0x18] sm:$0xff]  }
  0x13   : > { %v249_v4 = vunpack.c.l.bf16 %v602_v1  ;;  %v250_v5 = vunpack.c.h.bf16 %v602_v1  ;;  %v251_v6 = vunpack.c.l.bf16 %v604_v2  ;;  %v657_v7 = vunpack.c.l.bf16 %v687_v3  ;;  %v607_v8 = vld [vmem:[%s788_s19 + $0x20] sm:$0x1]  ;;  %v608_v9 = vld [vmem:[%s788_s19 + $0x24] sm:$0xff]   ;;  %v610_v27 = vld [vmem:[%s788_s19 + $0x2c] sm:$0x1] }
  0x14   : > { %v658_v11 = vunpack.c.h.bf16 %v687_v3  ;;  %v254_v12 = vunpack.c.l.bf16 %v607_v8  ;;  %v255_v13 = vunpack.c.l.bf16 %v608_v9  ;;  %v256_v14 = vunpack.c.h.bf16 %v608_v9  ;;  %v688_v32 = vld [vmem:[%s788_s19 + $0x30] sm:$0xff]   ;;  %v613_v33 = vld [vmem:[%s788_s19 + $0x38] sm:$0x1]  ;;  %v616_v34 = vld [vmem:[%s788_s19 + $0x44] sm:$0x1] }
  0x15   : > { %v304_v15 = vmul.f32 %v793_v0, %v249_v4  ;;  %v305_v16 = vmul.f32 %v793_v0, %v250_v5  ;;  %v306_v17 = vmul.f32 %v793_v0, %v251_v6  ;;  %v307_v18 = vmul.f32 %v657_v7, %v793_v0  ;;  %v614_v39 = vld [vmem:[%s788_s19 + $0x3c] sm:$0xff]   ;;  %v833_v40 = vld [vmem:[%s788_s19 + $0x48] sm:$0xff]   ;;  %v619_v2 = vld [vmem:[%s788_s19 + $0x50] sm:$0x1] }
  0x16   : > { %v308_v19 = vmul.f32 %v658_v11, %v793_v0  ;;  %v309_v20 = vmul.f32 %v793_v0, %v254_v12  ;;  %v310_v21 = vmul.f32 %v793_v0, %v255_v13  ;;  %v311_v22 = vmul.f32 %v793_v0, %v256_v14  ;;  %v620_v7 = vld [vmem:[%s788_s19 + $0x54] sm:$0xff]   ;;  %v622_v8 = vld [vmem:[%s788_s19 + $0x5c] sm:$0x1]  ;;  %v690_v9 = vld [vmem:[%s788_s19 + $0x60] sm:$0xff]  }
  0x17   : > { %v359_v23 = vadd.f32 %v803_v10, %v304_v15  ;;  %v360_v24 = vadd.f32 %v803_v10, %v305_v16  ;;  %v361_v25 = vadd.f32 %v803_v10, %v306_v17  ;;  %v362_v26 = vadd.f32 %v803_v10, %v307_v18  ;;  %v625_v15 = vld [vmem:[%s788_s19 + $0x68] sm:$0x1] }
  0x18   : > { %v363_v28 = vadd.f32 %v803_v10, %v308_v19  ;;  %v364_v29 = vadd.f32 %v803_v10, %v309_v20  ;;  %v365_v30 = vadd.f32 %v803_v10, %v310_v21  ;;  %v366_v31 = vadd.f32 %v803_v10, %v311_v22 }
  0x19   : > { %v407_v35 = vmax.f32 %v359_v23, 0.0  ;;  %v408_v36 = vmax.f32 %v360_v24, 0.0  ;;  %v409_v37 = vmax.f32 %v361_v25, 0.0  ;;  %v410_v38 = vmax.f32 %v362_v26, 0.0 }
  0x1a   : > { %v411_v41 = vmax.f32 %v363_v28, 0.0  ;;  %v412_v42 = vmax.f32 %v364_v29, 0.0  ;;  %v413_v43 = vmax.f32 %v365_v30, 0.0  ;;  %v414_v44 = vmax.f32 %v366_v31, 0.0 }
  0x1b   : > { %455 = vst [vmem:[%s822_s27 - $0x1] sm:$0xfe] %v407_v35  ;;  %456 = vst [vmem:[%s822_s27 + $0x7] sm:$0xff] %v408_v36  ;;  %v257_v45 = vunpack.c.l.bf16 %v610_v27  ;;  %v661_v46 = vunpack.c.l.bf16 %v688_v32  ;;  %v662_v47 = vunpack.c.h.bf16 %v688_v32  ;;  %v260_v48 = vunpack.c.l.bf16 %v613_v33 }
  0x1c   : > { %457 = vst [vmem:[%s822_s27 + $0xf] sm:$0x1] %v409_v37  ;;  %458 = vst [vmem:[%s822_s27 + $0xf] sm:$0xfe] %v410_v38  ;;  %v261_v49 = vunpack.c.l.bf16 %v614_v39  ;;  %v262_v50 = vunpack.c.h.bf16 %v614_v39  ;;  %v263_v51 = vunpack.c.l.bf16 %v616_v34  ;;  %v665_v52 = vunpack.c.l.bf16 %v833_v40 }
  0x1d   : > { %459 = vst [vmem:[%s822_s27 + $0x17] sm:$0xff] %v411_v41  ;;  %460 = vst [vmem:[%s822_s27 + $0x1f] sm:$0x1] %v412_v42  ;;  %v312_v53 = vmul.f32 %v793_v0, %v257_v45  ;;  %v313_v54 = vmul.f32 %v661_v46, %v793_v0  ;;  %v314_v55 = vmul.f32 %v662_v47, %v793_v0  ;;  %v666_v20 = vunpack.c.h.bf16 %v833_v40  ;;  %v626_v40 = vld [vmem:[%s788_s19 + $0x6c] sm:$0xff]   ;;  %v628_v45 = vld [vmem:[%s788_s19 + $0x74] sm:$0x1] }
  0x1e   : > { %461 = vst [vmem:[%s822_s27 + $0x1f] sm:$0xfe] %v413_v43  ;;  %462 = vst [vmem:[%s822_s27 + $0x27] sm:$0xff] %v414_v44  ;;  %v315_v56 = vmul.f32 %v793_v0, %v260_v48  ;;  %v316_v57 = vmul.f32 %v793_v0, %v261_v49  ;;  %v317_v58 = vmul.f32 %v793_v0, %v262_v50  ;;  %v266_v21 = vunpack.c.l.bf16 %v619_v2  ;;  %v691_v46 = vld [vmem:[%s788_s19 + $0x78] sm:$0xff]   ;;  %v631_v47 = vld [vmem:[%s788_s19 + $0x80] sm:$0x1] }
  0x1f   : > { %v318_v59 = vmul.f32 %v793_v0, %v263_v51  ;;  %v319_v60 = vmul.f32 %v665_v52, %v793_v0  ;;  %v367_v61 = vadd.f32 %v803_v10, %v312_v53  ;;  %v368_v62 = vadd.f32 %v803_v10, %v313_v54  ;;  %v632_v52 = vld [vmem:[%s788_s19 + $0x84] sm:$0xff]  }
  0x20   : > { %v369_v63 = vadd.f32 %v803_v10, %v314_v55  ;;  %v370_v1 = vadd.f32 %v803_v10, %v315_v56  ;;  %v371_v3 = vadd.f32 %v803_v10, %v316_v57  ;;  %v372_v4 = vadd.f32 %v803_v10, %v317_v58 }
  0x21   : > { %v373_v5 = vadd.f32 %v803_v10, %v318_v59  ;;  %v374_v6 = vadd.f32 %v803_v10, %v319_v60  ;;  %v415_v11 = vmax.f32 %v367_v61, 0.0  ;;  %v416_v12 = vmax.f32 %v368_v62, 0.0 }
  0x22   : > { %v417_v13 = vmax.f32 %v369_v63, 0.0  ;;  %v418_v14 = vmax.f32 %v370_v1, 0.0  ;;  %v419_v16 = vmax.f32 %v371_v3, 0.0  ;;  %v420_v17 = vmax.f32 %v372_v4, 0.0 }
  0x23   : > { %v421_v18 = vmax.f32 %v373_v5, 0.0  ;;  %v422_v19 = vmax.f32 %v374_v6, 0.0  ;;  %463 = vst [vmem:[%s822_s27 + $0x2f] sm:$0x1] %v415_v11  ;;  %464 = vst [vmem:[%s822_s27 + $0x2f] sm:$0xfe] %v416_v12  ;;  %v267_v22 = vunpack.c.l.bf16 %v620_v7  ;;  %v268_v23 = vunpack.c.h.bf16 %v620_v7 }
  0x24   : > { %465 = vst [vmem:[%s822_s27 + $0x37] sm:$0xff] %v417_v13  ;;  %466 = vst [vmem:[%s822_s27 + $0x3f] sm:$0x1] %v418_v14  ;;  %v269_v24 = vunpack.c.l.bf16 %v622_v8  ;;  %v669_v25 = vunpack.c.l.bf16 %v690_v9  ;;  %v670_v26 = vunpack.c.h.bf16 %v690_v9  ;;  %v272_v27 = vunpack.c.l.bf16 %v625_v15  ;;  %v634_v15 = vld [vmem:[%s788_s19 + $0x8c] sm:$0x1] }
  0x25   : > { %467 = vst [vmem:[%s822_s27 + $0x3f] sm:$0xfe] %v419_v16  ;;  %468 = vst [vmem:[%s822_s27 + $0x47] sm:$0xff] %v420_v17  ;;  %v320_v28 = vmul.f32 %v666_v20, %v793_v0  ;;  %v321_v29 = vmul.f32 %v793_v0, %v266_v21  ;;  %v322_v30 = vmul.f32 %v793_v0, %v267_v22  ;;  %v273_v57 = vunpack.c.l.bf16 %v626_v40  ;;  %v692_v20 = vld [vmem:[%s788_s19 + $0x90] sm:$0xff]   ;;  %v637_v21 = vld [vmem:[%s788_s19 + $0x98] sm:$0x1] }
  0x26   : > { %469 = vst [vmem:[%s822_s27 + $0x4f] sm:$0x1] %v421_v18  ;;  %470 = vst [vmem:[%s822_s27 + $0x4f] sm:$0xfe] %v422_v19  ;;  %v323_v31 = vmul.f32 %v793_v0, %v268_v23  ;;  %v324_v32 = vmul.f32 %v793_v0, %v269_v24  ;;  %v325_v33 = vmul.f32 %v669_v25, %v793_v0  ;;  %v274_v58 = vunpack.c.h.bf16 %v626_v40  ;;  %v640_v22 = vld [vmem:[%s788_s19 + $0xa4] sm:$0x1] }
  0x27   : > { %v326_v34 = vmul.f32 %v670_v26, %v793_v0  ;;  %v327_v35 = vmul.f32 %v793_v0, %v272_v27  ;;  %v375_v36 = vadd.f32 %v803_v10, %v320_v28  ;;  %v376_v37 = vadd.f32 %v803_v10, %v321_v29  ;;  %v638_v27 = vld [vmem:[%s788_s19 + $0x9c] sm:$0xff]   ;;  %v925_v28 = vld [vmem:[%s788_s19 + $0xa8] sm:$0xff]  }
  0x28   : > { %v377_v38 = vadd.f32 %v803_v10, %v322_v30  ;;  %v378_v39 = vadd.f32 %v803_v10, %v323_v31  ;;  %v379_v41 = vadd.f32 %v803_v10, %v324_v32  ;;  %v380_v42 = vadd.f32 %v803_v10, %v325_v33 }
  0x29   : > { %v381_v43 = vadd.f32 %v803_v10, %v326_v34  ;;  %v382_v44 = vadd.f32 %v803_v10, %v327_v35  ;;  %v423_v48 = vmax.f32 %v375_v36, 0.0  ;;  %v424_v49 = vmax.f32 %v376_v37, 0.0 }
  0x2a   : > { %v425_v50 = vmax.f32 %v377_v38, 0.0  ;;  %v426_v51 = vmax.f32 %v378_v39, 0.0  ;;  %v427_v53 = vmax.f32 %v379_v41, 0.0  ;;  %v428_v54 = vmax.f32 %v380_v42, 0.0 }
  0x2b   : > { %v429_v55 = vmax.f32 %v381_v43, 0.0  ;;  %v430_v56 = vmax.f32 %v382_v44, 0.0  ;;  %471 = vst [vmem:[%s822_s27 + $0x57] sm:$0xff] %v423_v48  ;;  %472 = vst [vmem:[%s822_s27 + $0x5f] sm:$0x1] %v424_v49  ;;  %v275_v59 = vunpack.c.l.bf16 %v628_v45  ;;  %v673_v60 = vunpack.c.l.bf16 %v691_v46 }
  0x2c   : > { %473 = vst [vmem:[%s822_s27 + $0x5f] sm:$0xfe] %v425_v50  ;;  %474 = vst [vmem:[%s822_s27 + $0x67] sm:$0xff] %v426_v51  ;;  %v674_v61 = vunpack.c.h.bf16 %v691_v46  ;;  %v278_v62 = vunpack.c.l.bf16 %v631_v47  ;;  %v279_v63 = vunpack.c.l.bf16 %v632_v52  ;;  %v280_v1 = vunpack.c.h.bf16 %v632_v52 }
  0x2d   : > { %475 = vst [vmem:[%s822_s27 + $0x6f] sm:$0x1] %v427_v53  ;;  %476 = vst [vmem:[%s822_s27 + $0x6f] sm:$0xfe] %v428_v54  ;;  %v328_v2 = vmul.f32 %v793_v0, %v273_v57  ;;  %v329_v3 = vmul.f32 %v793_v0, %v274_v58  ;;  %v330_v4 = vmul.f32 %v793_v0, %v275_v59  ;;  %v281_v33 = vunpack.c.l.bf16 %v634_v15  ;;  %v643_v53 = vld [vmem:[%s788_s19 + $0xb0] sm:$0x1] }
  0x2e   : > { %477 = vst [vmem:[%s822_s27 + $0x77] sm:$0xff] %v429_v55  ;;  %478 = vst [vmem:[%s822_s27 + $0x7f] sm:$0x1] %v430_v56  ;;  %v331_v5 = vmul.f32 %v673_v60, %v793_v0  ;;  %v332_v6 = vmul.f32 %v674_v61, %v793_v0  ;;  %v333_v7 = vmul.f32 %v793_v0, %v278_v62  ;;  %v677_v34 = vunpack.c.l.bf16 %v692_v20  ;;  %v644_v58 = vld [vmem:[%s788_s19 + $0xb4] sm:$0xff]   ;;  %v646_v59 = vld [vmem:[%s788_s19 + $0xbc] sm:$0x1] }
  0x2f   : > { %v334_v8 = vmul.f32 %v793_v0, %v279_v63  ;;  %v335_v9 = vmul.f32 %v793_v0, %v280_v1  ;;  %v383_v11 = vadd.f32 %v803_v10, %v328_v2  ;;  %v384_v12 = vadd.f32 %v803_v10, %v329_v3  ;;  %v694_v60 = vld [vmem:[%s788_s19 + $0xc0] sm:$0xff]   ;;  %v649_v2 = vld [vmem:[%s788_s19 + $0xc8] sm:$0x1] }
  0x30   : > { %v385_v13 = vadd.f32 %v803_v10, %v330_v4  ;;  %v386_v14 = vadd.f32 %v803_v10, %v331_v5  ;;  %v387_v16 = vadd.f32 %v803_v10, %v332_v6  ;;  %v388_v17 = vadd.f32 %v803_v10, %v333_v7 }
  0x31   : > { %v389_v18 = vadd.f32 %v803_v10, %v334_v8  ;;  %v390_v19 = vadd.f32 %v803_v10, %v335_v9  ;;  %v431_v23 = vmax.f32 %v383_v11, 0.0  ;;  %v432_v24 = vmax.f32 %v384_v12, 0.0 }
  0x32   : > { %v433_v25 = vmax.f32 %v385_v13, 0.0  ;;  %v434_v26 = vmax.f32 %v386_v14, 0.0  ;;  %v435_v29 = vmax.f32 %v387_v16, 0.0  ;;  %v436_v30 = vmax.f32 %v388_v17, 0.0 }
  0x33   : > { %v437_v31 = vmax.f32 %v389_v18, 0.0  ;;  %v438_v32 = vmax.f32 %v390_v19, 0.0  ;;  %479 = vst [vmem:[%s822_s27 + $0x7f] sm:$0xfe] %v431_v23  ;;  %480 = vst [vmem:[%s822_s27 + $0x87] sm:$0xff] %v432_v24  ;;  %v678_v35 = vunpack.c.h.bf16 %v692_v20  ;;  %v284_v36 = vunpack.c.l.bf16 %v637_v21 }
  0x34   : > { %481 = vst [vmem:[%s822_s27 + $0x8f] sm:$0x1] %v433_v25  ;;  %482 = vst [vmem:[%s822_s27 + $0x8f] sm:$0xfe] %v434_v26  ;;  %v285_v37 = vunpack.c.l.bf16 %v638_v27  ;;  %v286_v38 = vunpack.c.h.bf16 %v638_v27  ;;  %v287_v39 = vunpack.c.l.bf16 %v640_v22  ;;  %v681_v40 = vunpack.c.l.bf16 %v925_v28 }
  0x35   : > { %483 = vst [vmem:[%s822_s27 + $0x97] sm:$0xff] %v435_v29  ;;  %484 = vst [vmem:[%s822_s27 + $0x9f] sm:$0x1] %v436_v30  ;;  %v336_v41 = vmul.f32 %v793_v0, %v281_v33  ;;  %v337_v42 = vmul.f32 %v677_v34, %v793_v0  ;;  %v338_v43 = vmul.f32 %v678_v35, %v793_v0  ;;  %v682_v7 = vunpack.c.h.bf16 %v925_v28 }
  0x36   : > { %485 = vst [vmem:[%s822_s27 + $0x9f] sm:$0xfe] %v437_v31  ;;  %486 = vst [vmem:[%s822_s27 + $0xa7] sm:$0xff] %v438_v32  ;;  %v339_v44 = vmul.f32 %v793_v0, %v284_v36  ;;  %v340_v45 = vmul.f32 %v793_v0, %v285_v37  ;;  %v341_v46 = vmul.f32 %v793_v0, %v286_v38  ;;  %v290_v8 = vunpack.c.l.bf16 %v643_v53 }
  0x37   : > { %v342_v47 = vmul.f32 %v793_v0, %v287_v39  ;;  %v343_v48 = vmul.f32 %v681_v40, %v793_v0  ;;  %v391_v49 = vadd.f32 %v803_v10, %v336_v41  ;;  %v392_v50 = vadd.f32 %v803_v10, %v337_v42 }
  0x38   : > { %v393_v51 = vadd.f32 %v803_v10, %v338_v43  ;;  %v394_v52 = vadd.f32 %v803_v10, %v339_v44  ;;  %v395_v54 = vadd.f32 %v803_v10, %v340_v45  ;;  %v396_v55 = vadd.f32 %v803_v10, %v341_v46 }
  0x39   : > { %v397_v56 = vadd.f32 %v803_v10, %v342_v47  ;;  %v398_v57 = vadd.f32 %v803_v10, %v343_v48  ;;  %v439_v61 = vmax.f32 %v391_v49, 0.0  ;;  %v440_v62 = vmax.f32 %v392_v50, 0.0 }
  0x3a   : > { %v441_v63 = vmax.f32 %v393_v51, 0.0  ;;  %v442_v1 = vmax.f32 %v394_v52, 0.0  ;;  %v443_v3 = vmax.f32 %v395_v54, 0.0  ;;  %v444_v4 = vmax.f32 %v396_v55, 0.0 }
  0x3b   : > { %v445_v5 = vmax.f32 %v397_v56, 0.0  ;;  %v446_v6 = vmax.f32 %v398_v57, 0.0  ;;  %487 = vst [vmem:[%s822_s27 + $0xaf] sm:$0x1] %v439_v61  ;;  %488 = vst [vmem:[%s822_s27 + $0xaf] sm:$0xfe] %v440_v62  ;;  %v291_v9 = vunpack.c.l.bf16 %v644_v58  ;;  %v292_v11 = vunpack.c.h.bf16 %v644_v58 }
  0x3c   : > { %489 = vst [vmem:[%s822_s27 + $0xb7] sm:$0xff] %v441_v63  ;;  %490 = vst [vmem:[%s822_s27 + $0xbf] sm:$0x1] %v442_v1  ;;  %v293_v12 = vunpack.c.l.bf16 %v646_v59  ;;  %v685_v13 = vunpack.c.l.bf16 %v694_v60  ;;  %v686_v14 = vunpack.c.h.bf16 %v694_v60  ;;  %v296_v15 = vunpack.c.l.bf16 %v649_v2 }
  0x3d   : > { %491 = vst [vmem:[%s822_s27 + $0xbf] sm:$0xfe] %v443_v3  ;;  %492 = vst [vmem:[%s822_s27 + $0xc7] sm:$0xff] %v444_v4  ;;  %v344_v16 = vmul.f32 %v682_v7, %v793_v0  ;;  %v345_v17 = vmul.f32 %v793_v0, %v290_v8  ;;  %v346_v18 = vmul.f32 %v793_v0, %v291_v9 }
  0x3e   : > { %493 = vst [vmem:[%s822_s27 + $0xcf] sm:$0x1] %v445_v5  ;;  %494 = vst [vmem:[%s822_s27 + $0xcf] sm:$0xfe] %v446_v6  ;;  %v347_v19 = vmul.f32 %v793_v0, %v292_v11  ;;  %v348_v20 = vmul.f32 %v793_v0, %v293_v12  ;;  %v349_v21 = vmul.f32 %v685_v13, %v793_v0 }
  0x3f   : > { %v350_v22 = vmul.f32 %v686_v14, %v793_v0  ;;  %v351_v23 = vmul.f32 %v793_v0, %v296_v15  ;;  %v399_v24 = vadd.f32 %v803_v10, %v344_v16  ;;  %v400_v25 = vadd.f32 %v803_v10, %v345_v17 }
  0x40   : > { %v401_v26 = vadd.f32 %v803_v10, %v346_v18  ;;  %v402_v27 = vadd.f32 %v803_v10, %v347_v19  ;;  %v403_v28 = vadd.f32 %v803_v10, %v348_v20  ;;  %v404_v29 = vadd.f32 %v803_v10, %v349_v21 }
  0x41   : > { %v405_v0 = vadd.f32 %v803_v10, %v350_v22  ;;  %v406_v30 = vadd.f32 %v803_v10, %v351_v23  ;;  %v447_v31 = vmax.f32 %v399_v24, 0.0  ;;  %v448_v32 = vmax.f32 %v400_v25, 0.0 }
  0x42   : > { %v449_v33 = vmax.f32 %v401_v26, 0.0  ;;  %v450_v34 = vmax.f32 %v402_v27, 0.0  ;;  %v451_v35 = vmax.f32 %v403_v28, 0.0  ;;  %v452_v36 = vmax.f32 %v404_v29, 0.0 }
  0x43   : > { %v453_v37 = vmax.f32 %v405_v0, 0.0  ;;  %v454_v38 = vmax.f32 %v406_v30, 0.0  ;;  %495 = vst [vmem:[%s822_s27 + $0xd7] sm:$0xff] %v447_v31  ;;  %496 = vst [vmem:[%s822_s27 + $0xdf] sm:$0x1] %v448_v32 }
  0x44   : > { %497 = vst [vmem:[%s822_s27 + $0xdf] sm:$0xfe] %v449_v33  ;;  %498 = vst [vmem:[%s822_s27 + $0xe7] sm:$0xff] %v450_v34 }
  0x45   : > { %499 = vst [vmem:[%s822_s27 + $0xef] sm:$0x1] %v451_v35  ;;  %500 = vst [vmem:[%s822_s27 + $0xef] sm:$0xfe] %v452_v36 }
  0x46   : > { %501 = vst [vmem:[%s822_s27 + $0xf7] sm:$0xff] %v453_v37  ;;  %502 = vst [vmem:[%s822_s27 + $0xff] sm:$0x1] %v454_v38 }
  0x47 PF: > { %s13_s14 = sadd.s32 1, %s742_s14   ;;  %s1003_s12 = smov %s738_s13 }
  0x48   : > { %p10_p5 = scmp.ge.s32.totalorder %s13_s14, 4   ;;  %s1004_s13 = smov %s1006_s15 }
  0x4a   :  { %12 = sbr.rel (!%p10_p5) target bundleno = 2 (0x2), region = 63 }

// kernel: conv_block_forward.3
= control target key start
LH: loop header
LB: loop body
LE: loop exit
PB: predicated region body
PF: predicated region fallthrough
CT: control target
= control target key end

     0   :  { %s1769_s18 = smov 0   ;;  %s1771_s19 = smov 0   ;;  %s2219_s0 = inlined_call_operand.vmem [shape: bf16[2,16,16,36], index: 0, kind: input, shape index: {}]   ;;  %s2220_s1 = inlined_call_operand.vmem [shape: bf16[36,128], index: 1, kind: input, shape index: {}]   ;;  %s2221_s2 = inlined_call_operand.vmem [shape: f32[1,128], index: 2, kind: input, shape index: {}]   ;;  %s2222_s3 = inlined_call_operand.vmem [shape: bf16[2,18,18,128], index: 3, kind: output, shape index: {0}]   ;;  %s2223_s4 = inlined_call_operand.vmem [shape: f32[2,1,1,128], index: 4, kind: output, shape index: {1}]   ;;  %s2224_s5 = inlined_call_operand.vmem [shape: f32[2,1,1,128], index: 5, kind: output, shape index: {2}]  }
   0x1   :  { %s1773_s20 = smov 0  }
   0x2 LB: > { %s28_s21 = sadd.s32 1, %s1733_s19  ;;  %p1419_p0 = scmp.ge.s32.totalorder %s1737_s20, 1  ;;  %s1737_s20 = sphi %s1773_s20, %s16_s20   ;;  %s1733_s19 = sphi %s1771_s19, %s2232_s19   ;;  %s1729_s18 = sphi %s1769_s18, %s2231_s18  }
   0x3   : > { %p30_p1 = scmp.ge.s32.totalorder %s28_s21, 2  ;;  %p208_p2 = scmp.lt.s32.totalorder %s1737_s20, 3 }
   0x5   : > { %s2234_s21 = smov (%p30_p1, %s28_s21), 0  ;;  %p209_p3 = pnand %p1419_p0, %p208_p2 }
   0x6   : > { %v1696_v0 = vld [vmem:[%s2220_s1] sm:$0xff] (!%p209_p3)   ;;  %v1697_v1 = vld [vmem:[%s2220_s1 + $0x8] sm:$0xff] (!%p209_p3)   ;;  %p248_p4 = scmp.lt.s32.totalorder (!%p209_p3), %s1729_s18, 1  ;;  %v1698_v2 = vld [vmem:[%s2220_s1 + $0x10] ss:$0 sps:$4 sm:$0x33] (!%p209_p3)  }
   0x7   : > { %212 = sbr.rel (%p209_p3) target bundleno = 339 (0x153), region = 32  ;;  %1625 = vmatprep.subr.bf16.mxu0 (!%p209_p3), %v1696_v0  ;;  %1663 = vmatprep.subr.bf16.mxu1 (!%p209_p3), %v1696_v0  ;;  %vm463_vm0 = vcmask (!%p209_p3), 1041408   ;;  %vm414_vm1 = vcmask (!%p209_p3), 293888   ;;  %v1839_v20 = vld [vmem:[%s2221_s2] ss:$0 sm:$0xff] (!%p209_p3)  ;;  %vm1051_vm2 = vcmask (!%p209_p3), 1043456  }
   0x8   : > { %1626 = vmatpush3.bf16.msra.mxu0 (!%p209_p3), %v1696_v0  ;;  %1666 = vmatpush3.bf16.msra.mxu1 (!%p209_p3), %v1696_v0  ;;  %v465_v4 = vsel (!%p209_p3), %vm463_vm0, %v1698_v2, 0  ;;  %vm1052_vm3 = vsmask.f32 (!%p209_p3), 7938  ;;  %vm725_vm4 = vsmask.f32 (!%p209_p3), 256  ;;  %vm1058_vm6 = vcmask (!%p209_p3), 1040384  }
   0x9   : > { %1627 = vmatprep.subr.bf16.mxu0 (!%p209_p3), %v1697_v1  ;;  %1664 = vmatprep.subr.bf16.mxu1 (!%p209_p3), %v1697_v1  ;;  %vm726_vm5 = vsmask.f32 (!%p209_p3), 4368  ;;  %vm1865_vm7 = vmand (!%p209_p3), %vm1051_vm2, %vm1052_vm3 }
   0xa   : > { %vm1873_vm8 = vmor (!%p209_p3), %vm725_vm4, %vm726_vm5 }
   0xb   : > { %vm1879_vm9 = vmand (!%p209_p3), %vm1058_vm6, %vm725_vm4 }
   0xc   : > { %1628 = vmatpush3.bf16.msra.mxu0 (!%p209_p3), %v1697_v1  ;;  %1667 = vmatpush3.bf16.msra.mxu1 (!%p209_p3), %v1697_v1 }
   0xd   : > { %1669 = vmatprep.subr.msk.bf16.mxu0 (!%p209_p3), %vm463_vm0, %v1698_v2  ;;  %1670 = vmatprep.subr.msk.bf16.mxu1 (!%p209_p3), %vm463_vm0, %v1698_v2 }
   0xe   : > { %s2236_s18 = smov (!%p248_p4, %s1729_s18), 1 }
   0xf   : > { %s1573_s28 = sshll.u32 %s2236_s18, 7  ;;  %s1671_s9 = smul.u32 216, %s2236_s18 }
  0x10   : > { %s1802_s6 = scalar_lea.vmem %s2219_s0, %s1573_s28  ;;  %1630 = vmatpush3.bf16.msra.mxu0 %v465_v4  ;;  %1668 = vmatpush3.bf16.msra.mxu1 %v465_v4  ;;  %s263_s15 = scalar_lea.vmem %s2223_s4, %s2236_s18 }
  0x11   : > { %v1699_v3 = vld [vmem:[%s1802_s6] sm:$0xff]   ;;  %v1700_v5 = vld [vmem:[%s1802_s6 + $0x8] sm:$0xff]   ;;  %v1701_v6 = vld [vmem:[%s1802_s6 + $0x10] sm:$0xff]   ;;  %s1853_s12 = scalar_lea.vmem %s2222_s3, %s1671_s9  ;;  %s269_s22 = scalar_lea.vmem %s2224_s5, %s2236_s18 }
  0x12   : > { %1631 = vmatprep.mubr.msk.bf16.mxu0 %vm414_vm1, %v1699_v3  ;;  %v1707_v7 = vld [vmem:[%s1802_s6 + $0x40] sm:$0xff]   ;;  %v1708_v8 = vld [vmem:[%s1802_s6 + $0x48] sm:$0xff]   ;;  %v1709_v9 = vld [vmem:[%s1802_s6 + $0x50] sm:$0xff]  }
  0x13   : > { %1632 = vmatmul.mubr.msk.bf16.vlgmr.msra.gmra.mrb[0].mxu0 %vm414_vm1, %v1700_v5  ;;  %1647 = vmatprep.mubr.msk.bf16.mxu1 %vm414_vm1, %v1707_v7  ;;  %v1702_v10 = vld [vmem:[%s1802_s6 + $0x18] sm:$0xff]   ;;  %v1703_v11 = vld [vmem:[%s1802_s6 + $0x20] sm:$0xff]   ;;  %v1704_v14 = vld [vmem:[%s1802_s6 + $0x28] sm:$0xff]  }
  0x14   : > { %1635 = vmatprep.mubr.msk.bf16.mxu0 %vm414_vm1, %v1701_v6  ;;  %1648 = vmatmul.mubr.msk.bf16.vlgmr.msra.gmra.mrb[0].mxu1 %vm414_vm1, %v1708_v8  ;;  %v1710_v12 = vld [vmem:[%s1802_s6 + $0x58] sm:$0xff]   ;;  %v1711_v13 = vld [vmem:[%s1802_s6 + $0x60] sm:$0xff]   ;;  %v1705_v15 = vld [vmem:[%s1802_s6 + $0x30] sm:$0xff]  }
  0x15   : > { %1651 = vmatprep.mubr.msk.bf16.mxu1 %vm414_vm1, %v1709_v9  ;;  %v1712_v16 = vld [vmem:[%s1802_s6 + $0x68] sm:$0xff]   ;;  %v1713_v17 = vld [vmem:[%s1802_s6 + $0x70] sm:$0xff]   ;;  %v1706_v18 = vld [vmem:[%s1802_s6 + $0x38] sm:$0xff]  }
  0x16   : > { %v1714_v19 = vld [vmem:[%s1802_s6 + $0x78] sm:$0xff]   ;;  %v1491_v57 = vld [vmem:[%s1853_s12 + $0xc] sm:$0xf]  ;;  %v1499_v1 = vld [vmem:[%s1853_s12 + $0x20] sm:$0x1] }
  0x17   : > { %v1496_v49 = vld [vmem:[%s1853_s12 + $0x18] sm:$0xf]  ;;  %v1494_v8 = vld [vmem:[%s1853_s12 + $0x14] sm:$0x1] }
  0x1b   : > { %1636 = vmatmul.mubr.msk.bf16.gmra.mrb[4].mxu0 %vm414_vm1, %v1702_v10 }
  0x1c   : > { %1639 = vmatprep.mubr.msk.bf16.mxu0 %vm414_vm1, %v1703_v11  ;;  %1652 = vmatmul.mubr.msk.bf16.gmra.mrb[4].mxu1 %vm414_vm1, %v1710_v12 }
  0x1d   : > { %1655 = vmatprep.mubr.msk.bf16.mxu1 %vm414_vm1, %v1711_v13 }
  0x23   : > { %1640 = vmatmul.mubr.msk.bf16.gmra.mrb[8].mxu0 %vm414_vm1, %v1704_v14 }
  0x24   : > { %1643 = vmatprep.mubr.msk.bf16.mxu0 %vm414_vm1, %v1705_v15  ;;  %1656 = vmatmul.mubr.msk.bf16.gmra.mrb[8].mxu1 %vm414_vm1, %v1712_v16 }
  0x25   : > { %1659 = vmatprep.mubr.msk.bf16.mxu1 %vm414_vm1, %v1713_v17 }
  0x2b   : > { %1644 = vmatmul.mubr.msk.bf16.gmra.mrb[12].mxu0 %vm414_vm1, %v1706_v18 }
  0x2c   : > { %1660 = vmatmul.mubr.msk.bf16.gmra.mrb[12].mxu1 %vm414_vm1, %v1714_v19 }
  0xe6   : > { %v1633_v21 = vpop.f32.mrb[0].mxu0 }
  0xe7   : > { %v510_v22 = vadd.f32 %v1633_v21, %v1839_v20  ;;  %v501_v23 = vpop.f32.mrb[1].mxu0  ;;  %v1848_v32 = vpop.f32.mrb[0].mxu1 }
  0xe8   : > { %v502_v24 = vadd.f32 %v1839_v20, %v501_v23  ;;  %v1634_v25 = vpop.f32.mrb[2].mxu0  ;;  %v1857_v37 = vpop.f32.mrb[1].mxu1 }
  0xe9   : > { %v1576_v26 = vpack.c.bf16 %v510_v22, %v510_v22  ;;  %v1845_v27 = vadd.f32 %v1634_v25, %v1839_v20  ;;  %v504_v28 = vpop.f32.mrb[3].mxu0  ;;  %v1208_v29 = vmul.f32 %v510_v22, %v510_v22  ;;  %v1859_v42 = vpop.f32.mrb[2].mxu1 }
  0xea   : > { %v1574_v30 = vpack.c.bf16 %v502_v24, %v502_v24  ;;  %v505_v31 = vadd.f32 %v1839_v20, %v504_v28  ;;  %v1206_v35 = vmul.f32 %v502_v24, %v502_v24  ;;  %v1861_v47 = vpop.f32.mrb[3].mxu1 }
  0xeb   : > { %v746_v33 = vshrl.u32 %v1576_v26, 16  ;;  %v749_v34 = vshll.u32 %v1576_v26, 16  ;;  %v1577_v36 = vpack.c.bf16 %v1845_v27, %v1845_v27  ;;  %v1209_v18 = vmul.f32 %v1845_v27, %v1845_v27 }
  0xec   : > { %v729_v38 = vshrl.u32 %v1574_v30, 16  ;;  %v732_v39 = vshll.u32 %v1574_v30, 16  ;;  %v1575_v40 = vpack.c.bf16 %v505_v31, %v505_v31  ;;  %v1168_v41 = vadd.f32 %v505_v31, %v502_v24 }
  0xed   : > { %v748_v43 = vrot.slane %v746_v33, 7  ;;  %v754_v44 = vshrl.u32 %v1577_v36, 16  ;;  %v757_v45 = vshll.u32 %v1577_v36, 16  ;;  %v1207_v46 = vmul.f32 %v505_v31, %v505_v31 }
  0xee   : > { %v731_v50 = vrot.slane %v729_v38, 7  ;;  %v737_v51 = vshrl.u32 %v1575_v40, 16  ;;  %v740_v52 = vshll.u32 %v1575_v40, 16  ;;  %v1169_v53 = vadd.f32 %v1168_v41, %v510_v22  ;;  %v1637_v54 = vpop.f32.mrb[4].mxu0  ;;  %v1506_v40 = vld [vmem:[%s1853_s12 + $0x30] sm:$0xf] }
  0xef   : > { %v751_v55 = vor.u32 %v749_v34, %v748_v43  ;;  %v752_v56 = vrot.slane %v748_v43, 4  ;;  %v756_v59 = vrot.slane %v754_v44, 7  ;;  %v1238_v60 = vadd.f32 %v1207_v46, %v1206_v35  ;;  %v517_v61 = vpop.f32.mrb[5].mxu0  ;;  %v1895_v15 = vpop.f32.mrb[4].mxu1 }
  0xf0   : > { %v734_v62 = vor.u32 %v732_v39, %v731_v50  ;;  %v735_v63 = vrot.slane %v731_v50, 4  ;;  %v739_v2 = vrot.slane %v737_v51, 7  ;;  %v1885_v3 = vadd.f32 %v1637_v54, %v1839_v20  ;;  %v1638_v4 = vpop.f32.mrb[6].mxu0  ;;  %v1905_v21 = vpop.f32.mrb[5].mxu1 }
  0xf1   : > { %v1064_v5 = vsel %vm1865_vm7, %v751_v55, %v1496_v49  ;;  %v759_v6 = vor.u32 %v757_v45, %v756_v59  ;;  %v761_v7 = vrot.slane %v756_v59, 4  ;;  %v1239_v9 = vadd.f32 %v1238_v60, %v1208_v29  ;;  %v520_v10 = vpop.f32.mrb[7].mxu0  ;;  %v1915_v26 = vpop.f32.mrb[6].mxu1  ;;  %v1501_v60 = vld [vmem:[%s1853_s12 + $0x24] sm:$0xf] }
  0xf2   : > { %1497 = vst [vmem:[%s1853_s12 + $0x18] sm:$0xf] %v1064_v5  ;;  %v1055_v11 = vsel %vm1865_vm7, %v734_v62, %v1491_v57  ;;  %v742_v12 = vor.u32 %v740_v52, %v739_v2  ;;  %v744_v13 = vrot.slane %v739_v2, 4  ;;  %v1580_v14 = vpack.c.bf16 %v1885_v3, %v1885_v3  ;;  %v1920_v33 = vpop.f32.mrb[7].mxu1 }
  0xf3   : > { %1492 = vst [vmem:[%s1853_s12 + $0xc] sm:$0xf] %v1055_v11  ;;  %v760_v16 = vsel %vm1873_vm8, %v752_v56, %v759_v6  ;;  %v1068_v17 = vsel %vm1879_vm9, %v761_v7, %v1499_v1  ;;  %v518_v19 = vadd.f32 %v1839_v20, %v517_v61  ;;  %v1212_v25 = vmul.f32 %v1885_v3, %v1885_v3 }
  0xf4   : > { %1498 = vst [vmem:[%s1853_s12 + $0x1c] sm:$0xf] %v760_v16  ;;  %1500 = vst [vmem:[%s1853_s12 + $0x20] sm:$0x1] %v1068_v17  ;;  %v743_v22 = vsel %vm1873_vm8, %v735_v63, %v742_v12  ;;  %v1061_v23 = vsel %vm1879_vm9, %v744_v13, %v1494_v8  ;;  %v780_v24 = vshrl.u32 %v1580_v14, 16  ;;  %v1170_v29 = vadd.f32 %v1169_v53, %v1845_v27 }
  0xf5   : > { %1493 = vst [vmem:[%s1853_s12 + $0x10] sm:$0xf] %v743_v22  ;;  %1495 = vst [vmem:[%s1853_s12 + $0x14] sm:$0x1] %v1061_v23  ;;  %v1578_v28 = vpack.c.bf16 %v518_v19, %v518_v19  ;;  %v1210_v30 = vmul.f32 %v518_v19, %v518_v19  ;;  %v1240_v31 = vadd.f32 %v1239_v9, %v1209_v18  ;;  %v783_v35 = vshll.u32 %v1580_v14, 16 }
  0xf6   : > { %v782_v34 = vrot.slane %v780_v24, 7  ;;  %v529_v36 = vadd.f32 %v1638_v4, %v1839_v20  ;;  %v521_v38 = vadd.f32 %v1839_v20, %v520_v10  ;;  %v1641_v39 = vpop.f32.mrb[8].mxu0  ;;  %v1171_v43 = vadd.f32 %v1170_v29, %v518_v19  ;;  %v1509_v13 = vld [vmem:[%s1853_s12 + $0x38] sm:$0x1]  ;;  %v1504_v22 = vld [vmem:[%s1853_s12 + $0x2c] sm:$0x1] }
  0xf7   : > { %v763_v41 = vshrl.u32 %v1578_v28, 16  ;;  %v1241_v44 = vadd.f32 %v1240_v31, %v1210_v30  ;;  %v533_v45 = vpop.f32.mrb[9].mxu0  ;;  %v1927_v27 = vadd.f32 %v1848_v32, %v1839_v20  ;;  %v766_v50 = vshll.u32 %v1578_v28, 16  ;;  %v1937_v63 = vpop.f32.mrb[8].mxu1 }
  0xf8   : > { %v785_v46 = vor.u32 %v783_v35, %v782_v34  ;;  %v786_v49 = vrot.slane %v782_v34, 4  ;;  %v1581_v51 = vpack.c.bf16 %v529_v36, %v529_v36  ;;  %v1929_v52 = vpop.f32.mrb[10].mxu0  ;;  %v1579_v54 = vpack.c.bf16 %v521_v38, %v521_v38  ;;  %v1940_v6 = vpop.f32.mrb[9].mxu1 }
  0xf9   : > { %v765_v53 = vrot.slane %v763_v41, 7  ;;  %v1172_v55 = vadd.f32 %v1171_v43, %v521_v38  ;;  %v1211_v56 = vmul.f32 %v521_v38, %v521_v38  ;;  %v536_v57 = vpop.f32.mrb[11].mxu0  ;;  %v1213_v32 = vmul.f32 %v529_v36, %v529_v36  ;;  %v1945_v11 = vpop.f32.mrb[10].mxu1 }
  0xfa   : > { %v1078_v59 = vsel %vm1865_vm7, %v785_v46, %v1506_v40  ;;  %v788_v61 = vshrl.u32 %v1581_v51, 16  ;;  %v1935_v62 = vadd.f32 %v1641_v39, %v1839_v20  ;;  %v791_v4 = vshll.u32 %v1581_v51, 16  ;;  %v1951_v18 = vpop.f32.mrb[11].mxu1 }
  0xfb   : > { %1507 = vst [vmem:[%s1853_s12 + $0x30] sm:$0xf] %v1078_v59  ;;  %v768_v1 = vor.u32 %v766_v50, %v765_v53  ;;  %v769_v2 = vrot.slane %v765_v53, 4  ;;  %v771_v5 = vshrl.u32 %v1579_v54, 16  ;;  %v1173_v8 = vadd.f32 %v1172_v55, %v1885_v3 }
  0xfc   : > { %v790_v7 = vrot.slane %v788_v61, 7  ;;  %v1242_v9 = vadd.f32 %v1241_v44, %v1211_v56  ;;  %v1584_v10 = vpack.c.bf16 %v1935_v62, %v1935_v62  ;;  %v774_v16 = vshll.u32 %v1579_v54, 16 }
  0xfd   : > { %v1071_v12 = vsel %vm1865_vm7, %v768_v1, %v1501_v60  ;;  %v773_v14 = vrot.slane %v771_v5, 7  ;;  %v534_v17 = vadd.f32 %v1839_v20, %v533_v45  ;;  %v1174_v41 = vadd.f32 %v1173_v8, %v529_v36  ;;  %v1516_v45 = vld [vmem:[%s1853_s12 + $0x48] sm:$0xf]  ;;  %v1511_v5 = vld [vmem:[%s1853_s12 + $0x3c] sm:$0xf] }
  0xfe   : > { %1502 = vst [vmem:[%s1853_s12 + $0x24] sm:$0xf] %v1071_v12  ;;  %v793_v19 = vor.u32 %v791_v4, %v790_v7  ;;  %v795_v3 = vrot.slane %v790_v7, 4  ;;  %v1243_v23 = vadd.f32 %v1242_v9, %v1212_v25  ;;  %v814_v24 = vshrl.u32 %v1584_v10, 16  ;;  %v1645_v28 = vpop.f32.mrb[12].mxu0 }
  0xff   : > { %v776_v29 = vor.u32 %v774_v16, %v773_v14  ;;  %v778_v30 = vrot.slane %v773_v14, 4  ;;  %v817_v31 = vshll.u32 %v1584_v10, 16  ;;  %v1582_v34 = vpack.c.bf16 %v534_v17, %v534_v17  ;;  %v549_v35 = vpop.f32.mrb[13].mxu0  ;;  %v1975_v55 = vpop.f32.mrb[12].mxu1 }
 0x100   : > { %v794_v38 = vsel %vm1873_vm8, %v786_v49, %v793_v19  ;;  %v1082_v39 = vsel %vm1879_vm9, %v795_v3, %v1509_v13  ;;  %v1959_v40 = vrot.slane %v814_v24, 7  ;;  %v1646_v25 = vpop.f32.mrb[14].mxu0  ;;  %v1216_v46 = vmul.f32 %v1935_v62, %v1935_v62  ;;  %v1980_v1 = vpop.f32.mrb[13].mxu1 }
 0x101   : > { %1508 = vst [vmem:[%s1853_s12 + $0x34] sm:$0xf] %v794_v38  ;;  %1510 = vst [vmem:[%s1853_s12 + $0x38] sm:$0x1] %v1082_v39  ;;  %v777_v43 = vsel %vm1873_vm8, %v769_v2, %v776_v29  ;;  %v1075_v44 = vsel %vm1879_vm9, %v778_v30, %v1504_v22  ;;  %v797_v49 = vshrl.u32 %v1582_v34, 16  ;;  %v1970_v50 = vpop.f32.mrb[15].mxu0  ;;  %v1175_v53 = vadd.f32 %v1174_v41, %v534_v17 }
 0x102   : > { %1503 = vst [vmem:[%s1853_s12 + $0x28] sm:$0xf] %v777_v43  ;;  %1505 = vst [vmem:[%s1853_s12 + $0x2c] sm:$0x1] %v1075_v44  ;;  %v819_v36 = vor.u32 %v817_v31, %v1959_v40  ;;  %v800_v51 = vshll.u32 %v1582_v34, 16  ;;  %v1214_v54 = vmul.f32 %v534_v17, %v534_v17  ;;  %v1244_v59 = vadd.f32 %v1243_v23, %v1213_v32  ;;  %v1990_v32 = vpop.f32.mrb[14].mxu1 }
 0x103   : > { %v799_v56 = vrot.slane %v797_v49, 7  ;;  %v545_v60 = vadd.f32 %v1929_v52, %v1839_v20  ;;  %v537_v61 = vadd.f32 %v1839_v20, %v536_v57  ;;  %v820_v2 = vrot.slane %v1959_v40, 4  ;;  %v1996_v12 = vpop.f32.mrb[15].mxu1  ;;  %v1519_v39 = vld [vmem:[%s1853_s12 + $0x50] sm:$0x1] }
 0x104   : > { %v1092_v4 = vsel %vm1865_vm7, %v819_v36, %v1516_v45  ;;  %v1987_v7 = vadd.f32 %v1645_v28, %v1839_v20  ;;  %v550_v8 = vadd.f32 %v1839_v20, %v549_v35  ;;  %v1245_v9 = vadd.f32 %v1244_v59, %v1214_v54  ;;  %v1514_v49 = vld [vmem:[%s1853_s12 + $0x44] sm:$0x1]  ;;  %v1526_v54 = vld [vmem:[%s1853_s12 + $0x60] sm:$0xf] }
 0x105   : > { %1517 = vst [vmem:[%s1853_s12 + $0x48] sm:$0xf] %v1092_v4  ;;  %v802_v52 = vor.u32 %v800_v51, %v799_v56  ;;  %v1585_v57 = vpack.c.bf16 %v545_v60, %v545_v60  ;;  %v1994_v10 = vadd.f32 %v1646_v25, %v1839_v20  ;;  %v803_v13 = vrot.slane %v799_v56, 4 }
 0x106   : > { %v1583_v14 = vpack.c.bf16 %v537_v61, %v537_v61  ;;  %v1176_v16 = vadd.f32 %v1175_v53, %v537_v61  ;;  %v1215_v17 = vmul.f32 %v537_v61, %v537_v61  ;;  %v1217_v22 = vmul.f32 %v545_v60, %v545_v60 }
 0x107   : > { %v1085_v19 = vsel %vm1865_vm7, %v802_v52, %v1511_v5  ;;  %v822_v3 = vshrl.u32 %v1585_v57, 16  ;;  %v1588_v23 = vpack.c.bf16 %v1987_v7, %v1987_v7  ;;  %v825_v24 = vshll.u32 %v1585_v57, 16 }
 0x108   : > { %1512 = vst [vmem:[%s1853_s12 + $0x3c] sm:$0xf] %v1085_v19  ;;  %v805_v28 = vshrl.u32 %v1583_v14, 16  ;;  %v1177_v29 = vadd.f32 %v1176_v16, %v1935_v62  ;;  %v1246_v30 = vadd.f32 %v1245_v9, %v1215_v17  ;;  %v808_v34 = vshll.u32 %v1583_v14, 16  ;;  %v1521_v16 = vld [vmem:[%s1853_s12 + $0x54] sm:$0xf] }
 0x109   : > { %v824_v31 = vrot.slane %v822_v3, 7  ;;  %v848_v35 = vshrl.u32 %v1588_v23, 16  ;;  %v851_v38 = vshll.u32 %v1588_v23, 16  ;;  %v1586_v25 = vpack.c.bf16 %v550_v8, %v550_v8 }
 0x10a   : > { %v807_v40 = vrot.slane %v805_v28, 7  ;;  %v1247_v41 = vadd.f32 %v1246_v30, %v1216_v46  ;;  %v1178_v43 = vadd.f32 %v1177_v29, %v545_v60  ;;  %v1220_v62 = vmul.f32 %v1987_v7, %v1987_v7 }
 0x10b   : > { %v827_v44 = vor.u32 %v825_v24, %v824_v31  ;;  %v829_v45 = vrot.slane %v824_v31, 4  ;;  %v850_v36 = vrot.slane %v848_v35, 7  ;;  %v831_v56 = vshrl.u32 %v1586_v25, 16 }
 0x10c   : > { %v810_v51 = vor.u32 %v808_v34, %v807_v40  ;;  %v812_v53 = vrot.slane %v807_v40, 4  ;;  %v1218_v59 = vmul.f32 %v550_v8, %v550_v8  ;;  %v834_v4 = vshll.u32 %v1586_v25, 16 }
 0x10d   : > { %v828_v46 = vsel %vm1873_vm8, %v820_v2, %v827_v44  ;;  %v1096_v60 = vsel %vm1879_vm9, %v829_v45, %v1519_v39  ;;  %v853_v61 = vor.u32 %v851_v38, %v850_v36  ;;  %v833_v9 = vrot.slane %v831_v56, 7 }
 0x10e   : > { %1518 = vst [vmem:[%s1853_s12 + $0x4c] sm:$0xf] %v828_v46  ;;  %1520 = vst [vmem:[%s1853_s12 + $0x50] sm:$0x1] %v1096_v60  ;;  %v811_v5 = vsel %vm1873_vm8, %v803_v13, %v810_v51  ;;  %v1089_v52 = vsel %vm1879_vm9, %v812_v53, %v1514_v49  ;;  %v1179_v57 = vadd.f32 %v1178_v43, %v550_v8  ;;  %v854_v14 = vrot.slane %v850_v36, 4 }
 0x10f   : > { %1513 = vst [vmem:[%s1853_s12 + $0x40] sm:$0xf] %v811_v5  ;;  %1515 = vst [vmem:[%s1853_s12 + $0x44] sm:$0x1] %v1089_v52  ;;  %v1106_v2 = vsel %vm1865_vm7, %v853_v61, %v1526_v54  ;;  %v1248_v17 = vadd.f32 %v1247_v41, %v1217_v22  ;;  %v1589_v19 = vpack.c.bf16 %v1994_v10, %v1994_v10  ;;  %v837_v24 = vrot.slane %v833_v9, 4 }
 0x110   : > { %1527 = vst [vmem:[%s1853_s12 + $0x60] sm:$0xf] %v1106_v2  ;;  %v836_v3 = vor.u32 %v834_v4, %v833_v9  ;;  %v1221_v13 = vmul.f32 %v1994_v10, %v1994_v10  ;;  %v553_v8 = vadd.f32 %v1839_v20, %v1970_v50  ;;  %v1592_v23 = vpack.c.bf16 %v1927_v27, %v1927_v27  ;;  %v1529_v41 = vld [vmem:[%s1853_s12 + $0x68] sm:$0x1]  ;;  %v1524_v61 = vld [vmem:[%s1853_s12 + $0x5c] sm:$0x1] }
 0x111   : > { %v1249_v28 = vadd.f32 %v1248_v17, %v1218_v59  ;;  %v856_v29 = vshrl.u32 %v1589_v19, 16  ;;  %v859_v30 = vshll.u32 %v1589_v19, 16  ;;  %v566_v50 = vadd.f32 %v1839_v20, %v1857_v37  ;;  %v1536_v37 = vld [vmem:[%s1853_s12 + $0x78] sm:$0xf] }
 0x112   : > { %v1099_v22 = vsel %vm1865_vm7, %v836_v3, %v1521_v16  ;;  %v1587_v31 = vpack.c.bf16 %v553_v8, %v553_v8  ;;  %v1180_v34 = vadd.f32 %v1179_v57, %v553_v8  ;;  %v1219_v35 = vmul.f32 %v553_v8, %v553_v8 }
 0x113   : > { %1522 = vst [vmem:[%s1853_s12 + $0x54] sm:$0xf] %v1099_v22  ;;  %v858_v38 = vrot.slane %v856_v29, 7  ;;  %v882_v39 = vshrl.u32 %v1592_v23, 16  ;;  %v885_v40 = vshll.u32 %v1592_v23, 16  ;;  %v1224_v45 = vmul.f32 %v1927_v27, %v1927_v27 }
 0x114   : > { %v839_v25 = vshrl.u32 %v1587_v31, 16  ;;  %v1181_v43 = vadd.f32 %v1180_v34, %v1987_v7  ;;  %v1250_v44 = vadd.f32 %v1249_v28, %v1219_v35  ;;  %v1590_v53 = vpack.c.bf16 %v566_v50, %v566_v50  ;;  %v1531_v28 = vld [vmem:[%s1853_s12 + $0x6c] sm:$0xf] }
 0x115   : > { %v861_v49 = vor.u32 %v859_v30, %v858_v38  ;;  %v863_v36 = vrot.slane %v858_v38, 4  ;;  %v2042_v51 = vrot.slane %v882_v39, 7  ;;  %v842_v56 = vshll.u32 %v1587_v31, 16 }
 0x116   : > { %v841_v54 = vrot.slane %v839_v25, 7  ;;  %v1251_v59 = vadd.f32 %v1250_v44, %v1220_v62  ;;  %v1182_v46 = vadd.f32 %v1181_v43, %v1994_v10  ;;  %v1222_v5 = vmul.f32 %v566_v50, %v566_v50 }
 0x117   : > { %v862_v7 = vsel %vm1873_vm8, %v854_v14, %v861_v49  ;;  %v1110_v60 = vsel %vm1879_vm9, %v863_v36, %v1529_v41  ;;  %v887_v4 = vor.u32 %v885_v40, %v2042_v51  ;;  %v865_v9 = vshrl.u32 %v1590_v53, 16  ;;  %v1539_v36 = vld [vmem:[%s1853_s12 + $0x80] sm:$0x1] }
 0x118   : > { %1528 = vst [vmem:[%s1853_s12 + $0x64] sm:$0xf] %v862_v7  ;;  %1530 = vst [vmem:[%s1853_s12 + $0x68] sm:$0x1] %v1110_v60  ;;  %v844_v52 = vor.u32 %v842_v56, %v841_v54  ;;  %v846_v62 = vrot.slane %v841_v54, 4  ;;  %v868_v10 = vshll.u32 %v1590_v53, 16  ;;  %v1183_v14 = vadd.f32 %v1182_v46, %v566_v50 }
 0x119   : > { %v1120_v57 = vsel %vm1865_vm7, %v887_v4, %v1536_v37  ;;  %v1252_v2 = vadd.f32 %v1251_v59, %v1221_v13  ;;  %v577_v16 = vadd.f32 %v1859_v42, %v1839_v20  ;;  %v867_v3 = vrot.slane %v865_v9, 7  ;;  %v1534_v37 = vld [vmem:[%s1853_s12 + $0x74] sm:$0x1] }
 0x11a   : > { %v845_v17 = vsel %vm1873_vm8, %v837_v24, %v844_v52  ;;  %v1103_v19 = vsel %vm1879_vm9, %v846_v62, %v1524_v61  ;;  %1537 = vst [vmem:[%s1853_s12 + $0x78] sm:$0xf] %v1120_v57  ;;  %v569_v8 = vadd.f32 %v1839_v20, %v1861_v47  ;;  %v888_v23 = vrot.slane %v2042_v51, 4  ;;  %v1546_v61 = vld [vmem:[%s1853_s12 + $0x90] sm:$0xf] }
 0x11b   : > { %1523 = vst [vmem:[%s1853_s12 + $0x58] sm:$0xf] %v845_v17  ;;  %1525 = vst [vmem:[%s1853_s12 + $0x5c] sm:$0x1] %v1103_v19  ;;  %v1253_v13 = vadd.f32 %v1252_v2, %v1222_v5  ;;  %v1593_v29 = vpack.c.bf16 %v577_v16, %v577_v16  ;;  %v2071_v42 = vadd.f32 %v1895_v15, %v1839_v20  ;;  %v871_v49 = vrot.slane %v867_v3, 4 }
 0x11c   : > { %v870_v24 = vor.u32 %v868_v10, %v867_v3  ;;  %v1225_v30 = vmul.f32 %v577_v16, %v577_v16  ;;  %v1591_v22 = vpack.c.bf16 %v569_v8, %v569_v8  ;;  %v1184_v31 = vadd.f32 %v1183_v14, %v569_v8 }
 0x11d   : > { %v890_v34 = vshrl.u32 %v1593_v29, 16  ;;  %v893_v35 = vshll.u32 %v1593_v29, 16  ;;  %v1223_v47 = vmul.f32 %v569_v8, %v569_v8  ;;  %v1596_v38 = vpack.c.bf16 %v2071_v42, %v2071_v42 }
 0x11e   : > { %v1113_v39 = vsel %vm1865_vm7, %v870_v24, %v1531_v28  ;;  %v873_v40 = vshrl.u32 %v1591_v22, 16  ;;  %v876_v50 = vshll.u32 %v1591_v22, 16  ;;  %v1185_v15 = vadd.f32 %v1184_v31, %v1927_v27 }
 0x11f   : > { %1532 = vst [vmem:[%s1853_s12 + $0x6c] sm:$0xf] %v1113_v39  ;;  %v892_v41 = vrot.slane %v890_v34, 7  ;;  %v1254_v25 = vadd.f32 %v1253_v13, %v1223_v47  ;;  %v916_v43 = vshrl.u32 %v1596_v38, 16  ;;  %v919_v44 = vshll.u32 %v1596_v38, 16 }
 0x120   : > { %v875_v51 = vrot.slane %v873_v40, 7  ;;  %v582_v53 = vadd.f32 %v1839_v20, %v1905_v21  ;;  %v1186_v54 = vadd.f32 %v1185_v15, %v577_v16  ;;  %v593_v19 = vadd.f32 %v1915_v26, %v1839_v20  ;;  %v1541_v13 = vld [vmem:[%s1853_s12 + $0x84] sm:$0xf] }
 0x121   : > { %v895_v56 = vor.u32 %v893_v35, %v892_v41  ;;  %v897_v59 = vrot.slane %v892_v41, 4  ;;  %v1255_v46 = vadd.f32 %v1254_v25, %v1224_v45  ;;  %v2083_v27 = vrot.slane %v916_v43, 7 }
 0x122   : > { %v878_v7 = vor.u32 %v876_v50, %v875_v51  ;;  %v880_v60 = vrot.slane %v875_v51, 4  ;;  %v1594_v4 = vpack.c.bf16 %v582_v53, %v582_v53  ;;  %v1187_v5 = vadd.f32 %v1186_v54, %v582_v53 }
 0x123   : > { %v896_v52 = vsel %vm1873_vm8, %v888_v23, %v895_v56  ;;  %v1124_v21 = vsel %vm1879_vm9, %v897_v59, %v1539_v36  ;;  %v921_v62 = vor.u32 %v919_v44, %v2083_v27  ;;  %v1228_v45 = vmul.f32 %v2071_v42, %v2071_v42  ;;  %v1549_v44 = vld [vmem:[%s1853_s12 + $0x98] sm:$0x1]  ;;  %v1544_v56 = vld [vmem:[%s1853_s12 + $0x8c] sm:$0x1] }
 0x124   : > { %1538 = vst [vmem:[%s1853_s12 + $0x7c] sm:$0xf] %v896_v52  ;;  %1540 = vst [vmem:[%s1853_s12 + $0x80] sm:$0x1] %v1124_v21  ;;  %v879_v9 = vsel %vm1873_vm8, %v871_v49, %v878_v7  ;;  %v1117_v10 = vsel %vm1879_vm9, %v880_v60, %v1534_v37  ;;  %v899_v57 = vshrl.u32 %v1594_v4, 16  ;;  %v902_v14 = vshll.u32 %v1594_v4, 16 }
 0x125   : > { %1533 = vst [vmem:[%s1853_s12 + $0x70] sm:$0xf] %v879_v9  ;;  %1535 = vst [vmem:[%s1853_s12 + $0x74] sm:$0x1] %v1117_v10  ;;  %v1134_v2 = vsel %vm1865_vm7, %v921_v62, %v1546_v61  ;;  %v1226_v16 = vmul.f32 %v582_v53, %v582_v53  ;;  %v1256_v17 = vadd.f32 %v1255_v46, %v1225_v30  ;;  %v922_v3 = vrot.slane %v2083_v27, 4 }
 0x126   : > { %1547 = vst [vmem:[%s1853_s12 + $0x90] sm:$0xf] %v1134_v2  ;;  %v901_v8 = vrot.slane %v899_v57, 7  ;;  %v585_v23 = vadd.f32 %v1839_v20, %v1920_v33  ;;  %v2111_v28 = vadd.f32 %v1937_v63, %v1839_v20  ;;  %v1597_v24 = vpack.c.bf16 %v593_v19, %v593_v19  ;;  %v1556_v27 = vld [vmem:[%s1853_s12 + $0xa8] sm:$0xf] }
 0x127   : > { %v1257_v29 = vadd.f32 %v1256_v17, %v1226_v16  ;;  %v1229_v22 = vmul.f32 %v593_v19, %v593_v19  ;;  %v598_v30 = vadd.f32 %v1839_v20, %v1940_v6  ;;  %v2118_v35 = vadd.f32 %v1945_v11, %v1839_v20  ;;  %v1551_v57 = vld [vmem:[%s1853_s12 + $0x9c] sm:$0xf] }
 0x128   : > { %v904_v26 = vor.u32 %v902_v14, %v901_v8  ;;  %v1595_v31 = vpack.c.bf16 %v585_v23, %v585_v23  ;;  %v1188_v34 = vadd.f32 %v1187_v5, %v585_v23  ;;  %v924_v33 = vshrl.u32 %v1597_v24, 16 }
 0x129   : > { %v927_v47 = vshll.u32 %v1597_v24, 16  ;;  %v1227_v63 = vmul.f32 %v585_v23, %v585_v23  ;;  %v1600_v38 = vpack.c.bf16 %v2111_v28, %v2111_v28  ;;  %v905_v43 = vrot.slane %v901_v8, 4 }
 0x12a   : > { %v1127_v39 = vsel %vm1865_vm7, %v904_v26, %v1541_v13  ;;  %v907_v40 = vshrl.u32 %v1595_v31, 16  ;;  %v910_v6 = vshll.u32 %v1595_v31, 16  ;;  %v1189_v50 = vadd.f32 %v1188_v34, %v2071_v42 }
 0x12b   : > { %1542 = vst [vmem:[%s1853_s12 + $0x84] sm:$0xf] %v1127_v39  ;;  %v926_v15 = vrot.slane %v924_v33, 7  ;;  %v1258_v41 = vadd.f32 %v1257_v29, %v1227_v63  ;;  %v950_v11 = vshrl.u32 %v1600_v38, 16  ;;  %v953_v25 = vshll.u32 %v1600_v38, 16 }
 0x12c   : > { %v909_v49 = vrot.slane %v907_v40, 7  ;;  %v1598_v36 = vpack.c.bf16 %v598_v30, %v598_v30  ;;  %v1190_v51 = vadd.f32 %v1189_v50, %v593_v19  ;;  %v1232_v52 = vmul.f32 %v2111_v28, %v2111_v28  ;;  %v1559_v63 = vld [vmem:[%s1853_s12 + $0xb0] sm:$0x1] }
 0x12d   : > { %v929_v53 = vor.u32 %v927_v47, %v926_v15  ;;  %v931_v54 = vrot.slane %v926_v15, 4  ;;  %v1259_v59 = vadd.f32 %v1258_v41, %v1228_v45  ;;  %v952_v37 = vrot.slane %v950_v11, 7 }
 0x12e   : > { %v912_v42 = vor.u32 %v910_v6, %v909_v49  ;;  %v914_v46 = vrot.slane %v909_v49, 4  ;;  %v933_v7 = vshrl.u32 %v1598_v36, 16  ;;  %v936_v60 = vshll.u32 %v1598_v36, 16  ;;  %v1554_v36 = vld [vmem:[%s1853_s12 + $0xa4] sm:$0x1] }
 0x12f   : > { %v930_v61 = vsel %vm1873_vm8, %v922_v3, %v929_v53  ;;  %v1138_v4 = vsel %vm1879_vm9, %v931_v54, %v1549_v44  ;;  %v955_v5 = vor.u32 %v953_v25, %v952_v37  ;;  %v1191_v9 = vadd.f32 %v1190_v51, %v598_v30 }
 0x130   : > { %1548 = vst [vmem:[%s1853_s12 + $0x94] sm:$0xf] %v930_v61  ;;  %1550 = vst [vmem:[%s1853_s12 + $0x98] sm:$0x1] %v1138_v4  ;;  %v913_v21 = vsel %vm1873_vm8, %v905_v43, %v912_v42  ;;  %v1131_v62 = vsel %vm1879_vm9, %v914_v46, %v1544_v56  ;;  %v935_v45 = vrot.slane %v933_v7, 7  ;;  %v1230_v14 = vmul.f32 %v598_v30, %v598_v30 }
 0x131   : > { %1543 = vst [vmem:[%s1853_s12 + $0x88] sm:$0xf] %v913_v21  ;;  %1545 = vst [vmem:[%s1853_s12 + $0x8c] sm:$0x1] %v1131_v62  ;;  %v1148_v10 = vsel %vm1865_vm7, %v955_v5, %v1556_v27  ;;  %v1260_v2 = vadd.f32 %v1259_v59, %v1229_v22  ;;  %v1601_v16 = vpack.c.bf16 %v2118_v35, %v2118_v35  ;;  %v956_v17 = vrot.slane %v952_v37, 4 }
 0x132   : > { %1557 = vst [vmem:[%s1853_s12 + $0xa8] sm:$0xf] %v1148_v10  ;;  %v938_v19 = vor.u32 %v936_v60, %v935_v45  ;;  %v939_v3 = vrot.slane %v935_v45, 4  ;;  %v601_v8 = vadd.f32 %v1839_v20, %v1951_v18  ;;  %v622_v24 = vadd.f32 %v1975_v55, %v1839_v20  ;;  %v1566_v56 = vld [vmem:[%s1853_s12 + $0xc0] sm:$0xf] }
 0x133   : > { %v1261_v23 = vadd.f32 %v1260_v2, %v1230_v14  ;;  %v958_v13 = vshrl.u32 %v1601_v16, 16  ;;  %v961_v29 = vshll.u32 %v1601_v16, 16  ;;  %v1233_v33 = vmul.f32 %v2118_v35, %v2118_v35  ;;  %v1561_v5 = vld [vmem:[%s1853_s12 + $0xb4] sm:$0xf] }
 0x134   : > { %v1141_v22 = vsel %vm1865_vm7, %v938_v19, %v1551_v57  ;;  %v1599_v30 = vpack.c.bf16 %v601_v8, %v601_v8  ;;  %v1192_v26 = vadd.f32 %v1191_v9, %v601_v8  ;;  %v1231_v31 = vmul.f32 %v601_v8, %v601_v8 }
 0x135   : > { %1552 = vst [vmem:[%s1853_s12 + $0x9c] sm:$0xf] %v1141_v22  ;;  %v960_v34 = vrot.slane %v958_v13, 7  ;;  %v1604_v47 = vpack.c.bf16 %v622_v24, %v622_v24  ;;  %v614_v18 = vadd.f32 %v1839_v20, %v1980_v1  ;;  %v625_v61 = vadd.f32 %v1990_v32, %v1839_v20  ;;  %v1569_v13 = vld [vmem:[%s1853_s12 + $0xc8] sm:$0x1] }
 0x136   : > { %v941_v38 = vshrl.u32 %v1599_v30, 16  ;;  %v944_v39 = vshll.u32 %v1599_v30, 16  ;;  %v1193_v55 = vadd.f32 %v1192_v26, %v2111_v28  ;;  %v1262_v40 = vadd.f32 %v1261_v23, %v1231_v31 }
 0x137   : > { %v963_v6 = vor.u32 %v961_v29, %v960_v34  ;;  %v965_v50 = vrot.slane %v960_v34, 4  ;;  %v984_v15 = vshrl.u32 %v1604_v47, 16  ;;  %v987_v41 = vshll.u32 %v1604_v47, 16  ;;  %v1564_v34 = vld [vmem:[%s1853_s12 + $0xbc] sm:$0x1] }
 0x138   : > { %v943_v11 = vrot.slane %v941_v38, 7  ;;  %v1263_v25 = vadd.f32 %v1262_v40, %v1232_v52  ;;  %v1602_v43 = vpack.c.bf16 %v614_v18, %v614_v18  ;;  %v1194_v44 = vadd.f32 %v1193_v55, %v2118_v35 }
 0x139   : > { %v964_v1 = vsel %vm1873_vm8, %v956_v17, %v963_v6  ;;  %v1152_v49 = vsel %vm1879_vm9, %v965_v50, %v1559_v63  ;;  %v986_v28 = vrot.slane %v984_v15, 7  ;;  %v1234_v51 = vmul.f32 %v614_v18, %v614_v18 }
 0x13a   : > { %1558 = vst [vmem:[%s1853_s12 + $0xac] sm:$0xf] %v964_v1  ;;  %1560 = vst [vmem:[%s1853_s12 + $0xb0] sm:$0x1] %v1152_v49  ;;  %v946_v53 = vor.u32 %v944_v39, %v943_v11  ;;  %v948_v54 = vrot.slane %v943_v11, 4  ;;  %v967_v59 = vshrl.u32 %v1602_v43, 16  ;;  %v1195_v42 = vadd.f32 %v1194_v44, %v614_v18 }
 0x13b   : > { %v970_v35 = vshll.u32 %v1602_v43, 16  ;;  %v989_v37 = vor.u32 %v987_v41, %v986_v28  ;;  %v1264_v46 = vadd.f32 %v1263_v25, %v1233_v33  ;;  %v617_v21 = vadd.f32 %v1839_v20, %v1996_v12 }
 0x13c   : > { %v947_v27 = vsel %vm1873_vm8, %v939_v3, %v946_v53  ;;  %v1145_v7 = vsel %vm1879_vm9, %v948_v54, %v1554_v36  ;;  %v969_v60 = vrot.slane %v967_v59, 7  ;;  %v1605_v45 = vpack.c.bf16 %v625_v61, %v625_v61 }
 0x13d   : > { %1553 = vst [vmem:[%s1853_s12 + $0xa0] sm:$0xf] %v947_v27  ;;  %1555 = vst [vmem:[%s1853_s12 + $0xa4] sm:$0x1] %v1145_v7  ;;  %v1162_v4 = vsel %vm1865_vm7, %v989_v37, %v1566_v56  ;;  %v1265_v52 = vadd.f32 %v1264_v46, %v1234_v51  ;;  %v1603_v9 = vpack.c.bf16 %v617_v21, %v617_v21  ;;  %v990_v20 = vrot.slane %v986_v28, 4 }
 0x13e   : > { %1567 = vst [vmem:[%s1853_s12 + $0xc0] sm:$0xf] %v1162_v4  ;;  %v972_v62 = vor.u32 %v970_v35, %v969_v60  ;;  %v1196_v10 = vadd.f32 %v1195_v42, %v617_v21  ;;  %v1235_v57 = vmul.f32 %v617_v21, %v617_v21  ;;  %v1236_v14 = vmul.f32 %v622_v24, %v622_v24 }
 0x13f   : > { %v992_v2 = vshrl.u32 %v1605_v45, 16  ;;  %v995_v16 = vshll.u32 %v1605_v45, 16  ;;  %v975_v17 = vshrl.u32 %v1603_v9, 16  ;;  %v978_v19 = vshll.u32 %v1603_v9, 16 }
 0x140   : > { %v1155_v32 = vsel %vm1865_vm7, %v972_v62, %v1561_v5  ;;  %v1197_v3 = vadd.f32 %v1196_v10, %v622_v24  ;;  %v1266_v8 = vadd.f32 %v1265_v52, %v1235_v57  ;;  %v973_v12 = vrot.slane %v969_v60, 4 }
 0x141   : > { %1562 = vst [vmem:[%s1853_s12 + $0xb4] sm:$0xf] %v1155_v32  ;;  %v994_v23 = vrot.slane %v992_v2, 7  ;;  %v1237_v29 = vmul.f32 %v625_v61, %v625_v61  ;;  %v977_v22 = vrot.slane %v975_v17, 7 }
 0x142   : > { %v1198_v30 = vadd.f32 %v1197_v3, %v625_v61  ;;  %v1267_v26 = vadd.f32 %v1266_v8, %v1236_v14 }
 0x143   : > { %v997_v48 = vor.u32 %v995_v16, %v994_v23  ;;  %v999_v31 = vrot.slane %v994_v23, 4  ;;  %v980_v33 = vor.u32 %v978_v19, %v977_v22  ;;  %v982_v47 = vrot.slane %v977_v22, 4 }
 0x144   : > { %v1199_v18 = vrot.slane %v1198_v30, 4  ;;  %v1268_v24 = vadd.f32 %v1267_v26, %v1237_v29 }
 0x145   : > { %v998_v63 = vsel %vm1873_vm8, %v990_v20, %v997_v48  ;;  %v1166_v38 = vsel %vm1879_vm9, %v999_v31, %v1569_v13  ;;  %v981_v39 = vsel %vm1873_vm8, %v973_v12, %v980_v33  ;;  %v1159_v55 = vsel %vm1879_vm9, %v982_v47, %v1564_v34 }
 0x146   : > { %1568 = vst [vmem:[%s1853_s12 + $0xc4] sm:$0xf] %v998_v63  ;;  %1570 = vst [vmem:[%s1853_s12 + $0xc8] sm:$0x1] %v1166_v38  ;;  %v1200_v40 = vadd.f32 %v1199_v18, %v1198_v30  ;;  %v1269_v6 = vrot.slane %v1268_v24, 4 }
 0x147   : > { %1563 = vst [vmem:[%s1853_s12 + $0xb8] sm:$0xf] %v981_v39  ;;  %1565 = vst [vmem:[%s1853_s12 + $0xbc] sm:$0x1] %v1159_v55 }
 0x148   : > { %v1201_v50 = vrot.slane %v1200_v40, 2  ;;  %v1270_v15 = vadd.f32 %v1269_v6, %v1268_v24 }
 0x14a   : > { %v1202_v41 = vadd.f32 %v1201_v50, %v1200_v40  ;;  %v1271_v11 = vrot.slane %v1270_v15, 2 }
 0x14c   : > { %v1203_v25 = vrot.slane %v1202_v41, 1  ;;  %v1272_v43 = vadd.f32 %v1271_v11, %v1270_v15 }
 0x14e   : > { %v1204_v58 = vadd.f32 %v1203_v25, %v1202_v41  ;;  %v1273_v44 = vrot.slane %v1272_v43, 1 }
 0x150   : > { %1205 = vst [vmem:[%s263_s15] sm:$0x1] %v1204_v58  ;;  %v1274_v0 = vadd.f32 %v1273_v44, %v1272_v43 }
 0x152   : > { %1275 = vst [vmem:[%s269_s22] sm:$0x1] %v1274_v0 }
 0x153 PF: > { %s16_s20 = sadd.s32 1, %s1737_s20   ;;  %s2231_s18 = smov %s1733_s19 }
 0x154   : > { %p13_p5 = scmp.ge.s32.totalorder %s16_s20, 4   ;;  %s2232_s19 = smov %s2234_s21 }
 0x156   :  { %15 = sbr.rel (!%p13_p5) target bundleno = 2 (0x2), region = 88 }

// kernel: conv_block_forward.4
= control target key start
LH: loop header
LB: loop body
LE: loop exit
PB: predicated region body
PF: predicated region fallthrough
CT: control target
= control target key end

     0   :  { %s6948_s24 = smov 0   ;;  %s6950_s25 = smov 0   ;;  %s9575_s0 = inlined_call_operand.vmem [shape: bf16[2,18,18,128], index: 0, kind: input, shape index: {}]   ;;  %s9576_s1 = inlined_call_operand.vmem [shape: bf16[3,384,128], index: 1, kind: input, shape index: {}]   ;;  %s9577_s2 = inlined_call_operand.vmem [shape: f32[1,128], index: 2, kind: input, shape index: {}]   ;;  %s9578_s3 = inlined_call_operand.vmem [shape: f32[1,128], index: 3, kind: input, shape index: {}]   ;;  %s9579_s4 = inlined_call_operand.vmem [shape: f32[1,128], index: 4, kind: input, shape index: {}]   ;;  %s9580_s5 = inlined_call_operand.vmem [shape: bf16[2,18,18,128], index: 5, kind: output, shape index: {0}]   ;;  %s9581_s6 = inlined_call_operand.vmem [shape: f32[2,1,1,128], index: 6, kind: output, shape index: {1}]   ;;  %s9582_s7 = inlined_call_operand.vmem [shape: f32[2,1,1,128], index: 7, kind: output, shape index: {2}]  }
   0x1   :  { %s6952_s26 = smov 0  }
   0x2 LB: > { %s30_s27 = sadd.s32 1, %s6899_s25  ;;  %p5376_p0 = scmp.ge.s32.totalorder %s6903_s26, 1  ;;  %s6903_s26 = sphi %s6952_s26, %s18_s26   ;;  %s6899_s25 = sphi %s6950_s25, %s9735_s25   ;;  %s6895_s24 = sphi %s6948_s24, %s9734_s24  }
   0x3   : > { %p32_p1 = scmp.ge.s32.totalorder %s30_s27, 2  ;;  %p258_p2 = scmp.lt.s32.totalorder %s6903_s26, 3 }
   0x5   : > { %s9737_s27 = smov (%p32_p1, %s30_s27), 0  ;;  %p259_p3 = pnand %p5376_p0, %p258_p2 }
   0x7   : > { %262 = sbr.rel (%p259_p3) target bundleno = 643 (0x283), region = 40 }
   0xe   : > { %v6801_v0 = vld [vmem:[%s9576_s1 + $0x100] sm:$0xff]   ;;  %v6804_v3 = vld [vmem:[%s9576_s1 + $0x108] sm:$0xff]   ;;  %v6807_v6 = vld [vmem:[%s9576_s1 + $0x110] sm:$0xff]   ;;  %p302_p4 = scmp.lt.s32.totalorder %s6895_s24, 1  ;;  %v328_v14 = vlaneseq  ;;  %v6905_v30 = vmov 0   ;;  %vm1163_vm2 = vcmask 1046528  }
   0xf   : > { %v6974_v1 = vld [vmem:[%s9576_s1 + $0x140] sm:$0xff]   ;;  %6045 = vmatprep.subr.bf16.mxu0 %v6801_v0  ;;  %v6987_v4 = vld [vmem:[%s9576_s1 + $0x148] sm:$0xff]   ;;  %v6999_v7 = vld [vmem:[%s9576_s1 + $0x150] sm:$0xff]   ;;  %v7093_v31 = vrot.slane %v6905_v30, 1  ;;  %vm922_vm3 = vsmask.f32 7424 }
  0x10   : > { %v6803_v2 = vld [vmem:[%s9576_s1 + $0xc0] sm:$0xff]   ;;  %6597 = vmatprep.subr.bf16.mxu1 %v6974_v1  ;;  %v6806_v5 = vld [vmem:[%s9576_s1 + $0xc8] sm:$0xff]   ;;  %v6809_v8 = vld [vmem:[%s9576_s1 + $0xd0] sm:$0xff]   ;;  %s9739_s24 = smov (!%p302_p4, %s6895_s24), 1  ;;  %v7044_v18 = vshrl.u32 %v328_v14, 7  ;;  %vm6906_vm4 = vmmov 1  }
  0x11   : > { %6046 = vmatpush3.bf16.msra.mxu0 %v6803_v2  ;;  %6605 = vmatpush3.bf16.msra.mxu1 %v6974_v1  ;;  %v6810_v9 = vld [vmem:[%s9576_s1 + $0x118] sm:$0xff]   ;;  %v6813_v12 = vld [vmem:[%s9576_s1 + $0x120] sm:$0xff]   ;;  %v6816_v16 = vld [vmem:[%s9576_s1 + $0x128] sm:$0xff]   ;;  %s6773_s20 = smul.u32 216, %s9739_s24  ;;  %9635 = vst [vmem:[#allocation2_spill] sm:$0xff] %v7093_v31  ;;  %vm5000_vm6 = vcmask 1043456   ;;  %s317_s22 = scalar_lea.vmem %s9581_s6, %s9739_s24 }
  0x12   : > { %6047 = vmatprep.subr.bf16.mxu0 %v6804_v3  ;;  %6598 = vmatprep.subr.bf16.mxu1 %v6987_v4  ;;  %v7012_v10 = vld [vmem:[%s9576_s1 + $0x158] sm:$0xff]   ;;  %v7026_v13 = vld [vmem:[%s9576_s1 + $0x160] sm:$0xff]   ;;  %v7042_v17 = vld [vmem:[%s9576_s1 + $0x168] sm:$0xff]   ;;  %v7061_v22 = vadd.s32 16, %v7044_v18  ;;  %vm332_vm0 = vcmp.ge.s32.totalorder %v7044_v18, 1  ;;  %vm5007_vm9 = vcmask 1040384   ;;  %s323_s29 = scalar_lea.vmem %s9582_s7, %s9739_s24 }
  0x13   : > { %v6812_v11 = vld [vmem:[%s9576_s1 + $0xd8] sm:$0xff]   ;;  %v6815_v15 = vld [vmem:[%s9576_s1 + $0xe0] sm:$0xff]   ;;  %v6818_v19 = vld [vmem:[%s9576_s1 + $0xe8] sm:$0xff]   ;;  %s7068_s10 = scalar_lea.vmem %s9575_s0, %s6773_s20  ;;  %vm5001_vm7 = vsmask.f32 7938  ;;  %s9089_s17 = scalar_lea.vmem %s9580_s5, %s6773_s20 }
  0x14   : > { %v6819_v20 = vld [vmem:[%s9576_s1 + $0x130] sm:$0xff]   ;;  %v6822_v24 = vld [vmem:[%s9576_s1 + $0x138] sm:$0xff]   ;;  %v7085_v26 = vld [vmem:[%s9578_s3] ss:$0 sm:$0xff]  ;;  %vm337_vm1 = vcmp.le.s32.totalorder %v7061_v22, 16 }
  0x15   : > { %6048 = vmatpush3.bf16.msra.mxu0 %v6806_v5  ;;  %6606 = vmatpush3.bf16.msra.mxu1 %v6987_v4  ;;  %v7058_v21 = vld [vmem:[%s9576_s1 + $0x170] sm:$0xff]   ;;  %v7080_v25 = vld [vmem:[%s9576_s1 + $0x178] sm:$0xff]   ;;  %v5410_v38 = vld [vmem:[%s7068_s10 + $0x80] sm:$0x1]  ;;  %vm4675_vm8 = vsmask.f32 256 }
  0x16   : > { %6049 = vmatprep.subr.bf16.mxu0 %v6807_v6  ;;  %6599 = vmatprep.subr.bf16.mxu1 %v6999_v7  ;;  %v6821_v23 = vld [vmem:[%s9576_s1 + $0xf0] sm:$0xff]   ;;  %v6033_v37 = vld [vmem:[%s7068_s10 + $0x78] sm:$0xff]   ;;  %v7101_v39 = vld [vmem:[%s9579_s4] ss:$0 sm:$0xff]  ;;  %v1501_v48 = vunpack.c.l.bf16 %v5410_v38  ;;  %vm4676_vm10 = vsmask.f32 4368 }
  0x17   : > { %v5381_v27 = vld [vmem:[%s7068_s10 + $0xc] sm:$0xff]   ;;  %v5383_v28 = vld [vmem:[%s7068_s10 + $0x14] sm:$0x1]  ;;  %v5976_v42 = vunpack.c.l.bf16 %v6033_v37  ;;  %v5977_v43 = vunpack.c.h.bf16 %v6033_v37  ;;  %v6824_v44 = vld [vmem:[%s9576_s1 + $0xf8] sm:$0xff]  }
  0x18   : > { %v5405_v29 = vld [vmem:[%s7068_s10 + $0x6c] sm:$0xff]   ;;  %v1472_v32 = vunpack.c.l.bf16 %v5381_v27  ;;  %v1473_v33 = vunpack.c.h.bf16 %v5381_v27  ;;  %v1474_v34 = vunpack.c.l.bf16 %v5383_v28  ;;  %v5407_v35 = vld [vmem:[%s7068_s10 + $0x74] sm:$0x1]  ;;  %v6825_v52 = vld [vmem:[%s9576_s1 + $0x40] sm:$0xff]   ;;  %v1549_v0 = vmul.f32 %v7085_v26, %v1501_v48 }
  0x19   : > { %6050 = vmatpush3.bf16.msra.mxu0 %v6809_v8  ;;  %6607 = vmatpush3.bf16.msra.mxu1 %v6999_v7  ;;  %v1496_v36 = vunpack.c.l.bf16 %v5405_v29  ;;  %v1497_v40 = vunpack.c.h.bf16 %v5405_v29  ;;  %v1498_v41 = vunpack.c.l.bf16 %v5407_v35  ;;  %v1547_v56 = vmul.f32 %v5976_v42, %v7085_v26  ;;  %v6029_v28 = vld [vmem:[%s7068_s10 + $0x18] sm:$0xff]   ;;  %vm7182_vm5 = vmpackc.low %vm6906_vm4, %vm332_vm0 }
  0x1a   : > { %6051 = vmatprep.subr.bf16.mxu0 %v6810_v9  ;;  %6600 = vmatprep.subr.bf16.mxu1 %v7012_v10  ;;  %v1520_v45 = vmul.f32 %v7085_v26, %v1472_v32  ;;  %v1521_v46 = vmul.f32 %v7085_v26, %v1473_v33  ;;  %v1522_v47 = vmul.f32 %v7085_v26, %v1474_v34  ;;  %v5386_v34 = vld [vmem:[%s7068_s10 + $0x20] sm:$0x1]  ;;  %v5961_v48 = vunpack.c.h.bf16 %v6029_v28  ;;  %vm9093_vm11 = vmand %vm5000_vm6, %vm5001_vm7 }
  0x1b   : > { %v1544_v49 = vmul.f32 %v7085_v26, %v1496_v36  ;;  %v1545_v50 = vmul.f32 %v7085_v26, %v1497_v40  ;;  %v1546_v51 = vmul.f32 %v7085_v26, %v1498_v41  ;;  %v1548_v60 = vmul.f32 %v5977_v43, %v7085_v26  ;;  %vm9101_vm12 = vmand %vm5007_vm9, %vm4675_vm8 }
  0x1c   : > { %v1568_v53 = vadd.f32 %v7101_v39, %v1520_v45  ;;  %v1569_v54 = vadd.f32 %v7101_v39, %v1521_v46  ;;  %v1570_v55 = vadd.f32 %v7101_v39, %v1522_v47  ;;  %v7135_v6 = vadd.f32 %v7101_v39, %v1547_v56  ;;  %v6034_v56 = vld [vmem:[%s7068_s10 + $0x90] sm:$0xff]   ;;  %vm9107_vm13 = vmor %vm4675_vm8, %vm4676_vm10 }
  0x1d   : > { %6052 = vmatpush3.bf16.msra.mxu0 %v6812_v11  ;;  %6608 = vmatpush3.bf16.msra.mxu1 %v7012_v10  ;;  %v7122_v57 = vadd.f32 %v7101_v39, %v1544_v49  ;;  %v7125_v58 = vadd.f32 %v7101_v39, %v1545_v50  ;;  %v1594_v59 = vadd.f32 %v7101_v39, %v1546_v51  ;;  %v5960_v43 = vunpack.c.l.bf16 %v6029_v28  ;;  %v5413_v50 = vld [vmem:[%s7068_s10 + $0x8c] sm:$0x1] }
  0x1e   : > { %6053 = vmatprep.subr.bf16.mxu0 %v6813_v12  ;;  %6601 = vmatprep.subr.bf16.mxu1 %v7026_v13  ;;  %v1616_v61 = vmax.f32 %v1568_v53, 0.0  ;;  %v1617_v62 = vmax.f32 %v1569_v54, 0.0  ;;  %v1618_v63 = vmax.f32 %v1570_v55, 0.0  ;;  %v7142_v12 = vadd.f32 %v7101_v39, %v1548_v60  ;;  %v6826_v54 = vld [vmem:[%s9576_s1] sm:$0xff]  }
  0x1f   : > { %v9594_v2 = vmax.f32 %v7122_v57, 0.0  ;;  %v9593_v3 = vmax.f32 %v7125_v58, 0.0  ;;  %v1642_v5 = vmax.f32 %v1594_v59, 0.0  ;;  %v9592_v27 = vmax.f32 %v7135_v6, 0.0 }
  0x20   : > { %v1760_v8 = vsel %vm332_vm0, %v1616_v61, 0.0  ;;  %v1762_v9 = vsel %vm337_vm1, %v1618_v63, 0.0  ;;  %v5502_v11 = vpack.c.bf16 %v1617_v62, %v1616_v61  ;;  %v9591_v33 = vmax.f32 %v7142_v12, 0.0 }
  0x21   : > { %6054 = vmatpush3.bf16.msra.mxu0 %v6815_v15  ;;  %6609 = vmatpush3.bf16.msra.mxu1 %v7026_v13  ;;  %v7144_v14 = vpack.c.bf16 %v1617_v62, %v1760_v8  ;;  %v7146_v15 = vpack.c.bf16 %v1762_v9, %v1762_v9  ;;  %v1787_v38 = vsel %vm332_vm0, %v9592_v27, 0.0  ;;  %v1477_v49 = vunpack.c.l.bf16 %v5386_v34 }
  0x22   : > { %6055 = vmatprep.subr.bf16.mxu0 %v6816_v16  ;;  %6602 = vmatprep.subr.bf16.mxu1 %v7042_v17  ;;  %v1784_v16 = vsel %vm332_vm0, %v9594_v2, 0.0  ;;  %v7176_v42 = vpack.c.bf16 %v9591_v33, %v1787_v38  ;;  %v1523_v55 = vmul.f32 %v5960_v43, %v7085_v26  ;;  %v1524_v59 = vmul.f32 %v5961_v48, %v7085_v26  ;;  %v5393_v33 = vld [vmem:[%s7068_s10 + $0x3c] sm:$0xff]  }
  0x23   : > { %9636 = vst [vmem:[#allocation3_spill] sm:$0xff] %v7144_v14  ;;  %9637 = vst [vmem:[#allocation4_spill] sm:$0xff] %v7146_v15  ;;  %v1841_v29 = vshrl.u32 %v7144_v14, 16  ;;  %v1843_v30 = vshll.u32 %v7144_v14, 16  ;;  %v1848_v32 = vshll.u32 %v7146_v15, 16  ;;  %v1525_v60 = vmul.f32 %v7085_v26, %v1477_v49 }
  0x24   : > { %v2107_v53 = vrot.slane %v7176_v42, 1  ;;  %v1571_v8 = vadd.f32 %v7101_v39, %v1523_v55  ;;  %v1504_v9 = vunpack.c.l.bf16 %v5413_v50  ;;  %v6829_v50 = vld [vmem:[%s9576_s1 + $0x50] sm:$0xff]  }
  0x25   : > { %6056 = vmatpush3.bf16.msra.mxu0 %v6818_v19  ;;  %6610 = vmatpush3.bf16.msra.mxu1 %v7042_v17  ;;  %v1786_v19 = vsel %vm337_vm1, %v1642_v5, 0.0  ;;  %v1845_v40 = vrot.slane %v1843_v30, 1  ;;  %v1850_v41 = vrot.slane %v1848_v32, 1  ;;  %v6827_v5 = vld [vmem:[%s9576_s1 + $0x48] sm:$0xff]  }
  0x26   : > { %6057 = vmatprep.subr.bf16.mxu0 %v6819_v20  ;;  %6603 = vmatprep.subr.bf16.mxu1 %v7058_v21  ;;  %v7156_v20 = vpack.c.bf16 %v9593_v3, %v1784_v16  ;;  %v1572_v16 = vadd.f32 %v7101_v39, %v1524_v59  ;;  %v1619_v32 = vmax.f32 %v1571_v8, 0.0  ;;  %v1552_v34 = vmul.f32 %v7085_v26, %v1504_v9 }
  0x27   : > { %v1846_v51 = vor.u32 %v1845_v40, %v1841_v29  ;;  %v5416_v29 = vld [vmem:[%s7068_s10 + $0x98] sm:$0x1] }
  0x28   : > { %v2104_v35 = vrot.slane %v7156_v20, 1  ;;  %v1600_v43 = vadd.f32 %v7101_v39, %v1552_v34 }
  0x29   : > { %6058 = vmatpush3.bf16.msra.mxu0 %v6821_v23  ;;  %6611 = vmatpush3.bf16.msra.mxu1 %v7058_v21  ;;  %v7158_v23 = vpack.c.bf16 %v1786_v19, %v1786_v19  ;;  %v1851_v63 = vsel %vm922_vm3, %v1846_v51, %v1850_v41  ;;  %v1573_v19 = vadd.f32 %v7101_v39, %v1525_v60  ;;  %v1763_v41 = vsel %vm332_vm0, %v1619_v32, 0.0 }
  0x2a   : > { %6059 = vmatprep.subr.bf16.mxu0 %v6822_v24  ;;  %6604 = vmatprep.subr.bf16.mxu1 %v7080_v25  ;;  %v1597_v24 = vadd.f32 %v7101_v39, %v1549_v0 }
  0x2b   : > { %v2105_v36 = vrot.slane %v7158_v23, 1  ;;  %2369 = vmatprep.mubr.bf16.mxu0 %v1851_v63  ;;  %v6831_v63 = vld [vmem:[%s9576_s1 + $0x58] sm:$0xff]  }
  0x2c   : > { %v1645_v37 = vmax.f32 %v1597_v24, 0.0 }
  0x2d   : > { %6060 = vmatpush3.bf16.msra.mxu0 %v6824_v44  ;;  %6612 = vmatpush3.bf16.msra.mxu1 %v7080_v25  ;;  %v5411_v44 = vld [vmem:[%s7068_s10 + $0x84] sm:$0xff]   ;;  %v2106_v45 = vsel %vm1163_vm2, %v2104_v35, %v2105_v36  ;;  %v5980_v35 = vunpack.c.l.bf16 %v6034_v56  ;;  %v1620_v36 = vmax.f32 %v1572_v16, 0.0 }
  0x2e   : > { %6453 = vmatprep.subr.bf16.mxu0 %v6974_v1  ;;  %6181 = vmatprep.subr.bf16.mxu1 %v6825_v52  ;;  %v1789_v47 = vsel %vm337_vm1, %v1645_v37, 0.0  ;;  %v1502_v61 = vunpack.c.l.bf16 %v5411_v44  ;;  %v1503_v62 = vunpack.c.h.bf16 %v5411_v44  ;;  %v1621_v37 = vmax.f32 %v1573_v19, 0.0 }
  0x2f   : > { %6485 = vmatprep.mubr.bf16.mxu1 %v2106_v45  ;;  %v7189_v52 = vpack.c.bf16 %v1789_v47, %v1789_v47  ;;  %v5981_v44 = vunpack.c.h.bf16 %v6034_v56  ;;  %v7230_v47 = vpack.c.bf16 %v1620_v36, %v1763_v41  ;;  %v1553_v55 = vmul.f32 %v5980_v35, %v7085_v26  ;;  %v6830_v56 = vld [vmem:[%s9576_s1 + $0x10] sm:$0xff]  }
  0x30   : > { %v1550_v24 = vmul.f32 %v7085_v26, %v1502_v61  ;;  %v1551_v28 = vmul.f32 %v7085_v26, %v1503_v62  ;;  %5503 = vmatmul.mubr.msk.bf16.vlgmr.msra.gmra.mrb[0].mxu0 %vm7182_vm5, %v5502_v11  ;;  %v6828_v11 = vld [vmem:[%s9576_s1 + $0x8] sm:$0xff]   ;;  %v1765_v45 = vsel %vm337_vm1, %v1621_v37, 0.0 }
  0x31   : > { %v2108_v0 = vrot.slane %v7189_v52, 1  ;;  %6454 = vmatpush3.bf16.msra.mxu0 %v6974_v1  ;;  %v1507_v1 = vunpack.c.l.bf16 %v5416_v29  ;;  %9640 = vst [vmem:[#allocation5_spill] sm:$0xff] %v7230_v47  ;;  %v7237_v51 = vpack.c.bf16 %v1765_v45, %v1765_v45  ;;  %v1853_v59 = vshrl.u32 %v7230_v47, 16  ;;  %v5389_v29 = vld [vmem:[%s7068_s10 + $0x2c] sm:$0x1] }
  0x32   : > { %v7216_v38 = vadd.f32 %v7101_v39, %v1550_v24  ;;  %v7219_v40 = vadd.f32 %v7101_v39, %v1551_v28  ;;  %6455 = vmatprep.subr.bf16.mxu0 %v6987_v4  ;;  %v1855_v60 = vshll.u32 %v7230_v47, 16  ;;  %v1554_v62 = vmul.f32 %v5981_v44, %v7085_v26 }
  0x33   : > { %v2109_v30 = vsel %vm1163_vm2, %v2107_v53, %v2108_v0  ;;  %9641 = vst [vmem:[#allocation6_spill] sm:$0xff] %v7237_v51  ;;  %v1648_v53 = vmax.f32 %v1600_v43, 0.0  ;;  %v5387_v0 = vld [vmem:[%s7068_s10 + $0x24] sm:$0xff]   ;;  %v1555_v16 = vmul.f32 %v7085_v26, %v1507_v1  ;;  %v7269_v28 = vadd.f32 %v7101_v39, %v1553_v55  ;;  %v6832_v1 = vld [vmem:[%s9576_s1 + $0x18] sm:$0xff]  }
  0x34   : > { %6486 = vmatmul.mubr.bf16.vlgmr.msra.gmra.mrb[0].mxu1 %v2109_v30  ;;  %v9590_v48 = vmax.f32 %v7216_v38, 0.0  ;;  %v9587_v49 = vmax.f32 %v7219_v40, 0.0  ;;  %v1857_v19 = vrot.slane %v1855_v60, 1  ;;  %v5417_v30 = vld [vmem:[%s7068_s10 + $0x9c] sm:$0xff]   ;;  %v1479_v45 = vunpack.c.h.bf16 %v5387_v0  ;;  %v5419_v55 = vld [vmem:[%s7068_s10 + $0xa4] sm:$0x1] }
  0x35   : > { %6182 = vmatpush3.bf16.msra.mxu1 %v6826_v54  ;;  %v7239_v54 = vpack.c.bf16 %v1620_v36, %v1619_v32  ;;  %6456 = vmatpush3.bf16.msra.mxu0 %v6987_v4  ;;  %v1792_v8 = vsel %vm337_vm1, %v1648_v53, 0.0  ;;  %v7272_v4 = vadd.f32 %v7101_v39, %v1554_v62  ;;  %v1603_v35 = vadd.f32 %v7101_v39, %v1555_v16 }
  0x36   : > { %6183 = vmatprep.subr.bf16.mxu1 %v6827_v5  ;;  %v1790_v61 = vsel %vm332_vm0, %v9590_v48, 0.0  ;;  %v1860_v5 = vshll.u32 %v7237_v51, 16  ;;  %6457 = vmatprep.subr.bf16.mxu0 %v6999_v7  ;;  %v7266_v24 = vpack.c.bf16 %v1792_v8, %v1792_v8  ;;  %v1478_v36 = vunpack.c.l.bf16 %v5387_v0 }
  0x37   : > { %v7262_v9 = vpack.c.bf16 %v9587_v49, %v1790_v61  ;;  %v7278_v37 = vor.u32 %v1857_v19, %v1853_v59  ;;  %v9586_v41 = vmax.f32 %v7269_v28, 0.0  ;;  %v9584_v43 = vmax.f32 %v7272_v4, 0.0  ;;  %v6833_v61 = vld [vmem:[%s9576_s1 + $0x60] sm:$0xff]  }
  0x38   : > { %v1862_v32 = vrot.slane %v1860_v5, 1  ;;  %v1651_v44 = vmax.f32 %v1603_v35, 0.0  ;;  %v1526_v53 = vmul.f32 %v7085_v26, %v1478_v36  ;;  %v1527_v5 = vmul.f32 %v7085_v26, %v1479_v45 }
  0x39   : > { %6184 = vmatpush3.bf16.msra.mxu1 %v6828_v11  ;;  %v2110_v34 = vrot.slane %v7262_v9, 1  ;;  %v2111_v11 = vrot.slane %v7266_v24, 1  ;;  %6458 = vmatpush3.bf16.msra.mxu0 %v6999_v7  ;;  %v1793_v7 = vsel %vm332_vm0, %v9586_v41, 0.0  ;;  %v1509_v19 = vunpack.c.h.bf16 %v5417_v30 }
  0x3a   : > { %6185 = vmatprep.subr.bf16.mxu1 %v6829_v50  ;;  %v1480_v50 = vunpack.c.l.bf16 %v5389_v29  ;;  %6459 = vmatprep.subr.bf16.mxu0 %v7012_v10  ;;  %v1863_v59 = vsel %vm922_vm3, %v7278_v37, %v1862_v32  ;;  %v1795_v62 = vsel %vm337_vm1, %v1651_v44, 0.0  ;;  %v7304_v0 = vpack.c.bf16 %v9584_v43, %v1793_v7  ;;  %v6035_v32 = vld [vmem:[%s7068_s10 + $0xa8] sm:$0xff]  }
  0x3b   : > { %v2112_v60 = vsel %vm1163_vm2, %v2110_v34, %v2111_v11  ;;  %2377 = vmatprep.mubr.bf16.mxu0 %v1863_v59  ;;  %v1574_v16 = vadd.f32 %v7101_v39, %v1526_v53  ;;  %v1510_v29 = vunpack.c.l.bf16 %v5419_v55  ;;  %v1575_v35 = vadd.f32 %v7101_v39, %v1527_v5  ;;  %v6835_v7 = vld [vmem:[%s9576_s1 + $0x68] sm:$0xff]  }
  0x3c   : > { %6489 = vmatprep.mubr.bf16.mxu1 %v2112_v60  ;;  %v1528_v8 = vmul.f32 %v7085_v26, %v1480_v50  ;;  %5506 = vmatmul.mubr.msk.bf16.gmra.mrb[4].mxu0 %vm7182_vm5, %v7239_v54  ;;  %v2113_v34 = vrot.slane %v7304_v0, 1  ;;  %v1557_v50 = vmul.f32 %v7085_v26, %v1509_v19  ;;  %v5422_v60 = vld [vmem:[%s7068_s10 + $0xb0] sm:$0x1] }
  0x3d   : > { %6186 = vmatpush3.bf16.msra.mxu1 %v6830_v56  ;;  %v1508_v56 = vunpack.c.l.bf16 %v5417_v30  ;;  %6460 = vmatpush3.bf16.msra.mxu0 %v7012_v10  ;;  %v1622_v45 = vmax.f32 %v1574_v16, 0.0  ;;  %v1558_v30 = vmul.f32 %v7085_v26, %v1510_v29  ;;  %v1623_v53 = vmax.f32 %v1575_v35, 0.0 }
  0x3e   : > { %6187 = vmatprep.subr.bf16.mxu1 %v6831_v63  ;;  %v7311_v63 = vpack.c.bf16 %v1795_v62, %v1795_v62  ;;  %v1576_v36 = vadd.f32 %v7101_v39, %v1528_v8  ;;  %6461 = vmatprep.subr.bf16.mxu0 %v7026_v13  ;;  %v5984_v10 = vunpack.c.l.bf16 %v6035_v32  ;;  %v7338_v62 = vadd.f32 %v7101_v39, %v1557_v50 }
  0x3f   : > { %v1556_v11 = vmul.f32 %v7085_v26, %v1508_v56  ;;  %v1606_v5 = vadd.f32 %v7101_v39, %v1558_v30  ;;  %v5508_v29 = vpack.c.bf16 %v1623_v53, %v1622_v45 }
  0x40   : > { %v2114_v44 = vrot.slane %v7311_v63, 1  ;;  %v1624_v55 = vmax.f32 %v1576_v36, 0.0  ;;  %v9585_v36 = vmax.f32 %v7338_v62, 0.0 }
  0x41   : > { %6188 = vmatpush3.bf16.msra.mxu1 %v6832_v1  ;;  %v6834_v1 = vld [vmem:[%s9576_s1 + $0x20] sm:$0xff]   ;;  %v7328_v59 = vadd.f32 %v7101_v39, %v1556_v11  ;;  %6462 = vmatpush3.bf16.msra.mxu0 %v7026_v13  ;;  %v1654_v11 = vmax.f32 %v1606_v5, 0.0  ;;  %v1513_v13 = vunpack.c.l.bf16 %v5422_v60  ;;  %v5392_v5 = vld [vmem:[%s7068_s10 + $0x38] sm:$0x1] }
  0x42   : > { %6189 = vmatprep.subr.bf16.mxu1 %v6833_v61  ;;  %v2115_v56 = vsel %vm1163_vm2, %v2113_v34, %v2114_v44  ;;  %v1766_v61 = vsel %vm332_vm0, %v1622_v45, 0.0  ;;  %v1768_v8 = vsel %vm337_vm1, %v1624_v55, 0.0  ;;  %v6836_v34 = vld [vmem:[%s9576_s1 + $0x28] sm:$0xff]   ;;  %v5985_v44 = vunpack.c.h.bf16 %v6035_v32  ;;  %6463 = vmatprep.subr.bf16.mxu0 %v7042_v17  ;;  %v6837_v55 = vld [vmem:[%s9576_s1 + $0x70] sm:$0xff]  }
  0x43   : > { %6490 = vmatmul.mubr.bf16.gmra.mrb[4].mxu1 %v2115_v56  ;;  %v7343_v16 = vpack.c.bf16 %v1623_v53, %v1766_v61  ;;  %v9583_v19 = vmax.f32 %v7328_v59, 0.0  ;;  %v7350_v35 = vpack.c.bf16 %v1768_v8, %v1768_v8  ;;  %v6030_v53 = vld [vmem:[%s7068_s10 + $0x30] sm:$0xff]   ;;  %v1559_v61 = vmul.f32 %v5984_v10, %v7085_v26 }
  0x44   : > { %v1560_v8 = vmul.f32 %v5985_v44, %v7085_v26  ;;  %v5964_v10 = vunpack.c.l.bf16 %v6030_v53 }
  0x45   : > { %9642 = vst [vmem:[#allocation7_spill] sm:$0xff] %v7343_v16  ;;  %9643 = vst [vmem:[#allocation8_spill] sm:$0xff] %v7350_v35  ;;  %6190 = vmatpush3.bf16.msra.mxu1 %v6834_v1  ;;  %v1865_v50 = vshrl.u32 %v7343_v16, 16  ;;  %v1867_v45 = vshll.u32 %v7343_v16, 16  ;;  %v1796_v30 = vsel %vm332_vm0, %v9583_v19, 0.0  ;;  %v1872_v32 = vshll.u32 %v7350_v35, 16  ;;  %6464 = vmatpush3.bf16.msra.mxu0 %v7042_v17 }
  0x46   : > { %6191 = vmatprep.subr.bf16.mxu1 %v6835_v7  ;;  %v1798_v1 = vsel %vm337_vm1, %v1654_v11, 0.0  ;;  %v7369_v56 = vpack.c.bf16 %v9585_v36, %v1796_v30  ;;  %v1561_v19 = vmul.f32 %v7085_v26, %v1513_v13  ;;  %v7380_v30 = vadd.f32 %v7101_v39, %v1559_v61  ;;  %6465 = vmatprep.subr.bf16.mxu0 %v7058_v21  ;;  %v5423_v17 = vld [vmem:[%s7068_s10 + $0xb4] sm:$0xff]  }
  0x47   : > { %v1869_v60 = vrot.slane %v1867_v45, 1  ;;  %v7373_v7 = vpack.c.bf16 %v1798_v1, %v1798_v1  ;;  %v1874_v43 = vrot.slane %v1872_v32, 1  ;;  %v7385_v44 = vadd.f32 %v7101_v39, %v1560_v8  ;;  %v6838_v32 = vld [vmem:[%s9576_s1 + $0x30] sm:$0xff]  }
  0x48   : > { %v2116_v11 = vrot.slane %v7369_v56, 1  ;;  %v1609_v13 = vadd.f32 %v7101_v39, %v1561_v19  ;;  %v9589_v61 = vmax.f32 %v7380_v30, 0.0  ;;  %v1483_v36 = vunpack.c.l.bf16 %v5392_v5 }
  0x49   : > { %6192 = vmatpush3.bf16.msra.mxu1 %v6836_v34  ;;  %v1870_v45 = vor.u32 %v1869_v60, %v1865_v50  ;;  %v2117_v1 = vrot.slane %v7373_v7, 1  ;;  %v5965_v34 = vunpack.c.h.bf16 %v6030_v53  ;;  %v1529_v41 = vmul.f32 %v5964_v10, %v7085_v26  ;;  %v5425_v50 = vld [vmem:[%s7068_s10 + $0xbc] sm:$0x1]  ;;  %6466 = vmatpush3.bf16.msra.mxu0 %v7058_v21 }
  0x4a   : > { %6193 = vmatprep.subr.bf16.mxu1 %v6837_v55  ;;  %v6839_v60 = vld [vmem:[%s9576_s1 + $0x78] sm:$0xff]   ;;  %v9588_v55 = vmax.f32 %v7385_v44, 0.0  ;;  %v1657_v49 = vmax.f32 %v1609_v13, 0.0  ;;  %v1799_v53 = vsel %vm332_vm0, %v9589_v61, 0.0  ;;  %v1531_v10 = vmul.f32 %v7085_v26, %v1483_v36  ;;  %6467 = vmatprep.subr.bf16.mxu0 %v7080_v25 }
  0x4b   : > { %v1875_v8 = vsel %vm922_vm3, %v1870_v45, %v1874_v43  ;;  %v2118_v19 = vsel %vm1163_vm2, %v2116_v11, %v2117_v1  ;;  %v1530_v5 = vmul.f32 %v5965_v34, %v7085_v26  ;;  %v1577_v43 = vadd.f32 %v7101_v39, %v1529_v41  ;;  %v6840_v13 = vld [vmem:[%s9576_s1 + $0x38] sm:$0xff]  }
  0x4c   : > { %2385 = vmatprep.mubr.bf16.mxu0 %v1875_v8  ;;  %6493 = vmatprep.mubr.bf16.mxu1 %v2118_v19  ;;  %v1801_v21 = vsel %vm337_vm1, %v1657_v49, 0.0  ;;  %v7415_v11 = vpack.c.bf16 %v9588_v55, %v1799_v53  ;;  %v1514_v45 = vunpack.c.l.bf16 %v5423_v17  ;;  %v1515_v1 = vunpack.c.h.bf16 %v5423_v17  ;;  %v6036_v8 = vld [vmem:[%s7068_s10 + $0xc0] sm:$0xff]   ;;  %v5428_v55 = vld [vmem:[%s7068_s10 + $0xc8] sm:$0x1] }
  0x4d   : > { %5509 = vmatmul.mubr.msk.bf16.gmra.mrb[8].mxu0 %vm7182_vm5, %v5508_v29  ;;  %6194 = vmatpush3.bf16.msra.mxu1 %v6838_v32  ;;  %v7420_v36 = vpack.c.bf16 %v1801_v21, %v1801_v21  ;;  %v1578_v41 = vadd.f32 %v7101_v39, %v1530_v5  ;;  %v1579_v29 = vadd.f32 %v7101_v39, %v1531_v10  ;;  %v1625_v34 = vmax.f32 %v1577_v43, 0.0  ;;  %v7428_v49 = vld [vmem:[%s9576_s1 + $0x80] sm:$0xff]  }
  0x4e   : > { %6195 = vmatprep.subr.bf16.mxu1 %v6839_v60  ;;  %v2119_v17 = vrot.slane %v7415_v11, 1  ;;  %v1516_v32 = vunpack.c.l.bf16 %v5425_v50  ;;  %v1562_v19 = vmul.f32 %v7085_v26, %v1514_v45  ;;  %v1563_v53 = vmul.f32 %v7085_v26, %v1515_v1  ;;  %6468 = vmatpush3.bf16.msra.mxu0 %v7080_v25  ;;  %v6848_v21 = vld [vmem:[%s9576_s1 + $0x1c0] sm:$0xff]  }
  0x4f   : > { %v2120_v60 = vrot.slane %v7420_v36, 1  ;;  %v1626_v5 = vmax.f32 %v1578_v41, 0.0  ;;  %v1627_v10 = vmax.f32 %v1579_v29, 0.0  ;;  %v1769_v43 = vsel %vm332_vm0, %v1625_v34, 0.0  ;;  %6317 = vmatprep.subr.bf16.mxu0 %v6848_v21 }
  0x50   : > { %v1564_v50 = vmul.f32 %v7085_v26, %v1516_v32  ;;  %v7443_v45 = vadd.f32 %v7101_v39, %v1562_v19  ;;  %v7446_v1 = vadd.f32 %v7101_v39, %v1563_v53  ;;  %v5988_v25 = vunpack.c.l.bf16 %v6036_v8 }
  0x51   : > { %6196 = vmatpush3.bf16.msra.mxu1 %v6840_v13  ;;  %v2121_v41 = vsel %vm1163_vm2, %v2119_v17, %v2120_v60  ;;  %v1771_v29 = vsel %vm337_vm1, %v1627_v10, 0.0  ;;  %v7452_v61 = vpack.c.bf16 %v1626_v5, %v1769_v43  ;;  %v7454_v48 = vpack.c.bf16 %v1626_v5, %v1625_v34 }
  0x52   : > { %9644 = vst [vmem:[#allocation9_spill] sm:$0xff] %v7443_v45  ;;  %9645 = vst [vmem:[#allocation10_spill] sm:$0xff] %v7446_v1  ;;  %6501 = vmatprep.subr.bf16.mxu1 %v7428_v49  ;;  %6494 = vmatmul.mubr.bf16.gmra.mrb[8].mxu1 %v2121_v41  ;;  %v7458_v32 = vpack.c.bf16 %v1771_v29, %v1771_v29  ;;  %v1612_v19 = vadd.f32 %v7101_v39, %v1564_v50  ;;  %v9595_v13 = vmax.f32 %v7443_v45, 0.0  ;;  %v5395_v41 = vld [vmem:[%s7068_s10 + $0x44] sm:$0x1] }
  0x53   : > { %9646 = vst [vmem:[#allocation11_spill] sm:$0xff] %v7452_v61  ;;  %v9597_v17 = vmax.f32 %v7446_v1, 0.0  ;;  %v1877_v53 = vshrl.u32 %v7452_v61, 16  ;;  %v1879_v60 = vshll.u32 %v7452_v61, 16  ;;  %v5989_v34 = vunpack.c.h.bf16 %v6036_v8  ;;  %v5398_v61 = vld [vmem:[%s7068_s10 + $0x50] sm:$0x1] }
  0x54   : > { %9647 = vst [vmem:[#allocation12_spill] sm:$0xff] %v7458_v32  ;;  %v1519_v5 = vunpack.c.l.bf16 %v5428_v55  ;;  %v1884_v10 = vshll.u32 %v7458_v32, 16  ;;  %v1660_v43 = vmax.f32 %v1612_v19, 0.0  ;;  %v1802_v21 = vsel %vm332_vm0, %v9595_v13, 0.0 }
  0x55   : > { %v1565_v50 = vmul.f32 %v5988_v25, %v7085_v26  ;;  %v1881_v29 = vrot.slane %v1879_v60, 1  ;;  %v7474_v27 = vpack.c.bf16 %v9597_v17, %v1802_v21  ;;  %v1566_v8 = vmul.f32 %v5989_v34, %v7085_v26  ;;  %v6031_v17 = vld [vmem:[%s7068_s10 + $0x48] sm:$0xff]  }
  0x56   : > { %v1567_v55 = vmul.f32 %v7085_v26, %v1519_v5  ;;  %v1886_v3 = vrot.slane %v1884_v10, 1  ;;  %v1804_v19 = vsel %vm337_vm1, %v1660_v43, 0.0  ;;  %v1484_v13 = vunpack.c.l.bf16 %v5393_v33 }
  0x57   : > { %v7481_v2 = vadd.f32 %v7101_v39, %v1565_v50  ;;  %v7483_v25 = vor.u32 %v1881_v29, %v1877_v53  ;;  %v7485_v60 = vpack.c.bf16 %v1804_v19, %v1804_v19  ;;  %v2122_v32 = vrot.slane %v7474_v27, 1 }
  0x58   : > { %v7489_v21 = vadd.f32 %v7101_v39, %v1566_v8  ;;  %v1615_v34 = vadd.f32 %v7101_v39, %v1567_v55  ;;  %v1485_v10 = vunpack.c.h.bf16 %v5393_v33  ;;  %v1486_v43 = vunpack.c.l.bf16 %v5395_v41 }
  0x59   : > { %9648 = vst [vmem:[#allocation13_spill] sm:$0xff] %v7481_v2  ;;  %v9600_v5 = vmax.f32 %v7481_v2, 0.0  ;;  %v1887_v50 = vsel %vm922_vm3, %v7483_v25, %v1886_v3  ;;  %v2123_v53 = vrot.slane %v7485_v60, 1  ;;  %v1532_v19 = vmul.f32 %v7085_v26, %v1484_v13  ;;  %v352_v2 = vld [vmem:[%s7068_s10 + $0x20] sm:$0x1] }
  0x5a   : > { %9649 = vst [vmem:[#allocation14_spill] sm:$0xff] %v7489_v21  ;;  %v9603_v29 = vmax.f32 %v7489_v21, 0.0  ;;  %2393 = vmatprep.mubr.bf16.mxu0 %v1887_v50  ;;  %v1663_v8 = vmax.f32 %v1615_v34, 0.0  ;;  %v1533_v33 = vmul.f32 %v7085_v26, %v1485_v10  ;;  %v1534_v41 = vmul.f32 %v7085_v26, %v1486_v43 }
  0x5b   : > { %v1805_v55 = vsel %vm332_vm0, %v9600_v5, 0.0  ;;  %v2124_v3 = vsel %vm1163_vm2, %v2122_v32, %v2123_v53  ;;  %5512 = vmatmul.mubr.msk.bf16.gmra.mrb[12].mxu0 %vm7182_vm5, %v7454_v48  ;;  %v1580_v34 = vadd.f32 %v7101_v39, %v1532_v19  ;;  %v5968_v50 = vunpack.c.l.bf16 %v6031_v17  ;;  %v347_v5 = vld [vmem:[%s7068_s10 + $0xc] sm:$0xff]  }
  0x5c   : > { %v7512_v13 = vpack.c.bf16 %v9603_v29, %v1805_v55  ;;  %6497 = vmatprep.mubr.bf16.mxu1 %v2124_v3  ;;  %v1807_v10 = vsel %vm337_vm1, %v1663_v8, 0.0  ;;  %v1581_v43 = vadd.f32 %v7101_v39, %v1533_v33  ;;  %v1582_v32 = vadd.f32 %v7101_v39, %v1534_v41  ;;  %v349_v41 = vld [vmem:[%s7068_s10 + $0x14] sm:$0x1] }
  0x5d   : > { %v5969_v53 = vunpack.c.h.bf16 %v6031_v17  ;;  %v7520_v35 = vpack.c.bf16 %v1807_v10, %v1807_v10  ;;  %v1628_v55 = vmax.f32 %v1580_v34, 0.0  ;;  %v1489_v29 = vunpack.c.l.bf16 %v5398_v61 }
  0x5e   : > { %v2125_v16 = vrot.slane %v7512_v13, 1  ;;  %v1629_v51 = vmax.f32 %v1581_v43, 0.0  ;;  %v1630_v19 = vmax.f32 %v1582_v32, 0.0  ;;  %v1535_v3 = vmul.f32 %v5968_v50, %v7085_v26 }
  0x5f   : > { %v1536_v47 = vmul.f32 %v5969_v53, %v7085_v26  ;;  %v2126_v8 = vrot.slane %v7520_v35, 1  ;;  %v1772_v33 = vsel %vm332_vm0, %v1628_v55, 0.0  ;;  %v1537_v17 = vmul.f32 %v7085_v26, %v1489_v29 }
  0x60   : > { %v545_v10 = vunpack.c.l.bf16 %v347_v5  ;;  %v1774_v15 = vsel %vm337_vm1, %v1630_v19, 0.0  ;;  %v7532_v34 = vpack.c.bf16 %v1629_v51, %v1772_v33  ;;  %v5514_v61 = vpack.c.bf16 %v1629_v51, %v1628_v55 }
  0x61   : > { %v1583_v43 = vadd.f32 %v7101_v39, %v1535_v3  ;;  %v2127_v50 = vsel %vm1163_vm2, %v2125_v16, %v2126_v8  ;;  %v7536_v32 = vpack.c.bf16 %v1774_v15, %v1774_v15  ;;  %v1584_v53 = vadd.f32 %v7101_v39, %v1536_v47 }
  0x62   : > { %9650 = vst [vmem:[#allocation15_spill] sm:$0xff] %v7532_v34  ;;  %v1585_v14 = vadd.f32 %v7101_v39, %v1537_v17  ;;  %6498 = vmatmul.mubr.bf16.gmra.mrb[12].mxu1 %v2127_v50  ;;  %v1889_v29 = vshrl.u32 %v7532_v34, 16  ;;  %v1891_v21 = vshll.u32 %v7532_v34, 16  ;;  %v546_v33 = vunpack.c.h.bf16 %v347_v5 }
  0x63   : > { %9651 = vst [vmem:[#allocation16_spill] sm:$0xff] %v7536_v32  ;;  %v1631_v19 = vmax.f32 %v1583_v43, 0.0  ;;  %v1896_v51 = vshll.u32 %v7536_v32, 16  ;;  %2835 = vmatprep.mubr.bf16.mxu1 %v7093_v31  ;;  %v1632_v55 = vmax.f32 %v1584_v53, 0.0  ;;  %v547_v15 = vunpack.c.l.bf16 %v349_v41  ;;  %v5399_v53 = vld [vmem:[%s7068_s10 + $0x54] sm:$0xff]  }
  0x64   : > { %v1633_v16 = vmax.f32 %v1585_v14, 0.0  ;;  %v1893_v3 = vrot.slane %v1891_v21, 1  ;;  %v599_v8 = vmul.f32 %v7085_v26, %v545_v10  ;;  %v600_v17 = vmul.f32 %v7085_v26, %v546_v33 }
  0x65   : > { %v1775_v47 = vsel %vm332_vm0, %v1631_v19, 0.0  ;;  %v1898_v50 = vrot.slane %v1896_v51, 1  ;;  %v601_v31 = vmul.f32 %v7085_v26, %v547_v15  ;;  %v1490_v34 = vunpack.c.l.bf16 %v5399_v53 }
  0x66   : > { %v1777_v5 = vsel %vm337_vm1, %v1633_v16, 0.0  ;;  %v7550_v43 = vpack.c.bf16 %v1632_v55, %v1775_v47  ;;  %v1894_v14 = vor.u32 %v1893_v3, %v1889_v29  ;;  %v653_v21 = vadd.f32 %v7101_v39, %v599_v8  ;;  %v5401_v47 = vld [vmem:[%s7068_s10 + $0x5c] sm:$0x1]  ;;  %v6842_v8 = vld [vmem:[%s9576_s1 + $0x88] sm:$0xff]  }
  0x67   : > { %v7554_v41 = vpack.c.bf16 %v1777_v5, %v1777_v5  ;;  %v654_v32 = vadd.f32 %v7101_v39, %v600_v17  ;;  %v655_v51 = vadd.f32 %v7101_v39, %v601_v31  ;;  %v7561_v16 = vpack.c.bf16 %v1632_v55, %v1631_v19 }
  0x68   : > { %9652 = vst [vmem:[#allocation17_spill] sm:$0xff] %v7550_v43  ;;  %v1901_v10 = vshrl.u32 %v7550_v43, 16  ;;  %v1903_v33 = vshll.u32 %v7550_v43, 16  ;;  %v1899_v26 = vsel %vm922_vm3, %v1894_v14, %v1898_v50  ;;  %v701_v15 = vmax.f32 %v653_v21, 0.0 }
  0x69   : > { %9653 = vst [vmem:[#allocation18_spill] sm:$0xff] %v7554_v41  ;;  %v1908_v29 = vshll.u32 %v7554_v41, 16  ;;  %v702_v3 = vmax.f32 %v654_v32, 0.0  ;;  %2401 = vmatprep.mubr.bf16.mxu0 %v1899_v26  ;;  %v703_v5 = vmax.f32 %v655_v51, 0.0  ;;  %v1491_v43 = vunpack.c.h.bf16 %v5399_v53  ;;  %v6843_v26 = vld [vmem:[%s9576_s1 + $0x90] sm:$0xff]  }
  0x6a   : > { %v1905_v17 = vrot.slane %v1903_v33, 1  ;;  %5515 = vmatmul.mubr.msk.bf16.gmra.mrb[16].mxu0 %vm7182_vm5, %v5514_v61  ;;  %v9616_v31 = vmov 0.0|0.0   ;;  %v845_v32 = vsel %vm332_vm0, %v701_v15, 0.0  ;;  %v1492_v55 = vunpack.c.l.bf16 %v5401_v47  ;;  %v7585_v61 = vld [vmem:[%s9578_s3] ss:$0 sm:$0xff] }
  0x6b   : > { %2836 = vmatmul.mubr.bf16.vlgmr.msra.gmra.mrb[16].mxu1 %v9616_v31  ;;  %v1910_v39 = vrot.slane %v1908_v29, 1  ;;  %v5574_v19 = vpack.c.bf16 %v702_v3, %v701_v15  ;;  %v847_v53 = vsel %vm337_vm1, %v703_v5, 0.0  ;;  %v7580_v14 = vpack.c.bf16 %v702_v3, %v845_v32  ;;  %v6032_v47 = vld [vmem:[%s7068_s10 + $0x60] sm:$0xff]   ;;  %v5404_v32 = vld [vmem:[%s7068_s10 + $0x68] sm:$0x1] }
  0x6c   : > { %6502 = vmatpush3.bf16.msra.mxu1 %v7428_v49  ;;  %v7576_v50 = vor.u32 %v1905_v17, %v1901_v10  ;;  %v1538_v21 = vmul.f32 %v7585_v61, %v1490_v34  ;;  %v7588_v33 = vpack.c.bf16 %v847_v53, %v847_v53  ;;  %v1539_v51 = vmul.f32 %v7585_v61, %v1491_v43  ;;  %v7603_v43 = vld [vmem:[%s9579_s4] ss:$0 sm:$0xff] }
  0x6d   : > { %9654 = vst [vmem:[#allocation19_spill] sm:$0xff] %v7580_v14  ;;  %v1540_v49 = vmul.f32 %v7585_v61, %v1492_v55  ;;  %v550_v10 = vunpack.c.l.bf16 %v352_v2  ;;  %6503 = vmatprep.subr.bf16.mxu1 %v6842_v8  ;;  %v936_v15 = vshrl.u32 %v7580_v14, 16  ;;  %v938_v34 = vshll.u32 %v7580_v14, 16 }
  0x6e   : > { %9655 = vst [vmem:[#allocation20_spill] sm:$0xff] %v7588_v33  ;;  %v1911_v29 = vsel %vm922_vm3, %v7576_v50, %v1910_v39  ;;  %v1586_v2 = vadd.f32 %v7603_v43, %v1538_v21  ;;  %v943_v3 = vshll.u32 %v7588_v33, 16  ;;  %v1587_v17 = vadd.f32 %v7603_v43, %v1539_v51  ;;  %v6844_v51 = vld [vmem:[%s9576_s1 + $0x98] sm:$0xff]  }
  0x6f   : > { %2409 = vmatprep.mubr.bf16.mxu0 %v1911_v29  ;;  %v1588_v5 = vadd.f32 %v7603_v43, %v1540_v49  ;;  %v604_v39 = vmul.f32 %v7585_v61, %v550_v10  ;;  %v940_v55 = vrot.slane %v938_v34, 1  ;;  %v5972_v31 = vunpack.c.l.bf16 %v6032_v47 }
  0x70   : > { %v1634_v53 = vmax.f32 %v1586_v2, 0.0  ;;  %6504 = vmatpush3.bf16.msra.mxu1 %v6842_v8  ;;  %v5973_v14 = vunpack.c.h.bf16 %v6032_v47  ;;  %v945_v41 = vrot.slane %v943_v3, 1  ;;  %v1635_v1 = vmax.f32 %v1587_v17, 0.0 }
  0x71   : > { %v1636_v45 = vmax.f32 %v1588_v5, 0.0  ;;  %v658_v21 = vadd.f32 %v7603_v43, %v604_v39  ;;  %6505 = vmatprep.subr.bf16.mxu1 %v6843_v26  ;;  %v941_v49 = vor.u32 %v940_v55, %v936_v15  ;;  %v1495_v29 = vunpack.c.l.bf16 %v5404_v32  ;;  %v353_v39 = vld [vmem:[%s7068_s10 + $0x24] sm:$0xff]  }
  0x72   : > { %v1778_v10 = vsel %vm332_vm0, %v1634_v53, 0.0  ;;  %v1541_v8 = vmul.f32 %v7585_v61, %v5972_v31  ;;  %5518 = vmatmul.mubr.msk.bf16.gmra.mrb[20].mxu0 %vm7182_vm5, %v7561_v16  ;;  %v5520_v3 = vpack.c.bf16 %v1635_v1, %v1634_v53  ;;  %v1542_v5 = vmul.f32 %v7585_v61, %v5973_v14 }
  0x73   : > { %v1780_v47 = vsel %vm337_vm1, %v1636_v45, 0.0  ;;  %v7623_v34 = vpack.c.bf16 %v1635_v1, %v1778_v10  ;;  %v706_v2 = vmax.f32 %v658_v21, 0.0  ;;  %v946_v17 = vsel %vm922_vm3, %v941_v49, %v945_v41  ;;  %v6845_v41 = vld [vmem:[%s9576_s1 + $0xa0] sm:$0xff]   ;;  %v355_v49 = vld [vmem:[%s7068_s10 + $0x2c] sm:$0x1] }
  0x74   : > { %v7626_v15 = vpack.c.bf16 %v1780_v47, %v1780_v47  ;;  %v1543_v31 = vmul.f32 %v7585_v61, %v1495_v29  ;;  %6506 = vmatpush3.bf16.msra.mxu1 %v6843_v26  ;;  %2843 = vmatprep.mubr.bf16.mxu1 %v946_v17  ;;  %v1589_v1 = vadd.f32 %v7603_v43, %v1541_v8  ;;  %v551_v8 = vunpack.c.l.bf16 %v353_v39 }
  0x75   : > { %9656 = vst [vmem:[#allocation21_spill] sm:$0xff] %v7623_v34  ;;  %v1913_v32 = vshrl.u32 %v7623_v34, 16  ;;  %v1915_v45 = vshll.u32 %v7623_v34, 16  ;;  %v850_v55 = vsel %vm337_vm1, %v706_v2, 0.0  ;;  %6507 = vmatprep.subr.bf16.mxu1 %v6844_v51  ;;  %5575 = vmatmul.mubr.msk.bf16.gmra.mrb[20].mxu1 %vm7182_vm5, %v5574_v19  ;;  %v1590_v53 = vadd.f32 %v7603_v43, %v1542_v5 }
  0x76   : > { %9657 = vst [vmem:[#allocation22_spill] sm:$0xff] %v7626_v15  ;;  %v1920_v14 = vshll.u32 %v7626_v15, 16  ;;  %v7642_v26 = vpack.c.bf16 %v850_v55, %v850_v55  ;;  %v1591_v21 = vadd.f32 %v7603_v43, %v1543_v31  ;;  %v1637_v29 = vmax.f32 %v1589_v1, 0.0 }
  0x77   : > { %v1917_v10 = vrot.slane %v1915_v45, 1  ;;  %v552_v47 = vunpack.c.h.bf16 %v353_v39  ;;  %v1638_v33 = vmax.f32 %v1590_v53, 0.0  ;;  %v553_v15 = vunpack.c.l.bf16 %v355_v49 }
  0x78   : > { %9658 = vst [vmem:[#allocation23_spill] sm:$0xff] %v7642_v26  ;;  %v1922_v2 = vrot.slane %v1920_v14, 1  ;;  %v955_v17 = vshll.u32 %v7642_v26, 16  ;;  %v1639_v34 = vmax.f32 %v1591_v21, 0.0  ;;  %6508 = vmatpush3.bf16.msra.mxu1 %v6844_v51  ;;  %v1781_v55 = vsel %vm332_vm0, %v1637_v29, 0.0  ;;  %v6846_v51 = vld [vmem:[%s9576_s1 + $0xa8] sm:$0xff]  }
  0x79   : > { %v1918_v19 = vor.u32 %v1917_v10, %v1913_v32  ;;  %v605_v5 = vmul.f32 %v7585_v61, %v551_v8  ;;  %6509 = vmatprep.subr.bf16.mxu1 %v6845_v41  ;;  %v7653_v1 = vpack.c.bf16 %v1638_v33, %v1781_v55  ;;  %v606_v39 = vmul.f32 %v7585_v61, %v552_v47 }
  0x7a   : > { %v957_v31 = vrot.slane %v955_v17, 1  ;;  %v1783_v45 = vsel %vm337_vm1, %v1639_v34, 0.0  ;;  %v607_v53 = vmul.f32 %v7585_v61, %v553_v15  ;;  %v1939_v55 = vshll.u32 %v7156_v20, 16 }
  0x7b   : > { %v1923_v32 = vsel %vm922_vm3, %v1918_v19, %v1922_v2  ;;  %v7660_v14 = vpack.c.bf16 %v1783_v45, %v1783_v45  ;;  %v659_v21 = vadd.f32 %v7603_v43, %v605_v5  ;;  %v1925_v49 = vshrl.u32 %v7653_v1, 16 }
  0x7c   : > { %2417 = vmatprep.mubr.bf16.mxu0 %v1923_v32  ;;  %v958_v34 = vsel %vm922_vm3, %v7278_v37, %v957_v31  ;;  %v1927_v10 = vshll.u32 %v7653_v1, 16  ;;  %v660_v8 = vadd.f32 %v7603_v43, %v606_v39  ;;  %6510 = vmatpush3.bf16.msra.mxu1 %v6845_v41  ;;  %v661_v47 = vadd.f32 %v7603_v43, %v607_v53  ;;  %v6847_v37 = vld [vmem:[%s9576_s1 + $0xb0] sm:$0xff]  }
  0x7d   : > { %2851 = vmatprep.mubr.bf16.mxu1 %v958_v34  ;;  %5521 = vmatmul.mubr.msk.bf16.gmra.mrb[24].mxu0 %vm7182_vm5, %v5520_v3  ;;  %v1932_v15 = vshll.u32 %v7660_v14, 16  ;;  %v707_v2 = vmax.f32 %v659_v21, 0.0  ;;  %v1937_v41 = vshrl.u32 %v7156_v20, 16  ;;  %v358_v3 = vld [vmem:[%s7068_s10 + $0x38] sm:$0x1]  ;;  %v1944_v39 = vshll.u32 %v7158_v23, 16 }
  0x7e   : > { %5578 = vmatmul.mubr.msk.bf16.gmra.mrb[24].mxu1 %vm7182_vm5, %v7239_v54  ;;  %v1929_v17 = vrot.slane %v1927_v10, 1  ;;  %v708_v19 = vmax.f32 %v660_v8, 0.0  ;;  %6511 = vmatprep.subr.bf16.mxu1 %v6846_v51  ;;  %v709_v31 = vmax.f32 %v661_v47, 0.0  ;;  %v7689_v54 = vpack.c.bf16 %v1638_v33, %v1637_v29  ;;  %v6856_v23 = vld [vmem:[%s9576_s1 + $0xb8] sm:$0xff]  }
  0x7f   : > { %v1934_v5 = vrot.slane %v1932_v15, 1  ;;  %v851_v45 = vsel %vm332_vm0, %v707_v2, 0.0  ;;  %v1941_v21 = vrot.slane %v1939_v55, 1  ;;  %v1946_v10 = vrot.slane %v1944_v39, 1  ;;  %v359_v15 = vld [vmem:[%s7068_s10 + $0x3c] sm:$0xff]  }
  0x80   : > { %v7685_v32 = vor.u32 %v1929_v17, %v1925_v49  ;;  %v7687_v53 = vpack.c.bf16 %v708_v19, %v851_v45  ;;  %6512 = vmatpush3.bf16.msra.mxu1 %v6846_v51  ;;  %v853_v20 = vsel %vm337_vm1, %v709_v31, 0.0  ;;  %v5580_v34 = vpack.c.bf16 %v708_v19, %v707_v2  ;;  %v361_v55 = vld [vmem:[%s7068_s10 + $0x44] sm:$0x1] }
  0x81   : > { %v556_v8 = vunpack.c.l.bf16 %v358_v3  ;;  %6513 = vmatprep.subr.bf16.mxu1 %v6847_v37  ;;  %v7699_v33 = vpack.c.bf16 %v853_v20, %v853_v20  ;;  %v1942_v47 = vor.u32 %v1941_v21, %v1937_v41  ;;  %v1949_v17 = vshrl.u32 %v7176_v42, 16 }
  0x82   : > { %9659 = vst [vmem:[#allocation24_spill] sm:$0xff] %v7687_v53  ;;  %v1935_v49 = vsel %vm922_vm3, %v7685_v32, %v1934_v5  ;;  %v960_v29 = vshrl.u32 %v7687_v53, 16  ;;  %v962_v51 = vshll.u32 %v7687_v53, 16  ;;  %v1951_v19 = vshll.u32 %v7176_v42, 16  ;;  %v6865_v42 = vld [vmem:[%s9576_s1 + $0x200] sm:$0xff]  }
  0x83   : > { %9660 = vst [vmem:[#allocation25_spill] sm:$0xff] %v7699_v33  ;;  %2425 = vmatprep.mubr.bf16.mxu0 %v1935_v49  ;;  %v610_v2 = vmul.f32 %v7585_v61, %v556_v8  ;;  %v967_v31 = vshll.u32 %v7699_v33, 16  ;;  %v1956_v5 = vshll.u32 %v7189_v52, 16  ;;  %v557_v45 = vunpack.c.l.bf16 %v359_v15 }
  0x84   : > { %v964_v3 = vrot.slane %v962_v51, 1  ;;  %6514 = vmatpush3.bf16.msra.mxu1 %v6847_v37  ;;  %v1947_v41 = vsel %vm922_vm3, %v1942_v47, %v1946_v10  ;;  %v1953_v21 = vrot.slane %v1951_v19, 1  ;;  %v558_v20 = vunpack.c.h.bf16 %v359_v15 }
  0x85   : > { %5524 = vmatmul.mubr.msk.bf16.gmra.mrb[28].mxu0 %vm7182_vm5, %v7689_v54  ;;  %v664_v39 = vadd.f32 %v7603_v43, %v610_v2  ;;  %6515 = vmatprep.subr.bf16.mxu1 %v6856_v23  ;;  %v969_v52 = vrot.slane %v967_v31, 1  ;;  %v1958_v37 = vrot.slane %v1956_v5, 1  ;;  %v559_v49 = vunpack.c.l.bf16 %v361_v55 }
  0x86   : > { %v965_v8 = vor.u32 %v964_v3, %v960_v29  ;;  %2433 = vmatprep.mubr.bf16.mxu0 %v1947_v41  ;;  %v1954_v33 = vor.u32 %v1953_v21, %v1949_v17  ;;  %v611_v53 = vmul.f32 %v7585_v61, %v557_v45  ;;  %v612_v10 = vmul.f32 %v7585_v61, %v558_v20  ;;  %v364_v29 = vld [vmem:[%s7068_s10 + $0x50] sm:$0x1] }
  0x87   : > { %v712_v51 = vmax.f32 %v664_v39, 0.0  ;;  %v9661_v15 = vmax.f32 %v7122_v57, 0.0  ;;  %v9662_v2 = vmax.f32 %v7125_v58, 0.0  ;;  %v613_v26 = vmul.f32 %v7585_v61, %v559_v49 }
  0x88   : > { %v970_v47 = vsel %vm922_vm3, %v965_v8, %v969_v52  ;;  %6516 = vmatpush3.bf16.msra.mxu1 %v6856_v23  ;;  %v665_v17 = vadd.f32 %v7603_v43, %v611_v53  ;;  %v666_v3 = vadd.f32 %v7603_v43, %v612_v10  ;;  %v1961_v31 = vshrl.u32 %v7262_v9, 16 }
  0x89   : > { %v5526_v19 = vpack.c.bf16 %v9662_v2, %v9661_v15  ;;  %2859 = vmatprep.mubr.bf16.mxu1 %v970_v47  ;;  %v856_v55 = vsel %vm337_vm1, %v712_v51, 0.0  ;;  %6549 = vmatprep.subr.bf16.mxu1 %v6865_v42  ;;  %v667_v58 = vadd.f32 %v7603_v43, %v613_v26  ;;  %v1963_v23 = vshll.u32 %v7262_v9, 16  ;;  %v365_v15 = vld [vmem:[%s7068_s10 + $0x54] sm:$0xff]   ;;  %v367_v2 = vld [vmem:[%s7068_s10 + $0x5c] sm:$0x1] }
  0x8a   : > { %5581 = vmatmul.mubr.msk.bf16.gmra.mrb[28].mxu1 %vm7182_vm5, %v5580_v34  ;;  %v7733_v57 = vpack.c.bf16 %v856_v55, %v856_v55  ;;  %v1968_v5 = vshll.u32 %v7266_v24, 16  ;;  %v1959_v45 = vsel %vm922_vm3, %v1954_v33, %v1958_v37  ;;  %v713_v41 = vmax.f32 %v665_v17, 0.0 }
  0x8b   : > { %v714_v53 = vmax.f32 %v666_v3, 0.0  ;;  %v562_v39 = vunpack.c.l.bf16 %v364_v29  ;;  %v715_v20 = vmax.f32 %v667_v58, 0.0  ;;  %v1965_v42 = vrot.slane %v1963_v23, 1 }
  0x8c   : > { %v979_v21 = vshll.u32 %v7733_v57, 16  ;;  %v857_v26 = vsel %vm332_vm0, %v713_v41, 0.0  ;;  %v9663_v9 = vmax.f32 %v7135_v6, 0.0  ;;  %v9664_v24 = vmax.f32 %v7142_v12, 0.0 }
  0x8d   : > { %5527 = vmatmul.mubr.msk.bf16.gmra.mrb[32].mxu0 %vm7182_vm5, %v5526_v19  ;;  %v1970_v33 = vrot.slane %v1968_v5, 1  ;;  %v616_v8 = vmul.f32 %v7585_v61, %v562_v39  ;;  %v859_v37 = vsel %vm337_vm1, %v715_v20, 0.0  ;;  %v7751_v49 = vpack.c.bf16 %v714_v53, %v857_v26 }
  0x8e   : > { %v5529_v34 = vpack.c.bf16 %v9664_v24, %v9663_v9  ;;  %v981_v52 = vrot.slane %v979_v21, 1  ;;  %2441 = vmatprep.mubr.bf16.mxu0 %v1959_v45  ;;  %v1966_v51 = vor.u32 %v1965_v42, %v1961_v31  ;;  %v7753_v10 = vpack.c.bf16 %v859_v37, %v859_v37  ;;  %v370_v9 = vld [vmem:[%s7068_s10 + $0x68] sm:$0x1] }
  0x8f   : > { %v670_v47 = vadd.f32 %v7603_v43, %v616_v8  ;;  %v1975_v6 = vshll.u32 %v7304_v0, 16  ;;  %v1980_v12 = vshll.u32 %v7311_v63, 16  ;;  %v984_v29 = vshrl.u32 %v7751_v49, 16 }
  0x90   : > { %v982_v19 = vsel %vm922_vm3, %v7483_v25, %v981_v52  ;;  %v986_v55 = vshll.u32 %v7751_v49, 16  ;;  %v5586_v17 = vpack.c.bf16 %v714_v53, %v713_v41  ;;  %v991_v3 = vshll.u32 %v7753_v10, 16 }
  0x91   : > { %2867 = vmatprep.mubr.bf16.mxu1 %v982_v19  ;;  %v718_v31 = vmax.f32 %v670_v47, 0.0  ;;  %v1973_v58 = vshrl.u32 %v7304_v0, 16  ;;  %v1977_v23 = vrot.slane %v1975_v6, 1  ;;  %v563_v5 = vunpack.c.l.bf16 %v365_v15 }
  0x92   : > { %5584 = vmatmul.mubr.msk.bf16.gmra.mrb[32].mxu1 %vm7182_vm5, %v7454_v48  ;;  %v988_v63 = vrot.slane %v986_v55, 1  ;;  %v564_v25 = vunpack.c.h.bf16 %v365_v15  ;;  %v565_v45 = vunpack.c.l.bf16 %v367_v2  ;;  %v993_v39 = vrot.slane %v991_v3, 1 }
  0x93   : > { %v1971_v21 = vsel %vm922_vm3, %v1966_v51, %v1970_v33  ;;  %v862_v41 = vsel %vm337_vm1, %v718_v31, 0.0  ;;  %v1982_v53 = vrot.slane %v1980_v12, 1  ;;  %v617_v0 = vmul.f32 %v7585_v61, %v563_v5  ;;  %v371_v5 = vld [vmem:[%s7068_s10 + $0x6c] sm:$0xff]  }
  0x94   : > { %v989_v20 = vor.u32 %v988_v63, %v984_v29  ;;  %v7772_v42 = vpack.c.bf16 %v862_v41, %v862_v41  ;;  %v618_v26 = vmul.f32 %v7585_v61, %v564_v25  ;;  %v1978_v48 = vor.u32 %v1977_v23, %v1973_v58 }
  0x95   : > { %5530 = vmatmul.mubr.msk.bf16.gmra.mrb[36].mxu0 %vm7182_vm5, %v5529_v34  ;;  %v619_v24 = vmul.f32 %v7585_v61, %v565_v45  ;;  %v1985_v33 = vshrl.u32 %v7369_v56, 16  ;;  %v1987_v8 = vshll.u32 %v7369_v56, 16  ;;  %v671_v51 = vadd.f32 %v7603_v43, %v617_v0 }
  0x96   : > { %v994_v52 = vsel %vm922_vm3, %v989_v20, %v993_v39  ;;  %2449 = vmatprep.mubr.bf16.mxu0 %v1971_v21  ;;  %v1003_v37 = vshll.u32 %v7772_v42, 16  ;;  %v672_v47 = vadd.f32 %v7603_v43, %v618_v26  ;;  %v9665_v34 = vmax.f32 %v7216_v38, 0.0 }
  0x97   : > { %2875 = vmatprep.mubr.bf16.mxu1 %v994_v52  ;;  %v9666_v6 = vmax.f32 %v7219_v40, 0.0  ;;  %v673_v15 = vadd.f32 %v7603_v43, %v619_v24  ;;  %v1989_v2 = vrot.slane %v1987_v8, 1  ;;  %v568_v56 = vunpack.c.l.bf16 %v370_v9 }
  0x98   : > { %v1005_v19 = vrot.slane %v1003_v37, 1  ;;  %v719_v29 = vmax.f32 %v671_v51, 0.0  ;;  %v720_v55 = vmax.f32 %v672_v47, 0.0  ;;  %v9667_v3 = vmax.f32 %v7269_v28, 0.0 }
  0x99   : > { %v5532_v12 = vpack.c.bf16 %v9666_v6, %v9665_v34  ;;  %v9668_v31 = vmax.f32 %v7272_v4, 0.0  ;;  %v1983_v23 = vsel %vm922_vm3, %v1978_v48, %v1982_v53  ;;  %v721_v63 = vmax.f32 %v673_v15, 0.0  ;;  %v373_v53 = vld [vmem:[%s7068_s10 + $0x74] sm:$0x1] }
  0x9a   : > { %v1992_v38 = vshll.u32 %v7373_v7, 16  ;;  %v622_v40 = vmul.f32 %v7585_v61, %v568_v56  ;;  %5587 = vmatmul.mubr.msk.bf16.gmra.mrb[36].mxu1 %vm7182_vm5, %v5586_v17  ;;  %v1006_v25 = vsel %vm922_vm3, %v7576_v50, %v1005_v19  ;;  %v863_v28 = vsel %vm332_vm0, %v719_v29, 0.0 }
  0x9b   : > { %v5535_v58 = vpack.c.bf16 %v9668_v31, %v9667_v3  ;;  %v1990_v4 = vor.u32 %v1989_v2, %v1985_v33  ;;  %v9669_v45 = vmax.f32 %v7328_v59, 0.0  ;;  %v9670_v39 = vmax.f32 %v7338_v62, 0.0  ;;  %2883 = vmatprep.mubr.bf16.mxu1 %v1006_v25  ;;  %v6026_v31 = vld [vmem:[%s7068_s10 + $0x78] sm:$0xff]  }
  0x9c   : > { %v865_v7 = vsel %vm337_vm1, %v721_v63, 0.0  ;;  %v7813_v41 = vpack.c.bf16 %v720_v55, %v863_v28  ;;  %v676_v17 = vadd.f32 %v7603_v43, %v622_v40  ;;  %v1997_v50 = vshrl.u32 %v7415_v11, 16 }
  0x9d   : > { %v7809_v21 = vpack.c.bf16 %v9670_v39, %v9669_v45  ;;  %v7818_v20 = vpack.c.bf16 %v865_v7, %v865_v7  ;;  %v1999_v0 = vshll.u32 %v7415_v11, 16  ;;  %v2004_v59 = vshll.u32 %v7420_v36, 16  ;;  %5533 = vmatmul.mubr.msk.bf16.gmra.mrb[40].mxu0 %vm7182_vm5, %v5532_v12 }
  0x9e   : > { %v569_v62 = vunpack.c.l.bf16 %v371_v5  ;;  %v1008_v26 = vshrl.u32 %v7813_v41, 16  ;;  %v1010_v9 = vshll.u32 %v7813_v41, 16  ;;  %v724_v48 = vmax.f32 %v676_v17, 0.0  ;;  %2457 = vmatprep.mubr.bf16.mxu0 %v1983_v23 }
  0x9f   : > { %v570_v24 = vunpack.c.h.bf16 %v371_v5  ;;  %v1015_v33 = vshll.u32 %v7818_v20, 16  ;;  %v1994_v8 = vrot.slane %v1992_v38, 1  ;;  %v2001_v52 = vrot.slane %v1999_v0, 1 }
  0xa0   : > { %v571_v37 = vunpack.c.l.bf16 %v373_v53  ;;  %v1012_v11 = vrot.slane %v1010_v9, 1  ;;  %v868_v36 = vsel %vm337_vm1, %v724_v48, 0.0  ;;  %v623_v51 = vmul.f32 %v7585_v61, %v569_v62 }
  0xa1   : > { %v624_v47 = vmul.f32 %v7585_v61, %v570_v24  ;;  %v1017_v34 = vrot.slane %v1015_v33, 1  ;;  %v7831_v6 = vpack.c.bf16 %v868_v36, %v868_v36  ;;  %v2006_v12 = vrot.slane %v2004_v59, 1 }
  0xa2   : > { %v625_v15 = vmul.f32 %v7585_v61, %v571_v37  ;;  %v1013_v2 = vor.u32 %v1012_v11, %v1008_v26  ;;  %v2002_v56 = vor.u32 %v2001_v52, %v1997_v50  ;;  %v677_v19 = vadd.f32 %v7603_v43, %v623_v51  ;;  %5590 = vmatmul.mubr.msk.bf16.gmra.mrb[40].mxu1 %vm7182_vm5, %v7561_v16  ;;  %v377_v51 = vld [vmem:[%s7068_s10 + $0x84] sm:$0xff]  }
  0xa3   : > { %v678_v3 = vadd.f32 %v7603_v43, %v624_v47  ;;  %v5592_v23 = vpack.c.bf16 %v720_v55, %v719_v29  ;;  %v1995_v63 = vsel %vm922_vm3, %v1990_v4, %v1994_v8  ;;  %v1027_v38 = vshll.u32 %v7831_v6, 16  ;;  %v376_v4 = vld [vmem:[%s7068_s10 + $0x80] sm:$0x1] }
  0xa4   : > { %v679_v40 = vadd.f32 %v7603_v43, %v625_v15  ;;  %v1018_v5 = vsel %vm922_vm3, %v1013_v2, %v1017_v34  ;;  %v725_v25 = vmax.f32 %v677_v19, 0.0  ;;  %v2011_v45 = vshll.u32 %v7474_v27, 16 }
  0xa5   : > { %v726_v28 = vmax.f32 %v678_v3, 0.0  ;;  %2891 = vmatprep.mubr.bf16.mxu1 %v1018_v5  ;;  %v1029_v39 = vrot.slane %v1027_v38, 1  ;;  %v9671_v17 = vmax.f32 %v7380_v30, 0.0  ;;  %v9672_v16 = vmax.f32 %v7385_v44, 0.0  ;;  %5536 = vmatmul.mubr.msk.bf16.gmra.mrb[44].mxu0 %vm7182_vm5, %v5535_v58  ;;  %v379_v38 = vld [vmem:[%s7068_s10 + $0x8c] sm:$0x1] }
  0xa6   : > { %v727_v7 = vmax.f32 %v679_v40, 0.0  ;;  %v5948_v55 = vunpack.c.l.bf16 %v6026_v31  ;;  %v2007_v50 = vsel %vm922_vm3, %v2002_v56, %v2006_v12  ;;  %v869_v53 = vsel %vm332_vm0, %v725_v25, 0.0  ;;  %2465 = vmatprep.mubr.bf16.mxu0 %v1995_v63 }
  0xa7   : > { %v7849_v29 = vpack.c.bf16 %v9672_v16, %v9671_v17  ;;  %v2016_v0 = vshll.u32 %v7485_v60, 16  ;;  %v5949_v59 = vunpack.c.h.bf16 %v6026_v31  ;;  %v7860_v44 = vpack.c.bf16 %v726_v28, %v869_v53 }
  0xa8   : > { %v871_v30 = vsel %vm337_vm1, %v727_v7, 0.0  ;;  %v7862_v62 = vpack.c.bf16 %v726_v28, %v725_v25  ;;  %v2009_v26 = vshrl.u32 %v7474_v27, 16  ;;  %v2013_v9 = vrot.slane %v2011_v45, 1 }
  0xa9   : > { %v7865_v58 = vpack.c.bf16 %v871_v30, %v871_v30  ;;  %v574_v48 = vunpack.c.l.bf16 %v376_v4  ;;  %v626_v24 = vmul.f32 %v7585_v61, %v5948_v55  ;;  %v1030_v60 = vsel %vm922_vm3, %v7685_v32, %v1029_v39  ;;  %v9675_v39 = vld [vmem:[#allocation10_spill] sm:$0xff] }
  0xaa   : > { %v1032_v33 = vshrl.u32 %v7860_v44, 16  ;;  %v1034_v8 = vshll.u32 %v7860_v44, 16  ;;  %v627_v52 = vmul.f32 %v7585_v61, %v5949_v59  ;;  %v2018_v11 = vrot.slane %v2016_v0, 1  ;;  %5593 = vmatmul.mubr.msk.bf16.gmra.mrb[44].mxu1 %vm7182_vm5, %v5592_v23 }
  0xab   : > { %v1039_v37 = vshll.u32 %v7865_v58, 16  ;;  %v628_v27 = vmul.f32 %v7585_v61, %v574_v48  ;;  %v680_v36 = vadd.f32 %v7603_v43, %v626_v24  ;;  %v2021_v34 = vshrl.u32 %v7512_v13, 16  ;;  %2899 = vmatprep.mubr.bf16.mxu1 %v1030_v60 }
  0xac   : > { %v1036_v47 = vrot.slane %v1034_v8, 1  ;;  %v681_v32 = vadd.f32 %v7603_v43, %v627_v52  ;;  %v2023_v12 = vshll.u32 %v7512_v13, 16  ;;  %v2028_v19 = vshll.u32 %v7520_v35, 16  ;;  %v9673_v35 = vld [vmem:[#allocation9_spill] sm:$0xff] }
  0xad   : > { %v1041_v15 = vrot.slane %v1039_v37, 1  ;;  %v682_v2 = vadd.f32 %v7603_v43, %v628_v27  ;;  %v728_v56 = vmax.f32 %v680_v36, 0.0  ;;  %v575_v40 = vunpack.c.l.bf16 %v377_v51  ;;  %5539 = vmatmul.mubr.msk.bf16.gmra.mrb[48].mxu0 %vm7182_vm5, %v7809_v21  ;;  %v382_v36 = vld [vmem:[%s7068_s10 + $0x98] sm:$0x1] }
  0xae   : > { %v1037_v3 = vor.u32 %v1036_v47, %v1032_v33  ;;  %v729_v31 = vmax.f32 %v681_v32, 0.0  ;;  %v2025_v63 = vrot.slane %v2023_v12, 1  ;;  %v2014_v23 = vor.u32 %v2013_v9, %v2009_v26  ;;  %2473 = vmatprep.mubr.bf16.mxu0 %v2007_v50  ;;  %v6027_v9 = vld [vmem:[%s7068_s10 + $0x90] sm:$0xff]  }
  0xaf   : > { %v730_v5 = vmax.f32 %v682_v2, 0.0  ;;  %v872_v13 = vsel %vm332_vm0, %v728_v56, 0.0  ;;  %v576_v25 = vunpack.c.h.bf16 %v377_v51  ;;  %v9674_v45 = vmax.f32 %v9673_v35, 0.0 }
  0xb0   : > { %v7890_v28 = vpack.c.bf16 %v729_v31, %v872_v13  ;;  %v9676_v7 = vmax.f32 %v9675_v39, 0.0  ;;  %v2026_v16 = vor.u32 %v2025_v63, %v2021_v34  ;;  %v2030_v55 = vrot.slane %v2028_v19, 1  ;;  %v9679_v19 = vld [vmem:[#allocation14_spill] sm:$0xff]  ;;  %v9682_v13 = vld [vmem:[#allocation4_spill] sm:$0xff] }
  0xb1   : > { %v874_v21 = vsel %vm337_vm1, %v730_v5, 0.0  ;;  %v577_v4 = vunpack.c.l.bf16 %v379_v38  ;;  %v629_v53 = vmul.f32 %v7585_v61, %v575_v40  ;;  %v630_v0 = vmul.f32 %v7585_v61, %v576_v25  ;;  %v9681_v38 = vld [vmem:[#allocation3_spill] sm:$0xff] }
  0xb2   : > { %v7896_v17 = vpack.c.bf16 %v9676_v7, %v9674_v45  ;;  %v1042_v50 = vsel %vm922_vm3, %v1037_v3, %v1041_v15  ;;  %v7903_v59 = vpack.c.bf16 %v874_v21, %v874_v21  ;;  %v1044_v30 = vshrl.u32 %v7890_v28, 16  ;;  %5596 = vmatmul.mubr.msk.bf16.gmra.mrb[48].mxu1 %vm7182_vm5, %v7689_v54  ;;  %v9677_v15 = vld [vmem:[#allocation13_spill] sm:$0xff] }
  0xb3   : > { %v1046_v26 = vshll.u32 %v7890_v28, 16  ;;  %v2019_v48 = vsel %vm922_vm3, %v2014_v23, %v2018_v11  ;;  %v631_v24 = vmul.f32 %v7585_v61, %v577_v4  ;;  %v683_v60 = vadd.f32 %v7603_v43, %v629_v53  ;;  %2907 = vmatprep.mubr.bf16.mxu1 %v1042_v50  ;;  %v383_v50 = vld [vmem:[%s7068_s10 + $0x9c] sm:$0xff]  }
  0xb4   : > { %v684_v33 = vadd.f32 %v7603_v43, %v630_v0  ;;  %v1051_v52 = vshll.u32 %v7903_v59, 16  ;;  %v7916_v37 = vpack.c.bf16 %v729_v31, %v728_v56  ;;  %v2031_v27 = vsel %vm922_vm3, %v2026_v16, %v2030_v55  ;;  %v9683_v16 = vld [vmem:[#allocation5_spill] sm:$0xff] }
  0xb5   : > { %v1048_v8 = vrot.slane %v1046_v26, 1  ;;  %v685_v11 = vadd.f32 %v7603_v43, %v631_v24  ;;  %v731_v51 = vmax.f32 %v683_v60, 0.0  ;;  %v5952_v32 = vunpack.c.l.bf16 %v6027_v9  ;;  %5542 = vmatmul.mubr.msk.bf16.gmra.mrb[52].mxu0 %vm7182_vm5, %v7849_v29  ;;  %v9685_v24 = vld [vmem:[#allocation7_spill] sm:$0xff] }
  0xb6   : > { %v732_v47 = vmax.f32 %v684_v33, 0.0  ;;  %v1053_v12 = vrot.slane %v1051_v52, 1  ;;  %v9678_v2 = vmax.f32 %v9677_v15, 0.0  ;;  %v9680_v54 = vmax.f32 %v9679_v19, 0.0  ;;  %2481 = vmatprep.mubr.bf16.mxu0 %v2019_v48 }
  0xb7   : > { %v1049_v34 = vor.u32 %v1048_v8, %v1044_v30  ;;  %v5953_v63 = vunpack.c.h.bf16 %v6027_v9  ;;  %v733_v56 = vmax.f32 %v685_v11, 0.0  ;;  %v875_v31 = vsel %vm332_vm0, %v731_v51, 0.0  ;;  %v9684_v9 = vld [vmem:[#allocation6_spill] sm:$0xff] }
  0xb8   : > { %v7925_v3 = vpack.c.bf16 %v9680_v54, %v9678_v2  ;;  %v2080_v40 = vrot.slane %v9681_v38, 1  ;;  %v580_v23 = vunpack.c.l.bf16 %v382_v36  ;;  %v7933_v5 = vpack.c.bf16 %v732_v47, %v875_v31  ;;  %v9686_v36 = vld [vmem:[#allocation8_spill] sm:$0xff] }
  0xb9   : > { %v2081_v25 = vrot.slane %v9682_v13, 1  ;;  %v632_v35 = vmul.f32 %v7585_v61, %v5952_v32  ;;  %v633_v45 = vmul.f32 %v7585_v61, %v5953_v63  ;;  %v1054_v39 = vsel %vm922_vm3, %v1049_v34, %v1053_v12  ;;  %v385_v32 = vld [vmem:[%s7068_s10 + $0xa4] sm:$0x1] }
  0xba   : > { %v877_v29 = vsel %vm337_vm1, %v733_v56, 0.0  ;;  %v634_v7 = vmul.f32 %v7585_v61, %v580_v23  ;;  %v2083_v55 = vrot.slane %v9683_v16, 1  ;;  %v1056_v4 = vshrl.u32 %v7933_v5, 16  ;;  %5599 = vmatmul.mubr.msk.bf16.gmra.mrb[52].mxu1 %vm7182_vm5, %v7862_v62 }
  0xbb   : > { %v7943_v21 = vpack.c.bf16 %v877_v29, %v877_v29  ;;  %v1058_v53 = vshll.u32 %v7933_v5, 16  ;;  %v686_v0 = vadd.f32 %v7603_v43, %v632_v35  ;;  %v687_v30 = vadd.f32 %v7603_v43, %v633_v45  ;;  %2915 = vmatprep.mubr.bf16.mxu1 %v1054_v39 }
  0xbc   : > { %v688_v26 = vadd.f32 %v7603_v43, %v634_v7  ;;  %v2084_v48 = vrot.slane %v9684_v9, 1  ;;  %v2086_v60 = vrot.slane %v9685_v24, 1  ;;  %v2087_v11 = vrot.slane %v9686_v36, 1 }
  0xbd   : > { %v1060_v33 = vrot.slane %v1058_v53, 1  ;;  %v1063_v8 = vshll.u32 %v7943_v21, 16  ;;  %v734_v52 = vmax.f32 %v686_v0, 0.0  ;;  %v735_v34 = vmax.f32 %v687_v30, 0.0  ;;  %5545 = vmatmul.mubr.msk.bf16.gmra.mrb[56].mxu0 %vm7182_vm5, %v7896_v17 }
  0xbe   : > { %v736_v12 = vmax.f32 %v688_v26, 0.0  ;;  %v581_v15 = vunpack.c.l.bf16 %v383_v50  ;;  %v582_v2 = vunpack.c.h.bf16 %v383_v50  ;;  %v2082_v63 = vsel %vm1163_vm2, %v2080_v40, %v2081_v25  ;;  %2489 = vmatprep.mubr.bf16.mxu0 %v2031_v27  ;;  %v9687_v50 = vld [vmem:[#allocation11_spill] sm:$0xff]  ;;  %v9688_v26 = vld [vmem:[#allocation12_spill] sm:$0xff] }
  0xbf   : > { %v1061_v19 = vor.u32 %v1060_v33, %v1056_v4  ;;  %v1065_v54 = vrot.slane %v1063_v8, 1  ;;  %v878_v56 = vsel %vm332_vm0, %v734_v52, 0.0  ;;  %v5604_v62 = vpack.c.bf16 %v732_v47, %v731_v51  ;;  %v6028_v4 = vld [vmem:[%s7068_s10 + $0xa8] sm:$0xff]  }
  0xc0   : > { %v880_v31 = vsel %vm337_vm1, %v736_v12, 0.0  ;;  %v7967_v38 = vpack.c.bf16 %v735_v34, %v878_v56  ;;  %v583_v23 = vunpack.c.l.bf16 %v385_v32  ;;  %v7974_v40 = vsel %vm1163_vm2, %v2083_v55, %v2084_v48  ;;  %v388_v48 = vld [vmem:[%s7068_s10 + $0xb0] sm:$0x1]  ;;  %v9689_v32 = vld [vmem:[#allocation15_spill] sm:$0xff] }
  0xc1   : > { %v7969_v13 = vpack.c.bf16 %v880_v31, %v880_v31  ;;  %v635_v25 = vmul.f32 %v7585_v61, %v581_v15  ;;  %v636_v17 = vmul.f32 %v7585_v61, %v582_v2  ;;  %v7981_v35 = vsel %vm1163_vm2, %v2086_v60, %v2087_v11 }
  0xc2   : > { %v1068_v51 = vshrl.u32 %v7967_v38, 16  ;;  %v1070_v47 = vshll.u32 %v7967_v38, 16  ;;  %v637_v27 = vmul.f32 %v7585_v61, %v583_v23  ;;  %v1066_v45 = vsel %vm922_vm3, %v1061_v19, %v1065_v54  ;;  %5602 = vmatmul.mubr.msk.bf16.gmra.mrb[56].mxu1 %vm7182_vm5, %v7916_v37  ;;  %v9690_v19 = vld [vmem:[#allocation16_spill] sm:$0xff] }
  0xc3   : > { %v1075_v39 = vshll.u32 %v7969_v13, 16  ;;  %v689_v29 = vadd.f32 %v7603_v43, %v635_v25  ;;  %v690_v7 = vadd.f32 %v7603_v43, %v636_v17  ;;  %v9630_v30 = vrot.slane %v9687_v50, 1  ;;  %2923 = vmatprep.mubr.bf16.mxu1 %v1066_v45  ;;  %v9691_v45 = vld [vmem:[#allocation17_spill] sm:$0xff] }
  0xc4   : > { %v1072_v53 = vrot.slane %v1070_v47, 1  ;;  %v691_v0 = vadd.f32 %v7603_v43, %v637_v27  ;;  %v2090_v9 = vrot.slane %v9688_v26, 1  ;;  %v7996_v60 = vpack.c.bf16 %v735_v34, %v734_v52 }
  0xc5   : > { %v1077_v24 = vrot.slane %v1075_v39, 1  ;;  %v737_v33 = vmax.f32 %v689_v29, 0.0  ;;  %v738_v8 = vmax.f32 %v690_v7, 0.0  ;;  %v2092_v12 = vrot.slane %v9689_v32, 1  ;;  %5548 = vmatmul.mubr.msk.bf16.gmra.mrb[60].mxu0 %vm7182_vm5, %v7925_v3  ;;  %v9692_v29 = vld [vmem:[#allocation18_spill] sm:$0xff] }
  0xc6   : > { %v1073_v36 = vor.u32 %v1072_v53, %v1068_v51  ;;  %v739_v11 = vmax.f32 %v691_v0, 0.0  ;;  %v5956_v15 = vunpack.c.l.bf16 %v6028_v4  ;;  %v2093_v54 = vrot.slane %v9690_v19, 1  ;;  %6469 = vmatprep.mubr.bf16.mxu0 %v2082_v63  ;;  %v6849_v32 = vld [vmem:[%s9576_s1 + $0x180] sm:$0xff]   ;;  %v9693_v19 = vld [vmem:[#allocation21_spill] sm:$0xff] }
  0xc7   : > { %v881_v2 = vsel %vm332_vm0, %v737_v33, 0.0  ;;  %v5957_v56 = vunpack.c.h.bf16 %v6028_v4  ;;  %v586_v31 = vunpack.c.l.bf16 %v388_v48  ;;  %v8012_v34 = vsel %vm1163_vm2, %v9630_v30, %v2090_v9  ;;  %v389_v4 = vld [vmem:[%s7068_s10 + $0xb4] sm:$0xff]  }
  0xc8   : > { %v883_v37 = vsel %vm337_vm1, %v739_v11, 0.0  ;;  %v8007_v52 = vpack.c.bf16 %v738_v8, %v881_v2  ;;  %v638_v23 = vmul.f32 %v7585_v61, %v5956_v15  ;;  %v1078_v25 = vsel %vm922_vm3, %v1073_v36, %v1077_v24  ;;  %v391_v11 = vld [vmem:[%s7068_s10 + $0xbc] sm:$0x1] }
  0xc9   : > { %v8016_v17 = vpack.c.bf16 %v883_v37, %v883_v37  ;;  %v639_v3 = vmul.f32 %v7585_v61, %v5957_v56  ;;  %v640_v51 = vmul.f32 %v7585_v61, %v586_v31  ;;  %v9629_v39 = vrot.slane %v9691_v45, 1 }
  0xca   : > { %v1082_v47 = vshll.u32 %v8007_v52, 16  ;;  %v692_v27 = vadd.f32 %v7603_v43, %v638_v23  ;;  %v2096_v7 = vrot.slane %v9692_v29, 1  ;;  %v1080_v63 = vshrl.u32 %v8007_v52, 16  ;;  %5605 = vmatmul.mubr.msk.bf16.gmra.mrb[60].mxu1 %vm7182_vm5, %v5604_v62 }
  0xcb   : > { %v1087_v53 = vshll.u32 %v8016_v17, 16  ;;  %v693_v0 = vadd.f32 %v7603_v43, %v639_v3  ;;  %v694_v26 = vadd.f32 %v7603_v43, %v640_v51  ;;  %v8029_v48 = vpack.c.bf16 %v738_v8, %v737_v33  ;;  %2931 = vmatprep.mubr.bf16.mxu1 %v1078_v25  ;;  %v6850_v33 = vld [vmem:[%s9576_s1 + $0x1c8] sm:$0xff]  }
  0xcc   : > { %v1084_v9 = vrot.slane %v1082_v47, 1  ;;  %v8032_v24 = vsel %vm1163_vm2, %v2092_v12, %v2093_v54  ;;  %v740_v36 = vmax.f32 %v692_v27, 0.0  ;;  %v2098_v56 = vrot.slane %v9693_v19, 1  ;;  %v9694_v47 = vld [vmem:[#allocation22_spill] sm:$0xff] }
  0xcd   : > { %v741_v15 = vmax.f32 %v693_v0, 0.0  ;;  %v742_v2 = vmax.f32 %v694_v26, 0.0  ;;  %v587_v31 = vunpack.c.l.bf16 %v389_v4  ;;  %v1089_v8 = vrot.slane %v1087_v53, 1  ;;  %6470 = vmatmul.mubr.bf16.vlgmr.msra.gmra.mrb[64].mxu0 %v7974_v40  ;;  %v6037_v53 = vld [vmem:[%s7068_s10 + $0x18] sm:$0xff]   ;;  %v5620_v19 = vld [vmem:[%s7068_s10 + $0x20] sm:$0x1] }
  0xce   : > { %v884_v12 = vsel %vm332_vm0, %v740_v36, 0.0  ;;  %v8049_v62 = vsel %vm1163_vm2, %v9629_v39, %v2096_v7  ;;  %v588_v54 = vunpack.c.h.bf16 %v389_v4  ;;  %v1085_v37 = vor.u32 %v1084_v9, %v1080_v63  ;;  %6318 = vmatpush3.bf16.msra.mxu0 %v6849_v32  ;;  %v6851_v4 = vld [vmem:[%s9576_s1 + $0x188] sm:$0xff]   ;;  %6473 = vmatprep.mubr.bf16.mxu0 %v7981_v35  ;;  %v6852_v9 = vld [vmem:[%s9576_s1 + $0x1d0] sm:$0xff]  }
  0xcf   : > { %v886_v23 = vsel %vm337_vm1, %v742_v2, 0.0  ;;  %v8053_v3 = vpack.c.bf16 %v741_v15, %v884_v12  ;;  %v589_v25 = vunpack.c.l.bf16 %v391_v11  ;;  %v2099_v27 = vrot.slane %v9694_v47, 1  ;;  %6319 = vmatprep.subr.bf16.mxu0 %v6850_v33 }
  0xd0   : > { %v8056_v51 = vpack.c.bf16 %v886_v23, %v886_v23  ;;  %v641_v29 = vmul.f32 %v7585_v61, %v587_v31  ;;  %v642_v7 = vmul.f32 %v7585_v61, %v588_v54  ;;  %v9628_v26 = vrot.slane %v7653_v1, 1 }
  0xd1   : > { %v1092_v63 = vshrl.u32 %v8053_v3, 16  ;;  %v1094_v40 = vshll.u32 %v8053_v3, 16  ;;  %v643_v0 = vmul.f32 %v7585_v61, %v589_v25  ;;  %v2102_v35 = vrot.slane %v7660_v14, 1  ;;  %v6853_v14 = vld [vmem:[%s9576_s1 + $0x190] sm:$0xff]  }
  0xd2   : > { %v1099_v11 = vshll.u32 %v8056_v51, 16  ;;  %v695_v32 = vadd.f32 %v7603_v43, %v641_v29  ;;  %v696_v2 = vadd.f32 %v7603_v43, %v642_v7  ;;  %v1090_v31 = vsel %vm922_vm3, %v1085_v37, %v1089_v8  ;;  %5608 = vmatmul.mubr.msk.bf16.gmra.mrb[64].mxu1 %vm7182_vm5, %v7996_v60  ;;  %6320 = vmatpush3.bf16.msra.mxu0 %v6851_v4 }
  0xd3   : > { %v1096_v12 = vrot.slane %v1094_v40, 1  ;;  %v697_v61 = vadd.f32 %v7603_v43, %v643_v0  ;;  %v5992_v54 = vunpack.c.l.bf16 %v6037_v53  ;;  %v8080_v33 = vpack.c.bf16 %v741_v15, %v740_v36  ;;  %2939 = vmatprep.mubr.bf16.mxu1 %v1090_v31  ;;  %6321 = vmatprep.subr.bf16.mxu0 %v6852_v9  ;;  %v6854_v36 = vld [vmem:[%s9576_s1 + $0x1d8] sm:$0xff]   ;;  %v9695_v40 = vld [vmem:[#allocation19_spill] sm:$0xff] }
  0xd4   : > { %v8083_v23 = vsel %vm1163_vm2, %v2098_v56, %v2099_v27  ;;  %v743_v25 = vmax.f32 %v695_v32, 0.0  ;;  %v744_v47 = vmax.f32 %v696_v2, 0.0  ;;  %v1101_v8 = vrot.slane %v1099_v11, 1  ;;  %v8104_v27 = vld [vmem:[%s9578_s3] ss:$0 sm:$0xff]  ;;  %v5621_v31 = vld [vmem:[%s7068_s10 + $0x24] sm:$0xff]  }
  0xd5   : > { %v745_v37 = vmax.f32 %v697_v61, 0.0  ;;  %v5993_v43 = vunpack.c.h.bf16 %v6037_v53  ;;  %v3323_v29 = vunpack.c.l.bf16 %v5620_v19  ;;  %v1097_v15 = vor.u32 %v1096_v12, %v1092_v63  ;;  %6474 = vmatmul.mubr.bf16.gmra.mrb[68].mxu0 %v8012_v34  ;;  %v8120_v32 = vld [vmem:[%s9579_s4] ss:$0 sm:$0xff]  ;;  %v6855_v34 = vld [vmem:[%s9576_s1 + $0x198] sm:$0xff]  }
  0xd6   : > { %v887_v60 = vsel %vm332_vm0, %v743_v25, 0.0  ;;  %v8099_v56 = vsel %vm1163_vm2, %v9628_v26, %v2102_v35  ;;  %v3369_v7 = vmul.f32 %v8104_v27, %v5992_v54  ;;  %v1167_v0 = vrot.slane %v9695_v40, 1  ;;  %v9696_v35 = vld [vmem:[#allocation20_spill] sm:$0xff]  ;;  %6322 = vmatpush3.bf16.msra.mxu0 %v6853_v14  ;;  %6477 = vmatprep.mubr.bf16.mxu0 %v8032_v24 }
  0xd7   : > { %v889_v53 = vsel %vm337_vm1, %v745_v37, 0.0  ;;  %v8109_v4 = vpack.c.bf16 %v744_v47, %v887_v60  ;;  %v3370_v63 = vmul.f32 %v8104_v27, %v5993_v43  ;;  %v3371_v11 = vmul.f32 %v8104_v27, %v3323_v29  ;;  %v9697_v37 = vld [vmem:[#allocation23_spill] sm:$0xff]  ;;  %6323 = vmatprep.subr.bf16.mxu0 %v6854_v36  ;;  %v6857_v29 = vld [vmem:[%s9576_s1 + $0x1e0] sm:$0xff]  }
  0xd8   : > { %v8114_v9 = vpack.c.bf16 %v889_v53, %v889_v53  ;;  %v3417_v2 = vadd.f32 %v8120_v32, %v3369_v7  ;;  %v1168_v19 = vrot.slane %v9696_v35, 1  ;;  %v8130_v61 = vpack.c.bf16 %v744_v47, %v743_v25  ;;  %v5623_v53 = vld [vmem:[%s7068_s10 + $0x2c] sm:$0x1] }
  0xd9   : > { %v1106_v12 = vshll.u32 %v8109_v4, 16  ;;  %v3418_v54 = vadd.f32 %v8120_v32, %v3370_v63  ;;  %v1171_v43 = vrot.slane %v9697_v37, 1  ;;  %v1104_v14 = vshrl.u32 %v8109_v4, 16 }
  0xda   : > { %v1111_v60 = vshll.u32 %v8114_v9, 16  ;;  %v3419_v7 = vadd.f32 %v8120_v32, %v3371_v11  ;;  %v3465_v24 = vmax.f32 %v3417_v2, 0.0  ;;  %v1102_v25 = vsel %vm922_vm3, %v1097_v15, %v1101_v8  ;;  %5611 = vmatmul.mubr.msk.bf16.gmra.mrb[68].mxu1 %vm7182_vm5, %v8029_v48  ;;  %6324 = vmatpush3.bf16.msra.mxu0 %v6855_v34  ;;  %v6858_v8 = vld [vmem:[%s9576_s1 + $0x1a0] sm:$0xff]   ;;  %v6859_v48 = vld [vmem:[%s9576_s1 + $0x1e8] sm:$0xff]  }
  0xdb   : > { %v1108_v47 = vrot.slane %v1106_v12, 1  ;;  %v3466_v40 = vmax.f32 %v3418_v54, 0.0  ;;  %v3324_v63 = vunpack.c.l.bf16 %v5621_v31  ;;  %v8145_v37 = vsel %vm1163_vm2, %v1167_v0, %v1168_v19  ;;  %2947 = vmatprep.mubr.bf16.mxu1 %v1102_v25  ;;  %6325 = vmatprep.subr.bf16.mxu0 %v6857_v29  ;;  %v6038_v54 = vld [vmem:[%s7068_s10 + $0x30] sm:$0xff]   ;;  %v9700_v25 = vld [vmem:[#allocation25_spill] sm:$0xff] }
  0xdc   : > { %v3467_v35 = vmax.f32 %v3419_v7, 0.0  ;;  %v3609_v36 = vsel %vm332_vm0, %v3465_v24, 0.0  ;;  %v3325_v26 = vunpack.c.h.bf16 %v5621_v31  ;;  %v1113_v15 = vrot.slane %v1111_v60, 1  ;;  %v9699_v29 = vld [vmem:[#allocation24_spill] sm:$0xff] }
  0xdd   : > { %v8153_v11 = vpack.c.bf16 %v3466_v40, %v3609_v36  ;;  %v8158_v2 = vsel %vm1163_vm2, %v2083_v55, %v1171_v43  ;;  %v3326_v0 = vunpack.c.l.bf16 %v5623_v53  ;;  %v1109_v19 = vor.u32 %v1108_v47, %v1104_v14  ;;  %6478 = vmatmul.mubr.bf16.gmra.mrb[72].mxu0 %v8049_v62  ;;  %v6860_v47 = vld [vmem:[%s9576_s1 + $0x1a8] sm:$0xff]  }
  0xde   : > { %v3611_v31 = vsel %vm337_vm1, %v3467_v35, 0.0  ;;  %v3372_v34 = vmul.f32 %v8104_v27, %v3324_v63  ;;  %v3373_v12 = vmul.f32 %v8104_v27, %v3325_v26  ;;  %v1173_v60 = vrot.slane %v9699_v29, 1  ;;  %6326 = vmatpush3.bf16.msra.mxu0 %v6858_v8  ;;  %6481 = vmatprep.mubr.bf16.mxu0 %v8083_v23 }
  0xdf   : > { %v8168_v16 = vpack.c.bf16 %v3611_v31, %v3611_v31  ;;  %v3690_v55 = vshrl.u32 %v8153_v11, 16  ;;  %v3692_v43 = vshll.u32 %v8153_v11, 16  ;;  %v3374_v14 = vmul.f32 %v8104_v27, %v3326_v0  ;;  %v5626_v0 = vld [vmem:[%s7068_s10 + $0x38] sm:$0x1]  ;;  %6327 = vmatprep.subr.bf16.mxu0 %v6859_v48  ;;  %v6861_v31 = vld [vmem:[%s9576_s1 + $0x1f0] sm:$0xff]  }
  0xe0   : > { %v3420_v7 = vadd.f32 %v8120_v32, %v3372_v34  ;;  %v3421_v53 = vadd.f32 %v8120_v32, %v3373_v12  ;;  %v1174_v26 = vrot.slane %v9700_v25, 1  ;;  %v1177_v62 = vrot.slane %v7733_v57, 1 }
  0xe1   : > { %9698 = vst [vmem:[#allocation9_spill] sm:$0xff] %v8168_v16  ;;  %v3694_v63 = vrot.slane %v3692_v43, 1  ;;  %v3697_v35 = vshll.u32 %v8168_v16, 16  ;;  %v5996_v36 = vunpack.c.l.bf16 %v6038_v54  ;;  %v8188_v34 = vpack.c.bf16 %v3466_v40, %v3465_v24  ;;  %v6862_v24 = vld [vmem:[%s9576_s1 + $0x1b0] sm:$0xff]  }
  0xe2   : > { %v3422_v8 = vadd.f32 %v8120_v32, %v3374_v14  ;;  %v3468_v12 = vmax.f32 %v3420_v7, 0.0  ;;  %v3469_v29 = vmax.f32 %v3421_v53, 0.0  ;;  %v1114_v23 = vsel %vm922_vm3, %v1109_v19, %v1113_v15  ;;  %5614 = vmatmul.mubr.msk.bf16.gmra.mrb[72].mxu1 %vm7182_vm5, %v8080_v33  ;;  %6328 = vmatpush3.bf16.msra.mxu0 %v6860_v47  ;;  %v6863_v33 = vld [vmem:[%s9576_s1 + $0x1f8] sm:$0xff]  }
  0xe3   : > { %v3695_v43 = vor.u32 %v3694_v63, %v3690_v55  ;;  %v3699_v25 = vrot.slane %v3697_v35, 1  ;;  %v5997_v39 = vunpack.c.h.bf16 %v6038_v54  ;;  %v8195_v48 = vsel %vm1163_vm2, %v1173_v60, %v1174_v26  ;;  %2955 = vmatprep.mubr.bf16.mxu1 %v1114_v23  ;;  %6329 = vmatprep.subr.bf16.mxu0 %v6861_v31  ;;  %v5627_v26 = vld [vmem:[%s7068_s10 + $0x3c] sm:$0xff]  }
  0xe4   : > { %v3470_v30 = vmax.f32 %v3422_v8, 0.0  ;;  %v3612_v57 = vsel %vm332_vm0, %v3468_v12, 0.0  ;;  %v3329_v16 = vunpack.c.l.bf16 %v5626_v0  ;;  %v9701_v40 = vmov 0.0|0.0   ;;  %v6864_v31 = vld [vmem:[%s9576_s1 + $0x1b8] sm:$0xff]  }
  0xe5   : > { %v8204_v15 = vrot.slane %v9701_v40, 1  ;;  %v8206_v19 = vpack.c.bf16 %v3469_v29, %v3612_v57  ;;  %v9702_v54 = vrot.slane %v9687_v50, 1  ;;  %v3375_v60 = vmul.f32 %v8104_v27, %v5996_v36  ;;  %6482 = vmatmul.mubr.bf16.gmra.mrb[76].mxu0 %v8099_v56 }
  0xe6   : > { %v3700_v14 = vsel %vm922_vm3, %v3695_v43, %v3699_v25  ;;  %v3614_v7 = vsel %vm337_vm1, %v3470_v30, 0.0  ;;  %v3376_v53 = vmul.f32 %v8104_v27, %v5997_v39  ;;  %v3377_v50 = vmul.f32 %v8104_v27, %v3329_v16  ;;  %v5629_v16 = vld [vmem:[%s7068_s10 + $0x44] sm:$0x1]  ;;  %6330 = vmatpush3.bf16.msra.mxu0 %v6862_v24 }
  0xe7   : > { %v8211_v55 = vsel %vm1163_vm2, %v9702_v54, %v1177_v62  ;;  %v8223_v47 = vpack.c.bf16 %v3614_v7, %v3614_v7  ;;  %v3702_v63 = vshrl.u32 %v8206_v19, 16  ;;  %v3704_v35 = vshll.u32 %v8206_v19, 16  ;;  %4218 = vmatprep.mubr.bf16.mxu0 %v3700_v14  ;;  %6331 = vmatprep.subr.bf16.mxu0 %v6863_v33 }
  0xe8   : > { %v3423_v62 = vadd.f32 %v8120_v32, %v3375_v60  ;;  %v3424_v36 = vadd.f32 %v8120_v32, %v3376_v53  ;;  %v3425_v0 = vadd.f32 %v8120_v32, %v3377_v50  ;;  %v1179_v30 = vrot.slane %v7751_v49, 1 }
  0xe9   : > { %v1180_v39 = vrot.slane %v7753_v10, 1  ;;  %v3706_v8 = vrot.slane %v3704_v35, 1  ;;  %v3709_v23 = vshll.u32 %v8223_v47, 16  ;;  %v3330_v56 = vunpack.c.l.bf16 %v5627_v26  ;;  %v6039_v35 = vld [vmem:[%s7068_s10 + $0x48] sm:$0xff]  }
  0xea   : > { %v3471_v43 = vmax.f32 %v3423_v62, 0.0  ;;  %v8238_v25 = vpack.c.bf16 %v3469_v29, %v3468_v12  ;;  %v3472_v57 = vmax.f32 %v3424_v36, 0.0  ;;  %v3473_v54 = vmax.f32 %v3425_v0, 0.0  ;;  %5617 = vmatmul.mubr.msk.bf16.gmra.mrb[76].mxu1 %vm7182_vm5, %v8130_v61  ;;  %6332 = vmatpush3.bf16.msra.mxu0 %v6864_v31 }
  0xeb   : > { %v3331_v49 = vunpack.c.h.bf16 %v5627_v26  ;;  %v3707_v10 = vor.u32 %v3706_v8, %v3702_v63  ;;  %v3711_v60 = vrot.slane %v3709_v23, 1  ;;  %v3332_v7 = vunpack.c.l.bf16 %v5629_v16  ;;  %6517 = vmatprep.mubr.bf16.mxu1 %v8204_v15 }
  0xec   : > { %v3615_v24 = vsel %vm332_vm0, %v3471_v43, 0.0  ;;  %v3617_v14 = vsel %vm337_vm1, %v3473_v54, 0.0  ;;  %v8247_v50 = vsel %vm1163_vm2, %v1179_v30, %v1180_v39  ;;  %v3378_v12 = vmul.f32 %v8104_v27, %v3330_v56  ;;  %v5632_v54 = vld [vmem:[%s7068_s10 + $0x50] sm:$0x1] }
  0xed   : > { %v8244_v53 = vpack.c.bf16 %v3472_v57, %v3615_v24  ;;  %v3712_v29 = vsel %vm922_vm3, %v3707_v10, %v3711_v60  ;;  %v8254_v33 = vpack.c.bf16 %v3617_v14, %v3617_v14  ;;  %v1183_v26 = vrot.slane %v7772_v42, 1  ;;  %5740 = vmatmul.mubr.msk.bf16.vlgmr.msra.gmra.mrb[80].mxu0 %vm7182_vm5, %v8188_v34 }
  0xee   : > { %v3379_v63 = vmul.f32 %v8104_v27, %v3331_v49  ;;  %v3380_v0 = vmul.f32 %v8104_v27, %v3332_v7  ;;  %v3426_v61 = vadd.f32 %v8120_v32, %v3378_v12  ;;  %v1185_v42 = vrot.slane %v7813_v41, 1  ;;  %4226 = vmatprep.mubr.bf16.mxu0 %v3712_v29  ;;  %v6866_v12 = vld [vmem:[%s9576_s1 + $0x208] sm:$0xff]  }
  0xef   : > { %v3714_v62 = vshrl.u32 %v8244_v53, 16  ;;  %v3716_v36 = vshll.u32 %v8244_v53, 16  ;;  %v3721_v30 = vshll.u32 %v8254_v33, 16  ;;  %v1186_v16 = vrot.slane %v7818_v20, 1 }
  0xf0   : > { %v3427_v39 = vadd.f32 %v8120_v32, %v3379_v63  ;;  %v3428_v8 = vadd.f32 %v8120_v32, %v3380_v0  ;;  %v3474_v23 = vmax.f32 %v3426_v61, 0.0  ;;  %v6000_v56 = vunpack.c.l.bf16 %v6039_v35 }
  0xf1   : > { %v3718_v31 = vrot.slane %v3716_v36, 1  ;;  %v3723_v49 = vrot.slane %v3721_v30, 1  ;;  %v8273_v10 = vpack.c.bf16 %v3472_v57, %v3471_v43  ;;  %v9703_v60 = vrot.slane %v9691_v45, 1  ;;  %v5633_v30 = vld [vmem:[%s7068_s10 + $0x54] sm:$0xff]  }
  0xf2   : > { %v3475_v20 = vmax.f32 %v3427_v39, 0.0  ;;  %v3476_v7 = vmax.f32 %v3428_v8, 0.0  ;;  %v3618_v34 = vsel %vm332_vm0, %v3474_v23, 0.0  ;;  %v6001_v14 = vunpack.c.h.bf16 %v6039_v35  ;;  %6518 = vmatmul.mubr.bf16.vlgmr.msra.gmra.mrb[80].mxu1 %v8145_v37  ;;  %v6877_v39 = vld [vmem:[%s9576_s1 + $0x200] sm:$0xff]   ;;  %v6867_v8 = vld [vmem:[%s9576_s1 + $0x210] sm:$0xff]  }
  0xf3   : > { %v8278_v41 = vsel %vm1163_vm2, %v9703_v60, %v1183_v26  ;;  %v3719_v24 = vor.u32 %v3718_v31, %v3714_v62  ;;  %v1189_v43 = vrot.slane %v7831_v6, 1  ;;  %v3335_v45 = vunpack.c.l.bf16 %v5632_v54  ;;  %6550 = vmatpush3.bf16.msra.mxu1 %v6877_v39  ;;  %6521 = vmatprep.mubr.bf16.mxu1 %v8158_v2  ;;  %v5635_v60 = vld [vmem:[%s7068_s10 + $0x5c] sm:$0x1] }
  0xf4   : > { %v8285_v29 = vpack.c.bf16 %v3475_v20, %v3618_v34  ;;  %v3381_v57 = vmul.f32 %v8104_v27, %v6000_v56  ;;  %v3620_v63 = vsel %vm337_vm1, %v3476_v7, 0.0  ;;  %v8293_v62 = vsel %vm1163_vm2, %v1185_v42, %v1186_v16  ;;  %6551 = vmatprep.subr.bf16.mxu1 %v6866_v12 }
  0xf5   : > { %v3724_v26 = vsel %vm922_vm3, %v3719_v24, %v3723_v49  ;;  %v3382_v35 = vmul.f32 %v8104_v27, %v6001_v14  ;;  %v8297_v36 = vpack.c.bf16 %v3620_v63, %v3620_v63  ;;  %v3383_v61 = vmul.f32 %v8104_v27, %v3335_v45  ;;  %5743 = vmatmul.mubr.msk.bf16.gmra.mrb[84].mxu0 %vm7182_vm5, %v8238_v25 }
  0xf6   : > { %v3726_v0 = vshrl.u32 %v8285_v29, 16  ;;  %v3728_v6 = vshll.u32 %v8285_v29, 16  ;;  %v3429_v42 = vadd.f32 %v8120_v32, %v3381_v57  ;;  %v1191_v16 = vrot.slane %v7860_v44, 1  ;;  %4234 = vmatprep.mubr.bf16.mxu0 %v3724_v26 }
  0xf7   : > { %v3430_v37 = vadd.f32 %v8120_v32, %v3382_v35  ;;  %v1192_v31 = vrot.slane %v7865_v58, 1  ;;  %v3733_v54 = vshll.u32 %v8297_v36, 16  ;;  %v3431_v49 = vadd.f32 %v8120_v32, %v3383_v61  ;;  %6552 = vmatpush3.bf16.msra.mxu1 %v6866_v12 }
  0xf8   : > { %v3730_v56 = vrot.slane %v3728_v6, 1  ;;  %v1194_v2 = vrot.slane %v7890_v28, 1  ;;  %v3477_v44 = vmax.f32 %v3429_v42, 0.0  ;;  %v1195_v58 = vrot.slane %v7903_v59, 1  ;;  %6553 = vmatprep.subr.bf16.mxu1 %v6867_v8  ;;  %v6868_v59 = vld [vmem:[%s9576_s1 + $0x218] sm:$0xff]  }
  0xf9   : > { %v3478_v24 = vmax.f32 %v3430_v37, 0.0  ;;  %v3336_v7 = vunpack.c.l.bf16 %v5633_v30  ;;  %v3735_v14 = vrot.slane %v3733_v54, 1  ;;  %v9704_v45 = vrot.slane %v7653_v1, 1 }
  0xfa   : > { %v3731_v34 = vor.u32 %v3730_v56, %v3726_v0  ;;  %v3479_v63 = vmax.f32 %v3431_v49, 0.0  ;;  %v8327_v28 = vpack.c.bf16 %v3475_v20, %v3474_v23  ;;  %v3621_v25 = vsel %vm332_vm0, %v3477_v44, 0.0  ;;  %6522 = vmatmul.mubr.bf16.gmra.mrb[84].mxu1 %v8195_v48 }
  0xfb   : > { %v8325_v57 = vsel %vm1163_vm2, %v9704_v45, %v1189_v43  ;;  %v3337_v35 = vunpack.c.h.bf16 %v5633_v30  ;;  %v3338_v6 = vunpack.c.l.bf16 %v5635_v60  ;;  %v8336_v43 = vpack.c.bf16 %v3478_v24, %v3621_v25  ;;  %6525 = vmatprep.mubr.bf16.mxu1 %v8211_v55  ;;  %6554 = vmatpush3.bf16.msra.mxu1 %v6867_v8  ;;  %v6869_v60 = vld [vmem:[%s9576_s1 + $0x220] sm:$0xff]  }
  0xfc   : > { %v3623_v1 = vsel %vm337_vm1, %v3479_v63, 0.0  ;;  %v8339_v12 = vsel %vm1163_vm2, %v1191_v16, %v1192_v31  ;;  %v3384_v23 = vmul.f32 %v8104_v27, %v3336_v7  ;;  %v8345_v26 = vsel %vm1163_vm2, %v1194_v2, %v1195_v58  ;;  %v6040_v16 = vld [vmem:[%s7068_s10 + $0x60] sm:$0xff]   ;;  %6555 = vmatprep.subr.bf16.mxu1 %v6868_v59  ;;  %v5638_v58 = vld [vmem:[%s7068_s10 + $0x68] sm:$0x1] }
  0xfd   : > { %v8342_v20 = vpack.c.bf16 %v3623_v1, %v3623_v1  ;;  %v3385_v0 = vmul.f32 %v8104_v27, %v3337_v35  ;;  %v3386_v61 = vmul.f32 %v8104_v27, %v3338_v6  ;;  %v3736_v30 = vsel %vm922_vm3, %v3731_v34, %v3735_v14  ;;  %5746 = vmatmul.mubr.msk.bf16.gmra.mrb[88].mxu0 %vm7182_vm5, %v8273_v10 }
  0xfe   : > { %v3738_v39 = vshrl.u32 %v8336_v43, 16  ;;  %v3740_v42 = vshll.u32 %v8336_v43, 16  ;;  %v8354_v37 = vadd.f32 %v8120_v32, %v3384_v23  ;;  %v1200_v54 = vrot.slane %v7967_v38, 1  ;;  %4242 = vmatprep.mubr.bf16.mxu0 %v3736_v30 }
  0xff   : > { %v3745_v31 = vshll.u32 %v8342_v20, 16  ;;  %v8360_v56 = vadd.f32 %v8120_v32, %v3385_v0  ;;  %v3434_v48 = vadd.f32 %v8120_v32, %v3386_v61  ;;  %v8364_v2 = vpack.c.bf16 %v3478_v24, %v3477_v44  ;;  %6556 = vmatpush3.bf16.msra.mxu1 %v6868_v59  ;;  %v6870_v59 = vld [vmem:[%s9576_s1 + $0x228] sm:$0xff]  }
 0x100   : > { %v3742_v49 = vrot.slane %v3740_v42, 1  ;;  %v3480_v55 = vmax.f32 %v8354_v37, 0.0  ;;  %v1201_v8 = vrot.slane %v7969_v13, 1  ;;  %v6004_v14 = vunpack.c.l.bf16 %v6040_v16  ;;  %6557 = vmatprep.subr.bf16.mxu1 %v6869_v60 }
 0x101   : > { %v3747_v7 = vrot.slane %v3745_v31, 1  ;;  %v3481_v38 = vmax.f32 %v8360_v56, 0.0  ;;  %v3482_v34 = vmax.f32 %v3434_v48, 0.0  ;;  %v6005_v13 = vunpack.c.h.bf16 %v6040_v16 }
 0x102   : > { %v3743_v44 = vor.u32 %v3742_v49, %v3738_v39  ;;  %v3624_v24 = vsel %vm332_vm0, %v3480_v55, 0.0  ;;  %v8381_v45 = vsel %vm1163_vm2, %v1200_v54, %v1201_v8  ;;  %v1197_v25 = vrot.slane %v7933_v5, 1  ;;  %6526 = vmatmul.mubr.bf16.gmra.mrb[88].mxu1 %v8247_v50  ;;  %v5639_v49 = vld [vmem:[%s7068_s10 + $0x6c] sm:$0xff]  }
 0x103   : > { %v3626_v10 = vsel %vm337_vm1, %v3482_v34, 0.0  ;;  %v8387_v63 = vpack.c.bf16 %v3481_v38, %v3624_v24  ;;  %v3341_v35 = vunpack.c.l.bf16 %v5638_v58  ;;  %v3387_v23 = vmul.f32 %v8104_v27, %v6004_v14  ;;  %6529 = vmatprep.mubr.bf16.mxu1 %v8278_v41  ;;  %6558 = vmatpush3.bf16.msra.mxu1 %v6869_v60  ;;  %v6871_v41 = vld [vmem:[%s9576_s1 + $0x230] sm:$0xff]   ;;  %v6061_v60 = vpop.f32.mrb[0].mxu0 }
 0x104   : > { %v3748_v6 = vsel %vm922_vm3, %v3743_v44, %v3747_v7  ;;  %v8391_v1 = vpack.c.bf16 %v3626_v10, %v3626_v10  ;;  %v3388_v0 = vmul.f32 %v8104_v27, %v6005_v13  ;;  %v1203_v42 = vrot.slane %v8007_v52, 1  ;;  %v5641_v7 = vld [vmem:[%s7068_s10 + $0x74] sm:$0x1]  ;;  %6559 = vmatprep.subr.bf16.mxu1 %v6870_v59  ;;  %v6062_v24 = vpop.f32.mrb[1].mxu0 }
 0x105   : > { %v3750_v61 = vshrl.u32 %v8387_v63, 16  ;;  %v3752_v30 = vshll.u32 %v8387_v63, 16  ;;  %v3389_v39 = vmul.f32 %v8104_v27, %v3341_v35  ;;  %v8405_v31 = vadd.f32 %v8120_v32, %v3387_v23  ;;  %5749 = vmatmul.mubr.msk.bf16.gmra.mrb[92].mxu0 %vm7182_vm5, %v8327_v28 }
 0x106   : > { %v3757_v16 = vshll.u32 %v8391_v1, 16  ;;  %v8408_v48 = vadd.f32 %v8120_v32, %v3388_v0  ;;  %v1204_v54 = vrot.slane %v8016_v17, 1  ;;  %v1206_v52 = vrot.slane %v8053_v3, 1  ;;  %4250 = vmatprep.mubr.bf16.mxu0 %v3748_v6 }
 0x107   : > { %v3754_v8 = vrot.slane %v3752_v30, 1  ;;  %v3437_v58 = vadd.f32 %v8120_v32, %v3389_v39  ;;  %v1207_v50 = vrot.slane %v8056_v51, 1  ;;  %v3483_v14 = vmax.f32 %v8405_v31, 0.0  ;;  %v6064_v30 = vpop.f32.mrb[2].mxu0  ;;  %6560 = vmatpush3.bf16.msra.mxu1 %v6870_v59  ;;  %v6872_v59 = vld [vmem:[%s9576_s1 + $0x238] sm:$0xff]  }
 0x108   : > { %v3759_v34 = vrot.slane %v3757_v16, 1  ;;  %v3484_v44 = vmax.f32 %v8408_v48, 0.0  ;;  %v8420_v17 = vsel %vm1163_vm2, %v1203_v42, %v1204_v54  ;;  %v3342_v10 = vunpack.c.l.bf16 %v5639_v49  ;;  %v6065_v42 = vpop.f32.mrb[3].mxu0  ;;  %6561 = vmatprep.subr.bf16.mxu1 %v6871_v41  ;;  %v5650_v31 = vld [vmem:[%s7068_s10 + $0x98] sm:$0x1] }
 0x109   : > { %v3755_v3 = vor.u32 %v3754_v8, %v3750_v61  ;;  %v3485_v51 = vmax.f32 %v3437_v58, 0.0  ;;  %v8429_v13 = vsel %vm1163_vm2, %v1206_v52, %v1207_v50  ;;  %v1198_v35 = vrot.slane %v7943_v21, 1  ;;  %v6041_v52 = vld [vmem:[%s7068_s10 + $0x78] sm:$0xff]  }
 0x10a   : > { %v3627_v23 = vsel %vm332_vm0, %v3483_v14, 0.0  ;;  %v8436_v0 = vadd.f32 %v6062_v24, %v6061_v60  ;;  %v3343_v28 = vunpack.c.h.bf16 %v5639_v49  ;;  %v3344_v16 = vunpack.c.l.bf16 %v5641_v7  ;;  %6530 = vmatmul.mubr.bf16.gmra.mrb[92].mxu1 %v8293_v62 }
 0x10b   : > { %v3760_v61 = vsel %vm922_vm3, %v3755_v3, %v3759_v34  ;;  %v3629_v39 = vsel %vm337_vm1, %v3485_v51, 0.0  ;;  %v8443_v6 = vpack.c.bf16 %v3484_v44, %v3627_v23  ;;  %v8447_v8 = vadd.f32 %v6065_v42, %v6064_v30  ;;  %v5644_v23 = vld [vmem:[%s7068_s10 + $0x80] sm:$0x1]  ;;  %6533 = vmatprep.mubr.bf16.mxu1 %v8325_v57  ;;  %6562 = vmatpush3.bf16.msra.mxu1 %v6871_v41 }
 0x10c   : > { %v8445_v54 = vpack.c.bf16 %v3629_v39, %v3629_v39  ;;  %v3390_v49 = vmul.f32 %v8104_v27, %v3342_v10  ;;  %v3391_v58 = vmul.f32 %v8104_v27, %v3343_v28  ;;  %v3392_v7 = vmul.f32 %v8104_v27, %v3344_v16  ;;  %6563 = vmatprep.subr.bf16.mxu1 %v6872_v59 }
 0x10d   : > { %v3762_v50 = vshrl.u32 %v8443_v6, 16  ;;  %v3764_v34 = vshll.u32 %v8443_v6, 16  ;;  %v1209_v60 = vrot.slane %v8109_v4, 1  ;;  %v1210_v10 = vrot.slane %v8114_v9, 1  ;;  %5752 = vmatmul.mubr.msk.bf16.gmra.mrb[96].mxu0 %vm7182_vm5, %v8364_v2 }
 0x10e   : > { %v3769_v3 = vshll.u32 %v8445_v54, 16  ;;  %v8462_v51 = vadd.f32 %v8120_v32, %v3390_v49  ;;  %v8465_v24 = vadd.f32 %v8120_v32, %v3391_v58  ;;  %v3440_v28 = vadd.f32 %v8120_v32, %v3392_v7  ;;  %4258 = vmatprep.mubr.bf16.mxu0 %v3760_v61 }
 0x10f   : > { %v3766_v30 = vrot.slane %v3764_v34, 1  ;;  %v6008_v4 = vunpack.c.l.bf16 %v6041_v52  ;;  %v6009_v39 = vunpack.c.h.bf16 %v6041_v52  ;;  %v8474_v49 = vsel %vm1163_vm2, %v1209_v60, %v1210_v10  ;;  %6564 = vmatpush3.bf16.msra.mxu1 %v6872_v59 }
 0x110   : > { %v3771_v62 = vrot.slane %v3769_v3, 1  ;;  %v3486_v42 = vmax.f32 %v8462_v51, 0.0  ;;  %v9632_v16 = vmax.f32 %v8465_v24, 0.0  ;;  %v3488_v57 = vmax.f32 %v3440_v28, 0.0 }
 0x111   : > { %v3767_v9 = vor.u32 %v3766_v30, %v3762_v50  ;;  %v3347_v41 = vunpack.c.l.bf16 %v5644_v23  ;;  %v3393_v58 = vmul.f32 %v8104_v27, %v6008_v4  ;;  %v5754_v52 = vpack.c.bf16 %v3481_v38, %v3480_v55  ;;  %v6067_v30 = vpop.f32.mrb[4].mxu0  ;;  %v5645_v4 = vld [vmem:[%s7068_s10 + $0x84] sm:$0xff]  }
 0x112   : > { %v3630_v34 = vsel %vm332_vm0, %v3486_v42, 0.0  ;;  %v3394_v7 = vmul.f32 %v8104_v27, %v6009_v39  ;;  %v3929_v2 = vrot.slane %v8153_v11, 1  ;;  %v3632_v61 = vsel %vm337_vm1, %v3488_v57, 0.0  ;;  %v9705_v11 = vld [vmem:[#allocation9_spill] sm:$0xff]  ;;  %6534 = vmatmul.mubr.bf16.gmra.mrb[0].mxu1 %v8339_v12  ;;  %v5647_v12 = vld [vmem:[%s7068_s10 + $0x8c] sm:$0x1] }
 0x113   : > { %v3772_v50 = vsel %vm922_vm3, %v3767_v9, %v3771_v62  ;;  %v8495_v37 = vpack.c.bf16 %v9632_v16, %v3630_v34  ;;  %v3395_v56 = vmul.f32 %v8104_v27, %v3347_v41  ;;  %v8498_v55 = vpack.c.bf16 %v3632_v61, %v3632_v61  ;;  %v6068_v62 = vpop.f32.mrb[5].mxu0  ;;  %6537 = vmatprep.mubr.bf16.mxu1 %v8345_v26 }
 0x114   : > { %v8501_v38 = vadd.f32 %v8120_v32, %v3393_v58  ;;  %v8504_v60 = vadd.f32 %v8120_v32, %v3394_v7  ;;  %v3930_v3 = vrot.slane %v9705_v11, 1  ;;  %v3932_v28 = vrot.slane %v8206_v19, 1  ;;  %v6070_v7 = vpop.f32.mrb[6].mxu0 }
 0x115   : > { %v3774_v10 = vshrl.u32 %v8495_v37, 16  ;;  %v3776_v23 = vshll.u32 %v8495_v37, 16  ;;  %v3443_v59 = vadd.f32 %v8120_v32, %v3395_v56  ;;  %v3781_v39 = vshll.u32 %v8498_v55, 16  ;;  %v6071_v56 = vpop.f32.mrb[7].mxu0  ;;  %5755 = vmatmul.mubr.msk.bf16.gmra.mrb[100].mxu0 %vm7182_vm5, %v5754_v52 }
 0x116   : > { %v3489_v9 = vmax.f32 %v8501_v38, 0.0  ;;  %v3490_v57 = vmax.f32 %v8504_v60, 0.0  ;;  %v8517_v41 = vsel %vm1163_vm2, %v3929_v2, %v3930_v3  ;;  %v8520_v34 = vadd.f32 %v6068_v62, %v6067_v30  ;;  %4266 = vmatprep.mubr.bf16.mxu0 %v3772_v50 }
 0x117   : > { %v3778_v58 = vrot.slane %v3776_v23, 1  ;;  %v3491_v19 = vmax.f32 %v3443_v59, 0.0  ;;  %v3933_v61 = vrot.slane %v8223_v47, 1  ;;  %v3348_v16 = vunpack.c.l.bf16 %v5645_v4 }
 0x118   : > { %v3633_v11 = vsel %vm332_vm0, %v3489_v9, 0.0  ;;  %v1199_v26 = vsel %vm1163_vm2, %v1197_v25, %v1198_v35  ;;  %v8535_v2 = vadd.f32 %v6071_v56, %v6070_v7  ;;  %v3349_v21 = vunpack.c.h.bf16 %v5645_v4 }
 0x119   : > { %v3635_v47 = vsel %vm337_vm1, %v3491_v19, 0.0  ;;  %v8541_v3 = vpack.c.bf16 %v3490_v57, %v3633_v11  ;;  %v8546_v5 = vsel %vm1163_vm2, %v3932_v28, %v3933_v61  ;;  %v3350_v25 = vunpack.c.l.bf16 %v5647_v12  ;;  %v6042_v19 = vld [vmem:[%s7068_s10 + $0x90] sm:$0xff]  }
 0x11a   : > { %v8543_v23 = vpack.c.bf16 %v3635_v47, %v3635_v47  ;;  %v3779_v35 = vor.u32 %v3778_v58, %v3774_v10  ;;  %v3783_v52 = vrot.slane %v3781_v39, 1  ;;  %v3396_v59 = vmul.f32 %v8104_v27, %v3348_v16  ;;  %6538 = vmatmul.mubr.bf16.gmra.mrb[4].mxu1 %v1199_v26 }
 0x11b   : > { %v3788_v30 = vshll.u32 %v8541_v3, 16  ;;  %v3397_v62 = vmul.f32 %v8104_v27, %v3349_v21  ;;  %v3398_v7 = vmul.f32 %v8104_v27, %v3350_v25  ;;  %v3935_v50 = vrot.slane %v8244_v53, 1  ;;  %6541 = vmatprep.mubr.bf16.mxu1 %v8381_v45 }
 0x11c   : > { %v5757_v28 = vpack.c.bf16 %v3484_v44, %v3483_v14  ;;  %v3793_v10 = vshll.u32 %v8543_v23, 16  ;;  %v8560_v4 = vadd.f32 %v8120_v32, %v3396_v59  ;;  %v3936_v39 = vrot.slane %v8254_v33, 1 }
 0x11d   : > { %v3786_v16 = vshrl.u32 %v8541_v3, 16  ;;  %v3790_v58 = vrot.slane %v3788_v30, 1  ;;  %v8565_v61 = vadd.f32 %v8120_v32, %v3397_v62  ;;  %v3446_v53 = vadd.f32 %v8120_v32, %v3398_v7 }
 0x11e   : > { %v3784_v48 = vsel %vm922_vm3, %v3779_v35, %v3783_v52  ;;  %v3492_v14 = vmax.f32 %v8560_v4, 0.0  ;;  %v8573_v44 = vsel %vm1163_vm2, %v3935_v50, %v3936_v39  ;;  %v6012_v33 = vunpack.c.l.bf16 %v6042_v19  ;;  %5758 = vmatmul.mubr.msk.bf16.gmra.mrb[104].mxu0 %vm7182_vm5, %v5757_v28 }
 0x11f   : > { %v3493_v12 = vmax.f32 %v8565_v61, 0.0  ;;  %v3494_v56 = vmax.f32 %v3446_v53, 0.0  ;;  %v6013_v11 = vunpack.c.h.bf16 %v6042_v19  ;;  %v3795_v26 = vrot.slane %v3793_v10, 1  ;;  %4274 = vmatprep.mubr.bf16.mxu0 %v3784_v48  ;;  %v5659_v61 = vld [vmem:[%s7068_s10 + $0xbc] sm:$0x1] }
 0x120   : > { %v3636_v45 = vsel %vm332_vm0, %v3492_v14, 0.0  ;;  %v3353_v47 = vunpack.c.l.bf16 %v5650_v31  ;;  %v3399_v21 = vmul.f32 %v8104_v27, %v6012_v33  ;;  %v3791_v25 = vor.u32 %v3790_v58, %v3786_v16  ;;  %v6073_v50 = vpop.f32.mrb[8].mxu0 }
 0x121   : > { %v3638_v35 = vsel %vm337_vm1, %v3494_v56, 0.0  ;;  %v8587_v52 = vpack.c.bf16 %v3493_v12, %v3636_v45  ;;  %v3400_v30 = vmul.f32 %v8104_v27, %v6013_v11  ;;  %v9706_v10 = vmax.f32 %v8465_v24, 0.0  ;;  %v6074_v16 = vpop.f32.mrb[9].mxu0  ;;  %v5651_v11 = vld [vmem:[%s7068_s10 + $0x9c] sm:$0xff]  }
 0x122   : > { %v8590_v59 = vpack.c.bf16 %v3638_v35, %v3638_v35  ;;  %v3401_v62 = vmul.f32 %v8104_v27, %v3353_v47  ;;  %v8594_v7 = vadd.f32 %v8120_v32, %v3399_v21  ;;  %6542 = vmatmul.mubr.bf16.gmra.mrb[8].mxu1 %v8420_v17  ;;  %v3796_v31 = vsel %vm922_vm3, %v3791_v25, %v3795_v26  ;;  %v6076_v33 = vpop.f32.mrb[10].mxu0  ;;  %v5653_v25 = vld [vmem:[%s7068_s10 + $0xa4] sm:$0x1] }
 0x123   : > { %v3800_v19 = vshll.u32 %v8587_v52, 16  ;;  %v8598_v28 = vadd.f32 %v8120_v32, %v3400_v30  ;;  %v5760_v39 = vpack.c.bf16 %v9706_v10, %v3486_v42  ;;  %v8608_v48 = vadd.f32 %v6074_v16, %v6073_v50  ;;  %6545 = vmatprep.mubr.bf16.mxu1 %v8429_v13  ;;  %v6077_v24 = vpop.f32.mrb[11].mxu0 }
 0x124   : > { %v3449_v58 = vadd.f32 %v8120_v32, %v3401_v62  ;;  %v3495_v53 = vmax.f32 %v8594_v7, 0.0  ;;  %v3805_v56 = vshll.u32 %v8590_v59, 16  ;;  %v3798_v42 = vshrl.u32 %v8587_v52, 16 }
 0x125   : > { %v3496_v51 = vmax.f32 %v8598_v28, 0.0  ;;  %v3802_v45 = vrot.slane %v3800_v19, 1  ;;  %v8619_v26 = vadd.f32 %v6077_v24, %v6076_v33  ;;  %v3354_v35 = vunpack.c.l.bf16 %v5651_v11  ;;  %v6043_v24 = vld [vmem:[%s7068_s10 + $0xa8] sm:$0xff]  }
 0x126   : > { %v3497_v47 = vmax.f32 %v3449_v58, 0.0  ;;  %v3639_v17 = vsel %vm332_vm0, %v3495_v53, 0.0  ;;  %5761 = vmatmul.mubr.msk.bf16.gmra.mrb[108].mxu0 %vm7182_vm5, %v5760_v39  ;;  %v3355_v30 = vunpack.c.h.bf16 %v5651_v11  ;;  %v3807_v62 = vrot.slane %v3805_v56, 1 }
 0x127   : > { %v8623_v21 = vpack.c.bf16 %v3496_v51, %v3639_v17  ;;  %4282 = vmatprep.mubr.bf16.mxu0 %v3796_v31  ;;  %v3803_v10 = vor.u32 %v3802_v45, %v3798_v42  ;;  %v3356_v16 = vunpack.c.l.bf16 %v5653_v25  ;;  %v3402_v58 = vmul.f32 %v8104_v27, %v3354_v35  ;;  %v5656_v17 = vld [vmem:[%s7068_s10 + $0xb0] sm:$0x1] }
 0x128   : > { %v3641_v13 = vsel %vm337_vm1, %v3497_v47, 0.0  ;;  %v3403_v33 = vmul.f32 %v8104_v27, %v3355_v30  ;;  %v5763_v39 = vpack.c.bf16 %v3490_v57, %v3489_v9  ;;  %v6016_v38 = vunpack.c.l.bf16 %v6043_v24 }
 0x129   : > { %v8630_v50 = vpack.c.bf16 %v3641_v13, %v3641_v13  ;;  %v3812_v19 = vshll.u32 %v8623_v21, 16  ;;  %v3810_v31 = vshrl.u32 %v8623_v21, 16  ;;  %v3404_v47 = vmul.f32 %v8104_v27, %v3356_v16 }
 0x12a   : > { %v8644_v42 = vadd.f32 %v8120_v32, %v3402_v58  ;;  %v8647_v45 = vadd.f32 %v8120_v32, %v3403_v33  ;;  %6546 = vmatmul.mubr.bf16.gmra.mrb[12].mxu1 %v8474_v49  ;;  %v3808_v60 = vsel %vm922_vm3, %v3803_v10, %v3807_v62  ;;  %v6017_v13 = vunpack.c.h.bf16 %v6043_v24 }
 0x12b   : > { %v3814_v11 = vrot.slane %v3812_v19, 1  ;;  %v3817_v56 = vshll.u32 %v8630_v50, 16  ;;  %6565 = vmatprep.mubr.bf16.mxu1 %v8517_v41  ;;  %v3452_v9 = vadd.f32 %v8120_v32, %v3404_v47  ;;  %v3359_v35 = vunpack.c.l.bf16 %v5656_v17 }
 0x12c   : > { %v3498_v57 = vmax.f32 %v8644_v42, 0.0  ;;  %v3499_v25 = vmax.f32 %v8647_v45, 0.0  ;;  %v3405_v30 = vmul.f32 %v8104_v27, %v6016_v38  ;;  %v3406_v10 = vmul.f32 %v8104_v27, %v6017_v13 }
 0x12d   : > { %v3815_v19 = vor.u32 %v3814_v11, %v3810_v31  ;;  %v3819_v49 = vrot.slane %v3817_v56, 1  ;;  %v3500_v16 = vmax.f32 %v3452_v9, 0.0  ;;  %v3407_v58 = vmul.f32 %v8104_v27, %v3359_v35 }
 0x12e   : > { %5764 = vmatmul.mubr.msk.bf16.gmra.mrb[112].mxu0 %vm7182_vm5, %v5763_v39  ;;  %v3642_v41 = vsel %vm332_vm0, %v3498_v57, 0.0  ;;  %v8670_v33 = vadd.f32 %v8120_v32, %v3405_v30  ;;  %v3938_v24 = vrot.slane %v8285_v29, 1  ;;  %v3939_v39 = vrot.slane %v8297_v36, 1  ;;  %v6079_v31 = vpop.f32.mrb[12].mxu0  ;;  %v5657_v29 = vld [vmem:[%s7068_s10 + $0xb4] sm:$0xff]  }
 0x12f   : > { %4290 = vmatprep.mubr.bf16.mxu0 %v3808_v60  ;;  %v8665_v62 = vpack.c.bf16 %v3499_v25, %v3642_v41  ;;  %v3644_v11 = vsel %vm337_vm1, %v3500_v16, 0.0  ;;  %v5766_v56 = vpack.c.bf16 %v3493_v12, %v3492_v14  ;;  %v6080_v47 = vpop.f32.mrb[13].mxu0  ;;  %v8684_v60 = vadd.f32 %v8120_v32, %v3406_v10 }
 0x130   : > { %v8680_v17 = vpack.c.bf16 %v3644_v11, %v3644_v11  ;;  %v8687_v9 = vadd.f32 %v6080_v47, %v6079_v31  ;;  %v6082_v36 = vpop.f32.mrb[14].mxu0  ;;  %v3820_v13 = vsel %vm922_vm3, %v3815_v19, %v3819_v49  ;;  %v3455_v35 = vadd.f32 %v8120_v32, %v3407_v58 }
 0x131   : > { %v3824_v38 = vshll.u32 %v8665_v62, 16  ;;  %v3501_v4 = vmax.f32 %v8670_v33, 0.0  ;;  %v6083_v14 = vpop.f32.mrb[15].mxu0  ;;  %v3822_v12 = vshrl.u32 %v8665_v62, 16  ;;  %v3502_v41 = vmax.f32 %v8684_v60, 0.0 }
 0x132   : > { %6566 = vmatmul.mubr.bf16.vlgmr.msra.gmra.mrb[80].mxu1 %v8546_v5  ;;  %v3829_v16 = vshll.u32 %v8680_v17, 16  ;;  %v8698_v10 = vadd.f32 %v6083_v14, %v6082_v36  ;;  %v3503_v19 = vmax.f32 %v3455_v35, 0.0  ;;  %v3360_v58 = vunpack.c.l.bf16 %v5657_v29 }
 0x133   : > { %v3826_v30 = vrot.slane %v3824_v38, 1  ;;  %6569 = vmatprep.mubr.bf16.mxu1 %v8573_v44  ;;  %v3645_v49 = vsel %vm332_vm0, %v3501_v4, 0.0  ;;  %v3940_v5 = vsel %vm1163_vm2, %v3938_v24, %v3939_v39  ;;  %v3941_v31 = vrot.slane %v8336_v43, 1 }
 0x134   : > { %v3942_v11 = vrot.slane %v8342_v20, 1  ;;  %v8709_v47 = vpack.c.bf16 %v3502_v41, %v3645_v49  ;;  %v3647_v44 = vsel %vm337_vm1, %v3503_v19, 0.0  ;;  %v3361_v38 = vunpack.c.h.bf16 %v5657_v29 }
 0x135   : > { %v3362_v36 = vunpack.c.l.bf16 %v5659_v61  ;;  %v3408_v35 = vmul.f32 %v8104_v27, %v3360_v58  ;;  %v3944_v43 = vrot.slane %v8387_v63, 1  ;;  %v3827_v24 = vor.u32 %v3826_v30, %v3822_v12  ;;  %v6044_v27 = vld [vmem:[%s7068_s10 + $0xc0] sm:$0xff]  }
 0x136   : > { %5767 = vmatmul.mubr.msk.bf16.gmra.mrb[116].mxu0 %vm7182_vm5, %v5766_v56  ;;  %v3831_v20 = vrot.slane %v3829_v16, 1  ;;  %v3836_v39 = vshll.u32 %v8709_v47, 16  ;;  %v8718_v14 = vpack.c.bf16 %v3647_v44, %v3647_v44  ;;  %v6878_v56 = vld [vmem:[%s9578_s3] ss:$0 sm:$0xff]  ;;  %v5769_v63 = vpack.c.bf16 %v3496_v51, %v3495_v53 }
 0x137   : > { %4298 = vmatprep.mubr.bf16.mxu0 %v3820_v13  ;;  %v3409_v49 = vmul.f32 %v6878_v56, %v3361_v38  ;;  %v3410_v19 = vmul.f32 %v6878_v56, %v3362_v36  ;;  %v8724_v29 = vadd.f32 %v8120_v32, %v3408_v35  ;;  %v3943_v13 = vsel %vm1163_vm2, %v3941_v31, %v3942_v11  ;;  %v6879_v16 = vld [vmem:[%s9579_s4] ss:$0 sm:$0xff]  ;;  %v5662_v11 = vld [vmem:[%s7068_s10 + $0xc8] sm:$0x1] }
 0x138   : > { %v3945_v61 = vrot.slane %v8391_v1, 1  ;;  %v3947_v12 = vrot.slane %v8443_v6, 1  ;;  %v3948_v30 = vrot.slane %v8445_v54, 1  ;;  %v3832_v7 = vsel %vm922_vm3, %v3827_v24, %v3831_v20 }
 0x139   : > { %v8738_v32 = vadd.f32 %v6879_v16, %v3409_v49  ;;  %v3458_v58 = vadd.f32 %v6879_v16, %v3410_v19  ;;  %v9633_v31 = vmax.f32 %v8724_v29, 0.0  ;;  %v3834_v28 = vshrl.u32 %v8709_v47, 16 }
 0x13a   : > { %6570 = vmatmul.mubr.bf16.gmra.mrb[84].mxu1 %v3940_v5  ;;  %v3838_v1 = vrot.slane %v3836_v39, 1  ;;  %v6020_v53 = vunpack.c.l.bf16 %v6044_v27  ;;  %v3841_v6 = vshll.u32 %v8718_v14, 16  ;;  %v6021_v38 = vunpack.c.h.bf16 %v6044_v27 }
 0x13b   : > { %6573 = vmatprep.mubr.bf16.mxu1 %v3943_v13  ;;  %v9634_v54 = vmax.f32 %v8738_v32, 0.0  ;;  %v3506_v51 = vmax.f32 %v3458_v58, 0.0  ;;  %v3648_v44 = vsel %vm332_vm0, %v9633_v31, 0.0  ;;  %v3365_v36 = vunpack.c.l.bf16 %v5662_v11 }
 0x13c   : > { %v3411_v5 = vmul.f32 %v6878_v56, %v6020_v53  ;;  %v3946_v35 = vsel %vm1163_vm2, %v3944_v43, %v3945_v61  ;;  %v3950_v24 = vrot.slane %v8495_v37, 1  ;;  %v3412_v13 = vmul.f32 %v6878_v56, %v6021_v38 }
 0x13d   : > { %v3650_v20 = vsel %vm337_vm1, %v3506_v51, 0.0  ;;  %v8758_v39 = vpack.c.bf16 %v9634_v54, %v3648_v44  ;;  %v6085_v49 = vpop.f32.mrb[16].mxu0  ;;  %v3413_v58 = vmul.f32 %v6878_v56, %v3365_v36  ;;  %v3949_v37 = vsel %vm1163_vm2, %v3947_v12, %v3948_v30 }
 0x13e   : > { %5770 = vmatmul.mubr.msk.bf16.gmra.mrb[120].mxu0 %vm7182_vm5, %v5769_v63  ;;  %v6197_v19 = vpop.f32.mrb[16].mxu1  ;;  %v8760_v27 = vpack.c.bf16 %v3650_v20, %v3650_v20  ;;  %v8762_v11 = vadd.f32 %v6879_v16, %v3411_v5  ;;  %v6086_v63 = vpop.f32.mrb[17].mxu0  ;;  %v3839_v61 = vor.u32 %v3838_v1, %v3834_v28  ;;  %v3843_v53 = vrot.slane %v3841_v6, 1 }
 0x13f   : > { %4306 = vmatprep.mubr.bf16.mxu0 %v3832_v7  ;;  %v6198_v43 = vpop.f32.mrb[17].mxu1  ;;  %v3848_v51 = vshll.u32 %v8758_v39, 16  ;;  %v8766_v31 = vadd.f32 %v6086_v63, %v6085_v49  ;;  %v6088_v54 = vpop.f32.mrb[18].mxu0  ;;  %v5772_v56 = vpack.c.bf16 %v3499_v25, %v3498_v57  ;;  %v8774_v38 = vadd.f32 %v6879_v16, %v3412_v13 }
 0x140   : > { %v8768_v44 = vadd.f32 %v6198_v43, %v6197_v19  ;;  %v6200_v7 = vpop.f32.mrb[18].mxu1  ;;  %v6089_v36 = vpop.f32.mrb[19].mxu0  ;;  %v3846_v12 = vshrl.u32 %v8758_v39, 16  ;;  %v3853_v30 = vshll.u32 %v8760_v27, 16  ;;  %v3461_v28 = vadd.f32 %v6879_v16, %v3413_v58 }
 0x141   : > { %v6201_v5 = vpop.f32.mrb[19].mxu1  ;;  %v3507_v1 = vmax.f32 %v8762_v11, 0.0  ;;  %v8779_v6 = vadd.f32 %v6089_v36, %v6088_v54  ;;  %v3850_v42 = vrot.slane %v3848_v51, 1  ;;  %v3508_v45 = vmax.f32 %v8774_v38, 0.0 }
 0x142   : > { %6574 = vmatmul.mubr.bf16.gmra.mrb[88].mxu1 %v3946_v35  ;;  %v8781_v20 = vadd.f32 %v6201_v5, %v6200_v7  ;;  %v3951_v57 = vrot.slane %v8498_v55, 1  ;;  %v3844_v25 = vsel %vm922_vm3, %v3839_v61, %v3843_v53  ;;  %v3509_v49 = vmax.f32 %v3461_v28, 0.0 }
 0x143   : > { %6577 = vmatprep.mubr.bf16.mxu1 %v3949_v37  ;;  %v3651_v16 = vsel %vm332_vm0, %v3507_v1, 0.0  ;;  %v3953_v35 = vrot.slane %v8541_v3, 1  ;;  %v3954_v54 = vrot.slane %v8543_v23, 1  ;;  %v3851_v58 = vor.u32 %v3850_v42, %v3846_v12 }
 0x144   : > { %v8794_v19 = vpack.c.bf16 %v3508_v45, %v3651_v16  ;;  %v3653_v55 = vsel %vm337_vm1, %v3509_v49, 0.0  ;;  %v3855_v63 = vrot.slane %v3853_v30, 1  ;;  %v3952_v18 = vsel %vm1163_vm2, %v3950_v24, %v3951_v57 }
 0x145   : > { %v6091_v13 = vpop.f32.mrb[20].mxu0  ;;  %v8801_v3 = vpack.c.bf16 %v3653_v55, %v3653_v55  ;;  %v3955_v53 = vsel %vm1163_vm2, %v3953_v35, %v3954_v54  ;;  %v5775_v22 = vpack.c.bf16 %v3502_v41, %v3501_v4  ;;  %v3956_v36 = vrot.slane %v8587_v52, 1 }
 0x146   : > { %5773 = vmatmul.mubr.msk.bf16.gmra.mrb[124].mxu0 %vm7182_vm5, %v5772_v56  ;;  %v6092_v43 = vpop.f32.mrb[21].mxu0  ;;  %v3860_v23 = vshll.u32 %v8794_v19, 16  ;;  %v3957_v5 = vrot.slane %v8590_v59, 1  ;;  %v3856_v12 = vsel %vm922_vm3, %v3851_v58, %v3855_v63  ;;  %v3858_v42 = vshrl.u32 %v8794_v19, 16 }
 0x147   : > { %4314 = vmatprep.mubr.bf16.mxu0 %v3844_v25  ;;  %v8804_v37 = vadd.f32 %v6092_v43, %v6091_v13  ;;  %v6094_v61 = vpop.f32.mrb[22].mxu0  ;;  %v3865_v60 = vshll.u32 %v8801_v3, 16  ;;  %v3959_v41 = vrot.slane %v8623_v21, 1  ;;  %v3960_v57 = vrot.slane %v8630_v50, 1 }
 0x148   : > { %v6203_v51 = vpop.f32.mrb[20].mxu1  ;;  %v6095_v7 = vpop.f32.mrb[23].mxu0  ;;  %v3862_v33 = vrot.slane %v3860_v23, 1  ;;  %v3958_v52 = vsel %vm1163_vm2, %v3956_v36, %v3957_v5  ;;  %v9707_v13 = vmax.f32 %v8724_v29, 0.0  ;;  %v9708_v21 = vmax.f32 %v8738_v32, 0.0 }
 0x149   : > { %v6204_v56 = vpop.f32.mrb[21].mxu1  ;;  %v8811_v24 = vadd.f32 %v6095_v7, %v6094_v61  ;;  %v3867_v49 = vrot.slane %v3865_v60, 1  ;;  %v3961_v35 = vsel %vm1163_vm2, %v3959_v41, %v3960_v57  ;;  %v3969_v60 = vrot.slane %v8760_v27, 1 }
 0x14a   : > { %6578 = vmatmul.mubr.bf16.gmra.mrb[92].mxu1 %v3952_v18  ;;  %v8816_v30 = vadd.f32 %v6204_v56, %v6203_v51  ;;  %v6206_v28 = vpop.f32.mrb[22].mxu1  ;;  %v3863_v59 = vor.u32 %v3862_v33, %v3858_v42  ;;  %v5778_v50 = vpack.c.bf16 %v9708_v21, %v9707_v13  ;;  %v3963_v51 = vrot.slane %v8680_v17, 1 }
 0x14b   : > { %6581 = vmatprep.mubr.bf16.mxu1 %v3955_v53  ;;  %v6207_v4 = vpop.f32.mrb[23].mxu1  ;;  %v3962_v53 = vrot.slane %v8665_v62, 1  ;;  %v3966_v56 = vrot.slane %v8718_v14, 1  ;;  %v3968_v33 = vrot.slane %v8758_v39, 1  ;;  %v3971_v41 = vrot.slane %v8794_v19, 1 }
 0x14c   : > { %v8822_v25 = vadd.f32 %v6207_v4, %v6206_v28  ;;  %v3868_v7 = vsel %vm922_vm3, %v3863_v59, %v3867_v49  ;;  %v5781_v28 = vpack.c.bf16 %v3508_v45, %v3507_v1  ;;  %v3972_v57 = vrot.slane %v8801_v3, 1  ;;  %v9709_v1 = vld [vmem:[#allocation2_spill] sm:$0xff] }
 0x14d   : > { %v3964_v5 = vsel %vm1163_vm2, %v3962_v53, %v3963_v51  ;;  %v3970_v39 = vsel %vm1163_vm2, %v3968_v33, %v3969_v60 }
 0x14e   : > { %5776 = vmatmul.mubr.msk.bf16.gmra.mrb[128].mxu0 %vm7182_vm5, %v5775_v22  ;;  %v3965_v22 = vrot.slane %v8709_v47, 1  ;;  %v3973_v49 = vsel %vm1163_vm2, %v3971_v41, %v3972_v57 }
 0x14f   : > { %4322 = vmatprep.mubr.bf16.mxu0 %v3856_v12 }
 0x150   : > { %v6097_v16 = vpop.f32.mrb[24].mxu0  ;;  %v3967_v17 = vsel %vm1163_vm2, %v3965_v22, %v3966_v56 }
 0x151   : > { %v6209_v54 = vpop.f32.mrb[24].mxu1  ;;  %v6098_v55 = vpop.f32.mrb[25].mxu0 }
 0x152   : > { %6582 = vmatmul.mubr.bf16.gmra.mrb[0].mxu1 %v3958_v52  ;;  %v8832_v58 = vadd.f32 %v6098_v55, %v6097_v16  ;;  %v6210_v63 = vpop.f32.mrb[25].mxu1  ;;  %v6100_v18 = vpop.f32.mrb[26].mxu0 }
 0x153   : > { %v8834_v43 = vadd.f32 %v6210_v63, %v6209_v54  ;;  %v6212_v23 = vpop.f32.mrb[26].mxu1  ;;  %v6101_v61 = vpop.f32.mrb[27].mxu0  ;;  %6585 = vmatprep.mubr.bf16.mxu1 %v3961_v35 }
 0x154   : > { %v8839_v29 = vadd.f32 %v6101_v61, %v6100_v18  ;;  %v6213_v32 = vpop.f32.mrb[27].mxu1 }
 0x155   : > { %v8843_v36 = vadd.f32 %v6213_v32, %v6212_v23 }
 0x156   : > { %5779 = vmatmul.mubr.msk.bf16.gmra.mrb[132].mxu0 %vm7182_vm5, %v5778_v50 }
 0x157   : > { %4330 = vmatprep.mubr.bf16.mxu0 %v3868_v7 }
 0x158   : > { %v6103_v62 = vpop.f32.mrb[28].mxu0 }
 0x159   : > { %v6104_v12 = vpop.f32.mrb[29].mxu0 }
 0x15a   : > { %6586 = vmatmul.mubr.bf16.gmra.mrb[4].mxu1 %v3964_v5  ;;  %v8853_v47 = vadd.f32 %v6104_v12, %v6103_v62  ;;  %v6106_v14 = vpop.f32.mrb[30].mxu0 }
 0x15b   : > { %v6107_v42 = vpop.f32.mrb[31].mxu0  ;;  %6589 = vmatprep.mubr.bf16.mxu1 %v3967_v17 }
 0x15c   : > { %v8857_v4 = vadd.f32 %v6107_v42, %v6106_v14 }
 0x15d   : > { %v6215_v11 = vpop.f32.mrb[28].mxu1 }
 0x15e   : > { %5782 = vmatmul.mubr.msk.bf16.gmra.mrb[136].mxu0 %vm7182_vm5, %v5781_v28  ;;  %v6216_v38 = vpop.f32.mrb[29].mxu1 }
 0x15f   : > { %4338 = vmatprep.mubr.bf16.mxu0 %v9709_v1  ;;  %v8864_v45 = vadd.f32 %v6216_v38, %v6215_v11  ;;  %v6218_v52 = vpop.f32.mrb[30].mxu1 }
 0x160   : > { %v6219_v59 = vpop.f32.mrb[31].mxu1  ;;  %v6109_v27 = vpop.f32.mrb[32].mxu0 }
 0x161   : > { %v8868_v16 = vadd.f32 %v6219_v59, %v6218_v52  ;;  %v6110_v19 = vpop.f32.mrb[33].mxu0 }
 0x162   : > { %6590 = vmatmul.mubr.bf16.gmra.mrb[8].mxu1 %v3970_v39  ;;  %v6111_v3 = vadd.f32 %v6110_v19, %v6109_v27  ;;  %v6112_v35 = vpop.f32.mrb[34].mxu0 }
 0x163   : > { %v6113_v46 = vpop.f32.mrb[35].mxu0  ;;  %6593 = vmatprep.mubr.bf16.mxu1 %v3973_v49 }
 0x164   : > { %v6114_v54 = vadd.f32 %v6113_v46, %v6112_v35 }
 0x165   : > { %v6221_v55 = vpop.f32.mrb[32].mxu1 }
 0x166   : > { %4339 = vmatmul.mubr.bf16.gmra.mrb[140].mxu0 %v9701_v40  ;;  %v6222_v13 = vpop.f32.mrb[33].mxu1 }
 0x167   : > { %v8871_v21 = vadd.f32 %v6222_v13, %v6221_v55  ;;  %v6224_v50 = vpop.f32.mrb[34].mxu1 }
 0x168   : > { %v6225_v63 = vpop.f32.mrb[35].mxu1  ;;  %v6115_v18 = vpop.f32.mrb[36].mxu0 }
 0x169   : > { %v8873_v23 = vadd.f32 %v6225_v63, %v6224_v50  ;;  %v6116_v61 = vpop.f32.mrb[37].mxu0 }
 0x16a   : > { %6594 = vmatmul.mubr.bf16.gmra.mrb[12].mxu1 %v8204_v15  ;;  %v6117_v53 = vadd.f32 %v6116_v61, %v6115_v18  ;;  %v6118_v51 = vpop.f32.mrb[38].mxu0 }
 0x16b   : > { %v6119_v7 = vpop.f32.mrb[39].mxu0 }
 0x16c   : > { %v6120_v32 = vadd.f32 %v6119_v7, %v6118_v51 }
 0x16d   : > { %v6227_v22 = vpop.f32.mrb[36].mxu1 }
 0x16e   : > { %v6228_v56 = vpop.f32.mrb[37].mxu1 }
 0x16f   : > { %v8876_v5 = vadd.f32 %v6228_v56, %v6227_v22  ;;  %v6230_v40 = vpop.f32.mrb[38].mxu1 }
 0x170   : > { %v6231_v62 = vpop.f32.mrb[39].mxu1  ;;  %v6121_v17 = vpop.f32.mrb[40].mxu0 }
 0x171   : > { %v8878_v12 = vadd.f32 %v6231_v62, %v6230_v40  ;;  %v6122_v28 = vpop.f32.mrb[41].mxu0 }
 0x172   : > { %v6123_v14 = vadd.f32 %v6122_v28, %v6121_v17  ;;  %v6124_v42 = vpop.f32.mrb[42].mxu0 }
 0x173   : > { %v6125_v33 = vpop.f32.mrb[43].mxu0 }
 0x174   : > { %v8880_v60 = vadd.f32 %v6125_v33, %v6124_v42 }
 0x175   : > { %v6233_v15 = vpop.f32.mrb[40].mxu1 }
 0x176   : > { %v6234_v41 = vpop.f32.mrb[41].mxu1 }
 0x177   : > { %v8882_v57 = vadd.f32 %v6234_v41, %v6233_v15  ;;  %v6236_v11 = vpop.f32.mrb[42].mxu1 }
 0x178   : > { %v6237_v38 = vpop.f32.mrb[43].mxu1  ;;  %v6127_v1 = vpop.f32.mrb[44].mxu0 }
 0x179   : > { %v8884_v52 = vadd.f32 %v6237_v38, %v6236_v11  ;;  %v6128_v39 = vpop.f32.mrb[45].mxu0 }
 0x17a   : > { %v8886_v59 = vadd.f32 %v6128_v39, %v6127_v1  ;;  %v6130_v27 = vpop.f32.mrb[46].mxu0 }
 0x17b   : > { %v6131_v49 = vpop.f32.mrb[47].mxu0 }
 0x17c   : > { %v8888_v19 = vadd.f32 %v6131_v49, %v6130_v27 }
 0x17d   : > { %v6239_v35 = vpop.f32.mrb[44].mxu1 }
 0x17e   : > { %v6240_v46 = vpop.f32.mrb[45].mxu1 }
 0x17f   : > { %v8890_v55 = vadd.f32 %v6240_v46, %v6239_v35  ;;  %v6242_v13 = vpop.f32.mrb[46].mxu1 }
 0x180   : > { %v6243_v50 = vpop.f32.mrb[47].mxu1  ;;  %v6133_v63 = vpop.f32.mrb[48].mxu0 }
 0x181   : > { %v8892_v18 = vadd.f32 %v6243_v50, %v6242_v13  ;;  %v6134_v61 = vpop.f32.mrb[49].mxu0 }
 0x182   : > { %v8894_v51 = vadd.f32 %v6134_v61, %v6133_v63  ;;  %v6136_v7 = vpop.f32.mrb[50].mxu0 }
 0x183   : > { %v6137_v22 = vpop.f32.mrb[51].mxu0 }
 0x184   : > { %v8896_v56 = vadd.f32 %v6137_v22, %v6136_v7 }
 0x185   : > { %v6245_v40 = vpop.f32.mrb[48].mxu1 }
 0x186   : > { %v6246_v62 = vpop.f32.mrb[49].mxu1 }
 0x187   : > { %v6247_v17 = vadd.f32 %v6246_v62, %v6245_v40  ;;  %v6248_v28 = vpop.f32.mrb[50].mxu1 }
 0x188   : > { %v6249_v42 = vpop.f32.mrb[51].mxu1  ;;  %v6139_v33 = vpop.f32.mrb[52].mxu0 }
 0x189   : > { %v8898_v15 = vadd.f32 %v6247_v17, %v6111_v3  ;;  %v6250_v41 = vadd.f32 %v6249_v42, %v6248_v28  ;;  %v6140_v11 = vpop.f32.mrb[53].mxu0 }
 0x18a   : > { %v8900_v38 = vadd.f32 %v6140_v11, %v6139_v33  ;;  %v6142_v1 = vpop.f32.mrb[54].mxu0 }
 0x18b   : > { %v8902_v39 = vadd.f32 %v6250_v41, %v6114_v54  ;;  %v6143_v27 = vpop.f32.mrb[55].mxu0 }
 0x18c   : > { %v8904_v49 = vadd.f32 %v6143_v27, %v6142_v1 }
 0x18d   : > { %v6251_v35 = vpop.f32.mrb[52].mxu1 }
 0x18e   : > { %v6252_v46 = vpop.f32.mrb[53].mxu1 }
 0x18f   : > { %v6253_v13 = vadd.f32 %v6252_v46, %v6251_v35  ;;  %v6254_v50 = vpop.f32.mrb[54].mxu1 }
 0x190   : > { %v6255_v63 = vpop.f32.mrb[55].mxu1  ;;  %v6145_v61 = vpop.f32.mrb[56].mxu0 }
 0x191   : > { %v8906_v7 = vadd.f32 %v6253_v13, %v6117_v53  ;;  %v6256_v3 = vadd.f32 %v6255_v63, %v6254_v50  ;;  %v6146_v22 = vpop.f32.mrb[57].mxu0 }
 0x192   : > { %v8908_v40 = vadd.f32 %v6146_v22, %v6145_v61  ;;  %v6148_v62 = vpop.f32.mrb[58].mxu0 }
 0x193   : > { %v8910_v17 = vadd.f32 %v6256_v3, %v6120_v32  ;;  %v6149_v54 = vpop.f32.mrb[59].mxu0 }
 0x194   : > { %v8912_v28 = vadd.f32 %v6149_v54, %v6148_v62 }
 0x195   : > { %v6257_v42 = vpop.f32.mrb[56].mxu1 }
 0x196   : > { %v6258_v33 = vpop.f32.mrb[57].mxu1 }
 0x197   : > { %v6259_v41 = vadd.f32 %v6258_v33, %v6257_v42  ;;  %v6260_v11 = vpop.f32.mrb[58].mxu1 }
 0x198   : > { %v6261_v1 = vpop.f32.mrb[59].mxu1  ;;  %v6151_v27 = vpop.f32.mrb[60].mxu0 }
 0x199   : > { %v8914_v35 = vadd.f32 %v6259_v41, %v6123_v14  ;;  %v6262_v53 = vadd.f32 %v6261_v1, %v6260_v11  ;;  %v6152_v46 = vpop.f32.mrb[61].mxu0 }
 0x19a   : > { %v8916_v13 = vadd.f32 %v6152_v46, %v6151_v27  ;;  %v6154_v50 = vpop.f32.mrb[62].mxu0 }
 0x19b   : > { %v8919_v63 = vadd.f32 %v6262_v53, %v8880_v60  ;;  %v6155_v32 = vpop.f32.mrb[63].mxu0 }
 0x19c   : > { %v8921_v61 = vadd.f32 %v6155_v32, %v6154_v50 }
 0x19d   : > { %v6263_v3 = vpop.f32.mrb[60].mxu1 }
 0x19e   : > { %v6264_v22 = vpop.f32.mrb[61].mxu1 }
 0x19f   : > { %v6265_v62 = vadd.f32 %v6264_v22, %v6263_v3  ;;  %v6266_v54 = vpop.f32.mrb[62].mxu1 }
 0x1a0   : > { %v6267_v42 = vpop.f32.mrb[63].mxu1  ;;  %v6471_v33 = vpop.f32.mrb[64].mxu0 }
 0x1a1   : > { %v8924_v14 = vadd.f32 %v6265_v62, %v8886_v59  ;;  %v6268_v41 = vadd.f32 %v6267_v42, %v6266_v54  ;;  %v2541_v11 = vadd.f32 %v6471_v33, %v8520_v34  ;;  %v2532_v1 = vpop.f32.mrb[65].mxu0 }
 0x1a2   : > { %v2533_v27 = vadd.f32 %v8436_v0, %v2532_v1  ;;  %v6472_v60 = vpop.f32.mrb[66].mxu0 }
 0x1a3   : > { %v8929_v53 = vadd.f32 %v6268_v41, %v8888_v19  ;;  %v8932_v46 = vadd.f32 %v8816_v30, %v2541_v11  ;;  %v2544_v50 = vadd.f32 %v6472_v60, %v8535_v2  ;;  %v2535_v32 = vpop.f32.mrb[67].mxu0 }
 0x1a4   : > { %v8936_v3 = vadd.f32 %v8768_v44, %v2533_v27  ;;  %v2536_v59 = vadd.f32 %v8447_v8, %v2535_v32 }
 0x1a5   : > { %v6269_v22 = vpop.f32.mrb[64].mxu1  ;;  %v8940_v34 = vadd.f32 %v8822_v25, %v2544_v50 }
 0x1a6   : > { %v6270_v0 = vpop.f32.mrb[65].mxu1  ;;  %v8943_v62 = vadd.f32 %v8781_v20, %v2536_v59 }
 0x1a7   : > { %v6271_v19 = vadd.f32 %v6270_v0, %v6269_v22  ;;  %v6272_v54 = vpop.f32.mrb[66].mxu1 }
 0x1a8   : > { %v6273_v30 = vpop.f32.mrb[67].mxu1  ;;  %v6475_v42 = vpop.f32.mrb[68].mxu0 }
 0x1a9   : > { %v8946_v2 = vadd.f32 %v6271_v19, %v8894_v51  ;;  %v6274_v33 = vadd.f32 %v6273_v30, %v6272_v54  ;;  %v2557_v44 = vadd.f32 %v6475_v42, %v8687_v9  ;;  %v2548_v41 = vpop.f32.mrb[69].mxu0 }
 0x1aa   : > { %v2549_v8 = vadd.f32 %v8608_v48, %v2548_v41  ;;  %v6476_v11 = vpop.f32.mrb[70].mxu0 }
 0x1ab   : > { %9710 = vst [vmem:[#allocation10_spill] sm:$0xff] %v8946_v2  ;;  %v8951_v25 = vadd.f32 %v6274_v33, %v8896_v56  ;;  %v8954_v20 = vadd.f32 %v8864_v45, %v2557_v44  ;;  %v2560_v1 = vadd.f32 %v6476_v11, %v8698_v10  ;;  %v2551_v27 = vpop.f32.mrb[71].mxu0 }
 0x1ac   : > { %v8958_v60 = vadd.f32 %v8834_v43, %v2549_v8  ;;  %v2552_v51 = vadd.f32 %v8619_v26, %v2551_v27 }
 0x1ad   : > { %9711 = vst [vmem:[#allocation13_spill] sm:$0xff] %v8951_v25  ;;  %v6275_v50 = vpop.f32.mrb[68].mxu1  ;;  %v8962_v9 = vadd.f32 %v8868_v16, %v2560_v1  ;;  %v5834_v25 = vld [vmem:[%s9089_s17 + $0x38] sm:$0x1] }
 0x1ae   : > { %v6276_v48 = vpop.f32.mrb[69].mxu1  ;;  %v8965_v32 = vadd.f32 %v8843_v36, %v2552_v51 }
 0x1af   : > { %v6277_v56 = vadd.f32 %v6276_v48, %v6275_v50  ;;  %v6278_v59 = vpop.f32.mrb[70].mxu1 }
 0x1b0   : > { %v6279_v45 = vpop.f32.mrb[71].mxu1  ;;  %v6479_v22 = vpop.f32.mrb[72].mxu0 }
 0x1b1   : > { %v8968_v10 = vadd.f32 %v6277_v56, %v8900_v38  ;;  %v6280_v0 = vadd.f32 %v6279_v45, %v6278_v59  ;;  %v2573_v43 = vadd.f32 %v6479_v22, %v8804_v37  ;;  %v2564_v19 = vpop.f32.mrb[73].mxu0 }
 0x1b2   : > { %v2565_v26 = vadd.f32 %v8766_v31, %v2564_v19  ;;  %v6480_v54 = vpop.f32.mrb[74].mxu0 }
 0x1b3   : > { %v8973_v16 = vadd.f32 %v6280_v0, %v8904_v49  ;;  %v8976_v36 = vadd.f32 %v8876_v5, %v2573_v43  ;;  %v2576_v30 = vadd.f32 %v6480_v54, %v8811_v24  ;;  %v2567_v42 = vpop.f32.mrb[75].mxu0 }
 0x1b4   : > { %v8980_v33 = vadd.f32 %v8871_v21, %v2565_v26  ;;  %v2568_v38 = vadd.f32 %v8779_v6, %v2567_v42 }
 0x1b5   : > { %9712 = vst [vmem:[#allocation14_spill] sm:$0xff] %v8973_v16  ;;  %v6281_v44 = vpop.f32.mrb[72].mxu1  ;;  %v8984_v37 = vadd.f32 %v8878_v12, %v2576_v30 }
 0x1b6   : > { %v6282_v31 = vpop.f32.mrb[73].mxu1  ;;  %v8987_v41 = vadd.f32 %v8873_v23, %v2568_v38 }
 0x1b7   : > { %v6283_v49 = vadd.f32 %v6282_v31, %v6281_v44  ;;  %v6284_v8 = vpop.f32.mrb[74].mxu1 }
 0x1b8   : > { %v6285_v5 = vpop.f32.mrb[75].mxu1  ;;  %v6483_v11 = vpop.f32.mrb[76].mxu0 }
 0x1b9   : > { %v8990_v24 = vadd.f32 %v6283_v49, %v8908_v40  ;;  %v6286_v1 = vadd.f32 %v6285_v5, %v6284_v8  ;;  %v2589_v21 = vadd.f32 %v6483_v11, %v8853_v47  ;;  %v2580_v27 = vpop.f32.mrb[77].mxu0 }
 0x1ba   : > { %v2581_v6 = vadd.f32 %v8832_v58, %v2580_v27  ;;  %v6484_v51 = vpop.f32.mrb[78].mxu0 }
 0x1bb   : > { %9713 = vst [vmem:[#allocation3_spill] sm:$0xff] %v8990_v24  ;;  %v8995_v12 = vadd.f32 %v6286_v1, %v8912_v28  ;;  %v8998_v23 = vadd.f32 %v8890_v55, %v2589_v21  ;;  %v2592_v50 = vadd.f32 %v6484_v51, %v8857_v4  ;;  %v2583_v48 = vpop.f32.mrb[79].mxu0 }
 0x1bc   : > { %v9002_v56 = vadd.f32 %v8882_v57, %v2581_v6  ;;  %v2584_v40 = vadd.f32 %v8839_v29, %v2583_v48 }
 0x1bd   : > { %9714 = vst [vmem:[#allocation4_spill] sm:$0xff] %v8995_v12  ;;  %v6287_v59 = vpop.f32.mrb[76].mxu1  ;;  %v9006_v47 = vadd.f32 %v8892_v18, %v2592_v50 }
 0x1be   : > { %v6288_v58 = vpop.f32.mrb[77].mxu1  ;;  %v2889_v45 = vadd.f32 %v8884_v52, %v2584_v40 }
 0x1bf   : > { %v6289_v28 = vadd.f32 %v6288_v58, %v6287_v59  ;;  %v6290_v22 = vpop.f32.mrb[78].mxu1 }
 0x1c0   : > { %v6291_v0 = vpop.f32.mrb[79].mxu1  ;;  %v6333_v55 = vpop.f32.mrb[80].mxu0 }
 0x1c1   : > { %v9010_v43 = vadd.f32 %v6289_v28, %v8916_v13  ;;  %v6292_v4 = vadd.f32 %v6291_v0, %v6290_v22  ;;  %v6334_v19 = vpop.f32.mrb[81].mxu0 }
 0x1c2   : > { %v6335_v57 = vadd.f32 %v6334_v19, %v6333_v55  ;;  %v6336_v26 = vpop.f32.mrb[82].mxu0 }
 0x1c3   : > { %9715 = vst [vmem:[#allocation5_spill] sm:$0xff] %v9010_v43  ;;  %v9013_v29 = vadd.f32 %v6292_v4, %v8921_v61  ;;  %v6337_v54 = vpop.f32.mrb[83].mxu0 }
 0x1c4   : > { %v6338_v18 = vadd.f32 %v6337_v54, %v6336_v26  ;;  %v9016_v30 = vadd.f32 %v6335_v57, %v8936_v3 }
 0x1c5   : > { %9716 = vst [vmem:[#allocation6_spill] sm:$0xff] %v9013_v29 }
 0x1c6   : > { %v9019_v52 = vadd.f32 %v6338_v18, %v8943_v62 }
 0x1c8   : > { %v6339_v42 = vpop.f32.mrb[84].mxu0 }
 0x1c9   : > { %v6340_v38 = vpop.f32.mrb[85].mxu0 }
 0x1ca   : > { %v6341_v44 = vadd.f32 %v6340_v38, %v6339_v42  ;;  %v6342_v13 = vpop.f32.mrb[86].mxu0 }
 0x1cb   : > { %v6343_v31 = vpop.f32.mrb[87].mxu0 }
 0x1cc   : > { %v6344_v49 = vadd.f32 %v6343_v31, %v6342_v13  ;;  %v6615_v8 = vadd.f32 %v6341_v44, %v8932_v46 }
 0x1ce   : > { %v9023_v5 = vadd.f32 %v6344_v49, %v8940_v34 }
 0x1d0   : > { %v6345_v61 = vpop.f32.mrb[88].mxu0 }
 0x1d1   : > { %v6346_v11 = vpop.f32.mrb[89].mxu0 }
 0x1d2   : > { %v6347_v1 = vadd.f32 %v6346_v11, %v6345_v61  ;;  %v6348_v21 = vpop.f32.mrb[90].mxu0 }
 0x1d3   : > { %v6349_v3 = vpop.f32.mrb[91].mxu0 }
 0x1d4   : > { %v6350_v27 = vadd.f32 %v6349_v3, %v6348_v21  ;;  %v9026_v62 = vadd.f32 %v6347_v1, %v8958_v60 }
 0x1d6   : > { %v9029_v6 = vadd.f32 %v6350_v27, %v8965_v32 }
 0x1d8   : > { %v6351_v51 = vpop.f32.mrb[92].mxu0 }
 0x1d9   : > { %v6352_v50 = vpop.f32.mrb[93].mxu0 }
 0x1da   : > { %v6353_v48 = vadd.f32 %v6352_v50, %v6351_v51  ;;  %v6354_v40 = vpop.f32.mrb[94].mxu0 }
 0x1db   : > { %v6355_v46 = vpop.f32.mrb[95].mxu0 }
 0x1dc   : > { %v6356_v59 = vadd.f32 %v6355_v46, %v6354_v40  ;;  %v9032_v34 = vadd.f32 %v6353_v48, %v8954_v20 }
 0x1de   : > { %v9035_v58 = vadd.f32 %v6356_v59, %v8962_v9 }
 0x1e0   : > { %v6357_v28 = vpop.f32.mrb[96].mxu0 }
 0x1e1   : > { %v6358_v22 = vpop.f32.mrb[97].mxu0 }
 0x1e2   : > { %v6359_v0 = vadd.f32 %v6358_v22, %v6357_v28  ;;  %v6360_v60 = vpop.f32.mrb[98].mxu0 }
 0x1e3   : > { %v6361_v55 = vpop.f32.mrb[99].mxu0 }
 0x1e4   : > { %v6362_v4 = vadd.f32 %v6361_v55, %v6360_v60  ;;  %v9038_v32 = vadd.f32 %v6359_v0, %v8980_v33  ;;  %v9066_v0 = vld [vmem:[%s9577_s2] ss:$0 sm:$0xff] }
 0x1e6   : > { %v9041_v19 = vadd.f32 %v6362_v4, %v8987_v41 }
 0x1e8   : > { %v6363_v57 = vpop.f32.mrb[100].mxu0 }
 0x1e9   : > { %v6364_v26 = vpop.f32.mrb[101].mxu0 }
 0x1ea   : > { %v6365_v54 = vadd.f32 %v6364_v26, %v6363_v57  ;;  %v6366_v20 = vpop.f32.mrb[102].mxu0 }
 0x1eb   : > { %v6367_v18 = vpop.f32.mrb[103].mxu0 }
 0x1ec   : > { %v6368_v42 = vadd.f32 %v6367_v18, %v6366_v20  ;;  %v9044_v9 = vadd.f32 %v6365_v54, %v8976_v36 }
 0x1ee   : > { %v9047_v38 = vadd.f32 %v6368_v42, %v8984_v37 }
 0x1f1   : > { %v6369_v44 = vpop.f32.mrb[104].mxu0 }
 0x1f2   : > { %v6370_v13 = vpop.f32.mrb[105].mxu0 }
 0x1f3   : > { %v6371_v31 = vadd.f32 %v6370_v13, %v6369_v44  ;;  %v6372_v33 = vpop.f32.mrb[106].mxu0 }
 0x1f4   : > { %v6373_v49 = vpop.f32.mrb[107].mxu0 }
 0x1f5   : > { %v6374_v61 = vadd.f32 %v6373_v49, %v6372_v33  ;;  %v9050_v41 = vadd.f32 %v6371_v31, %v9002_v56 }
 0x1f7   : > { %v9052_v11 = vadd.f32 %v6374_v61, %v2889_v45 }
 0x1f9   : > { %v6375_v1 = vpop.f32.mrb[108].mxu0 }
 0x1fa   : > { %v6376_v21 = vpop.f32.mrb[109].mxu0 }
 0x1fb   : > { %v6377_v3 = vadd.f32 %v6376_v21, %v6375_v1  ;;  %v6378_v27 = vpop.f32.mrb[110].mxu0 }
 0x1fc   : > { %v6379_v36 = vpop.f32.mrb[111].mxu0 }
 0x1fd   : > { %v6380_v51 = vadd.f32 %v6379_v36, %v6378_v27  ;;  %v9055_v37 = vadd.f32 %v6377_v3, %v8998_v23 }
 0x1ff   : > { %v9058_v50 = vadd.f32 %v6380_v51, %v9006_v47 }
 0x201   : > { %v6381_v48 = vpop.f32.mrb[112].mxu0 }
 0x202   : > { %v6382_v40 = vpop.f32.mrb[113].mxu0 }
 0x203   : > { %v6383_v46 = vadd.f32 %v6382_v40, %v6381_v48  ;;  %v6384_v59 = vpop.f32.mrb[114].mxu0 }
 0x204   : > { %v6385_v56 = vpop.f32.mrb[115].mxu0 }
 0x205   : > { %v6386_v28 = vadd.f32 %v6385_v56, %v6384_v59  ;;  %v9061_v45 = vadd.f32 %v8898_v15, %v6383_v46  ;;  %v6567_v22 = vpop.f32.mrb[80].mxu1 }
 0x206   : > { %v6616_v23 = vadd.f32 %v6615_v8, %v6567_v22  ;;  %v4381_v60 = vpop.f32.mrb[81].mxu1 }
 0x207   : > { %v9069_v47 = vadd.f32 %v8902_v39, %v6386_v28  ;;  %v6620_v55 = vadd.f32 %v9016_v30, %v4381_v60  ;;  %v6568_v4 = vpop.f32.mrb[82].mxu1 }
 0x208   : > { %v4549_v57 = vadd.f32 %v6616_v23, %v9066_v0  ;;  %v6624_v15 = vadd.f32 %v9023_v5, %v6568_v4  ;;  %v4384_v26 = vpop.f32.mrb[83].mxu1  ;;  %v5821_v23 = vld [vmem:[%s9089_s17 + $0x18] sm:$0xf] }
 0x209   : > { %v6387_v54 = vpop.f32.mrb[116].mxu0  ;;  %v4547_v20 = vadd.f32 %v6620_v55, %v9066_v0  ;;  %v6628_v8 = vadd.f32 %v9019_v52, %v4384_v26 }
 0x20a   : > { %v6388_v39 = vpop.f32.mrb[117].mxu0  ;;  %v5900_v18 = vpack.c.bf16 %v4549_v57, %v4549_v57  ;;  %v4550_v30 = vadd.f32 %v6624_v15, %v9066_v0  ;;  %v5157_v13 = vmul.f32 %v4549_v57, %v4549_v57 }
 0x20b   : > { %v9077_v42 = vadd.f32 %v6388_v39, %v6387_v54  ;;  %v9079_v44 = vpop.f32.mrb[118].mxu0  ;;  %v5898_v5 = vpack.c.bf16 %v4547_v20, %v4547_v20  ;;  %v5155_v31 = vmul.f32 %v4547_v20, %v4547_v20  ;;  %v4548_v33 = vadd.f32 %v6628_v8, %v9066_v0  ;;  %v5816_v8 = vld [vmem:[%s9089_s17 + $0xc] sm:$0xf] }
 0x20c   : > { %v9082_v49 = vpop.f32.mrb[119].mxu0  ;;  %v4696_v52 = vshrl.u32 %v5900_v18, 16  ;;  %v4699_v61 = vshll.u32 %v5900_v18, 16  ;;  %v5901_v1 = vpack.c.bf16 %v4550_v30, %v4550_v30  ;;  %v5158_v21 = vmul.f32 %v4550_v30, %v4550_v30 }
 0x20d   : > { %v4679_v3 = vshrl.u32 %v5898_v5, 16  ;;  %v4682_v27 = vshll.u32 %v5898_v5, 16  ;;  %v5899_v36 = vpack.c.bf16 %v4548_v33, %v4548_v33  ;;  %v5117_v51 = vadd.f32 %v4548_v33, %v4547_v20  ;;  %v6571_v48 = vpop.f32.mrb[84].mxu1 }
 0x20e   : > { %v4698_v40 = vrot.slane %v4696_v52, 7  ;;  %v4704_v46 = vshrl.u32 %v5901_v1, 16  ;;  %v4707_v59 = vshll.u32 %v5901_v1, 16  ;;  %v5156_v56 = vmul.f32 %v4548_v33, %v4548_v33  ;;  %v4397_v28 = vpop.f32.mrb[85].mxu1 }
 0x20f   : > { %v4681_v60 = vrot.slane %v4679_v3, 7  ;;  %v4687_v55 = vshrl.u32 %v5899_v36, 16  ;;  %v4690_v4 = vshll.u32 %v5899_v36, 16  ;;  %v5118_v15 = vadd.f32 %v5117_v51, %v4549_v57  ;;  %v6572_v26 = vpop.f32.mrb[86].mxu1 }
 0x210   : > { %v4701_v54 = vor.u32 %v4699_v61, %v4698_v40  ;;  %v4702_v20 = vrot.slane %v4698_v40, 4  ;;  %v4706_v39 = vrot.slane %v4704_v46, 7  ;;  %v5187_v5 = vadd.f32 %v5156_v56, %v5155_v31  ;;  %v4400_v33 = vpop.f32.mrb[87].mxu1  ;;  %v5824_v61 = vld [vmem:[%s9089_s17 + $0x20] sm:$0x1] }
 0x211   : > { %v6393_v52 = vpop.f32.mrb[120].mxu0  ;;  %v4684_v1 = vor.u32 %v4682_v27, %v4681_v60  ;;  %v4685_v3 = vrot.slane %v4681_v60, 4  ;;  %v4689_v36 = vrot.slane %v4687_v55, 7  ;;  %v6632_v51 = vadd.f32 %v9032_v34, %v6571_v48  ;;  %v5819_v27 = vld [vmem:[%s9089_s17 + $0x14] sm:$0x1] }
 0x212   : > { %v6394_v40 = vpop.f32.mrb[121].mxu0  ;;  %v5013_v31 = vsel %vm9093_vm11, %v4701_v54, %v5821_v23  ;;  %v4709_v46 = vor.u32 %v4707_v59, %v4706_v39  ;;  %v4711_v56 = vrot.slane %v4706_v39, 4  ;;  %v5188_v60 = vadd.f32 %v5187_v5, %v5157_v13 }
 0x213   : > { %v9116_v29 = vpop.f32.mrb[122].mxu0  ;;  %5822 = vst [vmem:[%s9089_s17 + $0x18] sm:$0xf] %v5013_v31  ;;  %v5004_v43 = vsel %vm9093_vm11, %v4684_v1, %v5816_v8  ;;  %v4692_v55 = vor.u32 %v4690_v4, %v4689_v36  ;;  %v4694_v34 = vrot.slane %v4689_v36, 4  ;;  %v4553_v48 = vadd.f32 %v6632_v51, %v9066_v0 }
 0x214   : > { %v9122_v12 = vpop.f32.mrb[123].mxu0  ;;  %5817 = vst [vmem:[%s9089_s17 + $0xc] sm:$0xf] %v5004_v43  ;;  %v4710_v59 = vsel %vm9107_vm13, %v4702_v20, %v4709_v46  ;;  %v5017_v13 = vsel %vm9101_vm12, %v4711_v56, %v5824_v61  ;;  %v6636_v23 = vadd.f32 %v9026_v62, %v4397_v28  ;;  %v5119_v54 = vadd.f32 %v5118_v15, %v4550_v30 }
 0x215   : > { %5823 = vst [vmem:[%s9089_s17 + $0x1c] sm:$0xf] %v4710_v59  ;;  %5825 = vst [vmem:[%s9089_s17 + $0x20] sm:$0x1] %v5017_v13  ;;  %v4693_v4 = vsel %vm9107_vm13, %v4685_v3, %v4692_v55  ;;  %v5010_v8 = vsel %vm9101_vm12, %v4694_v34, %v5819_v27  ;;  %v5904_v39 = vpack.c.bf16 %v4553_v48, %v4553_v48  ;;  %v6575_v5 = vpop.f32.mrb[88].mxu1 }
 0x216   : > { %5818 = vst [vmem:[%s9089_s17 + $0x10] sm:$0xf] %v4693_v4  ;;  %5820 = vst [vmem:[%s9089_s17 + $0x14] sm:$0x1] %v5010_v8  ;;  %v4551_v43 = vadd.f32 %v6636_v23, %v9066_v0  ;;  %v5189_v20 = vadd.f32 %v5188_v60, %v5158_v21  ;;  %v6640_v1 = vadd.f32 %v9035_v58, %v6572_v26  ;;  %v4413_v30 = vpop.f32.mrb[89].mxu1 }
 0x217   : > { %v9142_v62 = vadd.f32 %v9082_v49, %v9079_v44  ;;  %v4730_v28 = vshrl.u32 %v5904_v39, 16  ;;  %v5161_v15 = vmul.f32 %v4553_v48, %v4553_v48  ;;  %v6644_v3 = vadd.f32 %v9029_v6, %v4400_v33  ;;  %v9146_v36 = vpop.f32.mrb[90].mxu1 }
 0x218   : > { %v6648_v61 = vadd.f32 %v9044_v9, %v6575_v5  ;;  %v5902_v51 = vpack.c.bf16 %v4551_v43, %v4551_v43  ;;  %v5120_v31 = vadd.f32 %v5119_v54, %v4551_v43  ;;  %v5159_v46 = vmul.f32 %v4551_v43, %v4551_v43  ;;  %v9151_v58 = vpop.f32.mrb[91].mxu1  ;;  %v5831_v9 = vld [vmem:[%s9089_s17 + $0x30] sm:$0xf] }
 0x219   : > { %v9149_v21 = vadd.f32 %v6640_v1, %v9066_v0  ;;  %v9153_v44 = vpop.f32.mrb[124].mxu0  ;;  %v4732_v49 = vrot.slane %v4730_v28, 7  ;;  %v4733_v26 = vshll.u32 %v5904_v39, 16  ;;  %v4552_v56 = vadd.f32 %v6644_v3, %v9066_v0 }
 0x21a   : > { %v9156_v27 = vadd.f32 %v6394_v40, %v6393_v52  ;;  %v9158_v6 = vpop.f32.mrb[125].mxu0  ;;  %v4713_v33 = vshrl.u32 %v5902_v51, 16  ;;  %v5190_v60 = vadd.f32 %v5189_v20, %v5159_v46  ;;  %v9164_v34 = vadd.f32 %v6648_v61, %v9066_v0  ;;  %v5826_v20 = vld [vmem:[%s9089_s17 + $0x24] sm:$0xf] }
 0x21b   : > { %v5905_v55 = vpack.c.bf16 %v9149_v21, %v9149_v21  ;;  %v9166_v59 = vpop.f32.mrb[126].mxu0  ;;  %v4735_v13 = vor.u32 %v4733_v26, %v4732_v49  ;;  %v4736_v23 = vrot.slane %v4732_v49, 4  ;;  %v4716_v54 = vshll.u32 %v5902_v51, 16 }
 0x21c   : > { %v5903_v52 = vpack.c.bf16 %v4552_v56, %v4552_v56  ;;  %v9168_v40 = vpop.f32.mrb[127].mxu0  ;;  %v4715_v4 = vrot.slane %v4713_v33, 7  ;;  %v5162_v39 = vmul.f32 %v9149_v21, %v9149_v21  ;;  %v5121_v5 = vadd.f32 %v5120_v31, %v4552_v56 }
 0x21d   : > { %v4738_v8 = vshrl.u32 %v5905_v55, 16  ;;  %v5027_v43 = vsel %vm9093_vm11, %v4735_v13, %v5831_v9  ;;  %v4741_v1 = vshll.u32 %v5905_v55, 16  ;;  %v5160_v3 = vmul.f32 %v4552_v56, %v4552_v56  ;;  %v6579_v61 = vpop.f32.mrb[92].mxu1 }
 0x21e   : > { %v4721_v28 = vshrl.u32 %v5903_v52, 16  ;;  %5832 = vst [vmem:[%s9089_s17 + $0x30] sm:$0xf] %v5027_v43  ;;  %v4718_v51 = vor.u32 %v4716_v54, %v4715_v4  ;;  %v4724_v49 = vshll.u32 %v5903_v52, 16  ;;  %v5122_v26 = vadd.f32 %v5121_v5, %v4553_v48  ;;  %v4429_v33 = vpop.f32.mrb[93].mxu1 }
 0x21f   : > { %v4740_v46 = vrot.slane %v4738_v8, 7  ;;  %v4719_v24 = vrot.slane %v4715_v4, 4  ;;  %v5191_v31 = vadd.f32 %v5190_v60, %v5160_v3  ;;  %v5908_v9 = vpack.c.bf16 %v9164_v34, %v9164_v34  ;;  %v6580_v13 = vpop.f32.mrb[94].mxu1  ;;  %v5829_v54 = vld [vmem:[%s9089_s17 + $0x2c] sm:$0x1] }
 0x220   : > { %v4723_v16 = vrot.slane %v4721_v28, 7  ;;  %v5020_v56 = vsel %vm9093_vm11, %v4718_v51, %v5826_v20  ;;  %v6652_v52 = vadd.f32 %v9038_v32, %v4413_v30  ;;  %v9183_v48 = vpop.f32.mrb[95].mxu1 }
 0x221   : > { %v4743_v55 = vor.u32 %v4741_v1, %v4740_v46  ;;  %v4745_v2 = vrot.slane %v4740_v46, 4  ;;  %v9185_v4 = vpop.f32.mrb[128].mxu0  ;;  %5827 = vst [vmem:[%s9089_s17 + $0x24] sm:$0xf] %v5020_v56  ;;  %v5192_v5 = vadd.f32 %v5191_v31, %v5161_v15  ;;  %v4764_v43 = vshrl.u32 %v5908_v9, 16 }
 0x222   : > { %v4726_v60 = vor.u32 %v4724_v49, %v4723_v16  ;;  %v4728_v8 = vrot.slane %v4723_v16, 4  ;;  %v9188_v20 = vpop.f32.mrb[129].mxu0  ;;  %v4767_v30 = vshll.u32 %v5908_v9, 16  ;;  %v4555_v28 = vadd.f32 %v6652_v52, %v9066_v0 }
 0x223   : > { %v4744_v1 = vsel %vm9107_vm13, %v4736_v23, %v4743_v55  ;;  %v5031_v32 = vsel %vm9101_vm12, %v4745_v2, %v5834_v25  ;;  %v9195_v3 = vpop.f32.mrb[130].mxu0  ;;  %v9203_v51 = vrot.slane %v4764_v43, 7  ;;  %v5123_v23 = vadd.f32 %v5122_v26, %v9149_v21  ;;  %v5841_v2 = vld [vmem:[%s9089_s17 + $0x48] sm:$0xf] }
 0x224   : > { %5833 = vst [vmem:[%s9089_s17 + $0x34] sm:$0xf] %v4744_v1  ;;  %5835 = vst [vmem:[%s9089_s17 + $0x38] sm:$0x1] %v5031_v32  ;;  %v4727_v16 = vsel %vm9107_vm13, %v4719_v24, %v4726_v60  ;;  %v5024_v15 = vsel %vm9101_vm12, %v4728_v8, %v5829_v54  ;;  %v9206_v46 = vpop.f32.mrb[131].mxu0  ;;  %v5906_v25 = vpack.c.bf16 %v4555_v28, %v4555_v28 }
 0x225   : > { %5828 = vst [vmem:[%s9089_s17 + $0x28] sm:$0xf] %v4727_v16  ;;  %5830 = vst [vmem:[%s9089_s17 + $0x2c] sm:$0x1] %v5024_v15  ;;  %v5163_v49 = vmul.f32 %v4555_v28, %v4555_v28  ;;  %v5193_v31 = vadd.f32 %v5192_v5, %v5162_v39  ;;  %v6656_v9 = vadd.f32 %v9047_v38, %v9146_v36  ;;  %v9220_v26 = vpop.f32.mrb[0].mxu1  ;;  %v4770_v54 = vrot.slane %v9203_v51, 4 }
 0x226   : > { %v4769_v24 = vor.u32 %v4767_v30, %v9203_v51  ;;  %v5165_v56 = vmul.f32 %v9164_v34, %v9164_v34  ;;  %v5124_v55 = vadd.f32 %v5123_v23, %v4555_v28  ;;  %v9218_v21 = vadd.f32 %v9122_v12, %v9116_v29  ;;  %v9224_v36 = vpop.f32.mrb[1].mxu1 }
 0x227   : > { %v4747_v52 = vshrl.u32 %v5906_v25, 16  ;;  %v5194_v39 = vadd.f32 %v5193_v31, %v5163_v49  ;;  %v4558_v38 = vadd.f32 %v6656_v9, %v9066_v0  ;;  %v6660_v8 = vadd.f32 %v9041_v19, %v9151_v58  ;;  %v9235_v5 = vpop.f32.mrb[2].mxu1  ;;  %v5836_v19 = vld [vmem:[%s9089_s17 + $0x3c] sm:$0xf] }
 0x228   : > { %v5041_v60 = vsel %vm9093_vm11, %v4769_v24, %v5841_v2  ;;  %v6664_v12 = vadd.f32 %v9055_v37, %v6579_v61  ;;  %v9233_v29 = vadd.f32 %v9158_v6, %v9153_v44  ;;  %v4750_v1 = vshll.u32 %v5906_v25, 16  ;;  %v9241_v28 = vpop.f32.mrb[3].mxu1  ;;  %v5844_v24 = vld [vmem:[%s9089_s17 + $0x50] sm:$0x1] }
 0x229   : > { %5842 = vst [vmem:[%s9089_s17 + $0x48] sm:$0xf] %v5041_v60  ;;  %v9238_v43 = vrot.slane %v4747_v52, 7  ;;  %v5909_v32 = vpack.c.bf16 %v4558_v38, %v4558_v38  ;;  %v6668_v30 = vadd.f32 %v9050_v41, %v4429_v33  ;;  %v9243_v16 = vpop.f32.mrb[132].mxu0  ;;  %v4556_v37 = vadd.f32 %v6660_v8, %v9066_v0 }
 0x22a   : > { %v9248_v58 = vadd.f32 %v6664_v12, %v9066_v0  ;;  %v6672_v44 = vadd.f32 %v9058_v50, %v6580_v13  ;;  %v9253_v6 = vadd.f32 %v9168_v40, %v9166_v59  ;;  %v9255_v61 = vpop.f32.mrb[133].mxu0  ;;  %v5166_v51 = vmul.f32 %v4558_v38, %v4558_v38 }
 0x22b   : > { %v4752_v41 = vor.u32 %v4750_v1, %v9238_v43  ;;  %v4753_v33 = vrot.slane %v9238_v43, 4  ;;  %v4772_v15 = vshrl.u32 %v5909_v32, 16  ;;  %v9259_v23 = vpop.f32.mrb[134].mxu0  ;;  %v5907_v2 = vpack.c.bf16 %v4556_v37, %v4556_v37 }
 0x22c   : > { %v5125_v25 = vadd.f32 %v5124_v55, %v4556_v37  ;;  %v5164_v49 = vmul.f32 %v4556_v37, %v4556_v37  ;;  %v5912_v50 = vpack.c.bf16 %v9248_v58, %v9248_v58  ;;  %v9263_v59 = vpop.f32.mrb[135].mxu0  ;;  %v4775_v31 = vshll.u32 %v5909_v32, 16 }
 0x22d   : > { %v5034_v40 = vsel %vm9093_vm11, %v4752_v41, %v5836_v19  ;;  %v4774_v13 = vrot.slane %v4772_v15, 7  ;;  %v4559_v9 = vadd.f32 %v6668_v30, %v9066_v0  ;;  %v4755_v52 = vshrl.u32 %v5907_v2, 16  ;;  %v9271_v12 = vpop.f32.mrb[4].mxu1 }
 0x22e   : > { %5837 = vst [vmem:[%s9089_s17 + $0x3c] sm:$0xf] %v5034_v40  ;;  %v4758_v60 = vshll.u32 %v5907_v2, 16  ;;  %v5126_v55 = vadd.f32 %v5125_v25, %v9164_v34  ;;  %v5195_v8 = vadd.f32 %v5194_v39, %v5164_v49  ;;  %v4798_v37 = vshrl.u32 %v5912_v50, 16  ;;  %v9273_v41 = vpop.f32.mrb[5].mxu1 }
 0x22f   : > { %v4777_v43 = vor.u32 %v4775_v31, %v4774_v13  ;;  %v4779_v1 = vrot.slane %v4774_v13, 4  ;;  %v4801_v19 = vshll.u32 %v5912_v50, 16  ;;  %v4757_v32 = vrot.slane %v4755_v52, 7  ;;  %v9275_v2 = vpop.f32.mrb[6].mxu1  ;;  %v5839_v25 = vld [vmem:[%s9089_s17 + $0x44] sm:$0x1] }
 0x230   : > { %v5196_v30 = vadd.f32 %v5195_v8, %v5165_v56  ;;  %v5910_v15 = vpack.c.bf16 %v4559_v9, %v4559_v9  ;;  %v5127_v40 = vadd.f32 %v5126_v55, %v4558_v38  ;;  %v9282_v49 = vrot.slane %v4798_v37, 7  ;;  %v9284_v50 = vpop.f32.mrb[7].mxu1  ;;  %v5851_v52 = vld [vmem:[%s9089_s17 + $0x60] sm:$0xf] }
 0x231   : > { %v4778_v34 = vsel %vm9107_vm13, %v4770_v54, %v4777_v43  ;;  %v5045_v39 = vsel %vm9101_vm12, %v4779_v1, %v5844_v24  ;;  %v5167_v13 = vmul.f32 %v4559_v9, %v4559_v9  ;;  %9723 = vst [vmem:[#allocation7_spill] sm:$0xff] %v9284_v50  ;;  %v9286_v31 = vpop.f32.mrb[136].mxu0  ;;  %v4760_v56 = vor.u32 %v4758_v60, %v4757_v32 }
 0x232   : > { %9724 = vst [vmem:[#allocation8_spill] sm:$0xff] %v9286_v31  ;;  %5843 = vst [vmem:[%s9089_s17 + $0x4c] sm:$0xf] %v4778_v34  ;;  %v4762_v38 = vrot.slane %v4757_v32, 4  ;;  %v5169_v54 = vmul.f32 %v9248_v58, %v9248_v58  ;;  %v4781_v24 = vshrl.u32 %v5910_v15, 16  ;;  %v9293_v55 = vpop.f32.mrb[137].mxu0  ;;  %v4803_v8 = vor.u32 %v4801_v19, %v9282_v49 }
 0x233   : > { %5845 = vst [vmem:[%s9089_s17 + $0x50] sm:$0x1] %v5045_v39  ;;  %v4784_v43 = vshll.u32 %v5910_v15, 16  ;;  %v5128_v1 = vadd.f32 %v5127_v40, %v4559_v9  ;;  %v5197_v37 = vadd.f32 %v5196_v30, %v5166_v51  ;;  %v9296_v34 = vpop.f32.mrb[138].mxu0  ;;  %v4761_v60 = vsel %vm9107_vm13, %v4753_v33, %v4760_v56  ;;  %v5846_v51 = vld [vmem:[%s9089_s17 + $0x54] sm:$0xf] }
 0x234   : > { %v5038_v32 = vsel %vm9101_vm12, %v4762_v38, %v5839_v25  ;;  %v9302_v39 = vrot.slane %v4781_v24, 7  ;;  %v4562_v50 = vadd.f32 %v6672_v44, %v9066_v0  ;;  %v9305_v31 = vpop.f32.mrb[139].mxu0  ;;  %5838 = vst [vmem:[%s9089_s17 + $0x40] sm:$0xf] %v4761_v60  ;;  %v5055_v9 = vsel %vm9093_vm11, %v4803_v8, %v5851_v52 }
 0x235   : > { %5840 = vst [vmem:[%s9089_s17 + $0x44] sm:$0x1] %v5038_v32  ;;  %v5198_v19 = vadd.f32 %v5197_v37, %v5167_v13  ;;  %v6676_v30 = vadd.f32 %v9052_v11, %v9183_v48  ;;  %v6678_v33 = vadd.f32 %v8906_v7, %v9077_v42  ;;  %v4804_v15 = vrot.slane %v9282_v49, 4  ;;  %5852 = vst [vmem:[%s9089_s17 + $0x60] sm:$0xf] %v5055_v9  ;;  %v9320_v56 = vpop.f32.mrb[8].mxu1 }
 0x236   : > { %v4786_v44 = vor.u32 %v4784_v43, %v9302_v39  ;;  %v4787_v40 = vrot.slane %v9302_v39, 4  ;;  %v5913_v25 = vpack.c.bf16 %v4562_v50, %v4562_v50  ;;  %v9326_v11 = vadd.f32 %v9188_v20, %v9185_v4  ;;  %v9330_v42 = vpop.f32.mrb[9].mxu1 }
 0x237   : > { %v4560_v38 = vadd.f32 %v6676_v30, %v9066_v0  ;;  %v6679_v13 = vadd.f32 %v6678_v33, %v9220_v26  ;;  %v6682_v7 = vadd.f32 %v9061_v45, %v9224_v36  ;;  %v6684_v24 = vadd.f32 %v8910_v17, %v9142_v62  ;;  %v9336_v8 = vpop.f32.mrb[10].mxu1 }
 0x238   : > { %v5048_v48 = vsel %vm9093_vm11, %v4786_v44, %v5846_v51  ;;  %v4806_v49 = vshrl.u32 %v5913_v25, 16  ;;  %v4809_v52 = vshll.u32 %v5913_v25, 16  ;;  %v9342_v45 = vpop.f32.mrb[11].mxu1  ;;  %v9350_v17 = vadd.f32 %v9206_v46, %v9195_v3 }
 0x239   : > { %5847 = vst [vmem:[%s9089_s17 + $0x54] sm:$0xf] %v5048_v48  ;;  %v5911_v26 = vpack.c.bf16 %v4560_v38, %v4560_v38  ;;  %v5129_v4 = vadd.f32 %v5128_v1, %v4560_v38  ;;  %v5168_v20 = vmul.f32 %v4560_v38, %v4560_v38  ;;  %v9340_v43 = vadd.f32 %v6679_v13, %v9066_v0  ;;  %v9344_v36 = vpop.f32.mrb[140].mxu0  ;;  %v5854_v1 = vld [vmem:[%s9089_s17 + $0x68] sm:$0x1] }
 0x23a   : > { %v4808_v37 = vrot.slane %v4806_v49, 7  ;;  %v4563_v60 = vadd.f32 %v6682_v7, %v9066_v0  ;;  %v6685_v32 = vadd.f32 %v6684_v24, %v9235_v5  ;;  %v9352_v62 = vpop.f32.mrb[141].mxu0  ;;  %v5170_v39 = vmul.f32 %v4562_v50, %v4562_v50  ;;  %v5849_v49 = vld [vmem:[%s9089_s17 + $0x5c] sm:$0x1] }
 0x23b   : > { %v4789_v9 = vshrl.u32 %v5911_v26, 16  ;;  %v5130_v51 = vadd.f32 %v5129_v4, %v9248_v58  ;;  %v5199_v30 = vadd.f32 %v5198_v19, %v5168_v20  ;;  %v9356_v33 = vpop.f32.mrb[142].mxu0  ;;  %v4792_v5 = vshll.u32 %v5911_v26, 16 }
 0x23c   : > { %v4811_v44 = vor.u32 %v4809_v52, %v4808_v37  ;;  %v4813_v25 = vrot.slane %v4808_v37, 4  ;;  %v5916_v3 = vpack.c.bf16 %v9340_v43, %v9340_v43  ;;  %v9360_v46 = vpop.f32.mrb[143].mxu0  ;;  %v5914_v7 = vpack.c.bf16 %v4563_v60, %v4563_v60 }
 0x23d   : > { %v4791_v38 = vrot.slane %v4789_v9, 7  ;;  %v5200_v13 = vadd.f32 %v5199_v30, %v5169_v54  ;;  %v5131_v48 = vadd.f32 %v5130_v51, %v4562_v50  ;;  %v9367_v26 = vpop.f32.mrb[12].mxu1 }
 0x23e   : > { %v4812_v58 = vsel %vm9107_vm13, %v4804_v15, %v4811_v44  ;;  %v5059_v19 = vsel %vm9101_vm12, %v4813_v25, %v5854_v1  ;;  %v4832_v52 = vshrl.u32 %v5916_v3, 16  ;;  %v4835_v24 = vshll.u32 %v5916_v3, 16  ;;  %v9371_v37 = vpop.f32.mrb[13].mxu1 }
 0x23f   : > { %5853 = vst [vmem:[%s9089_s17 + $0x64] sm:$0xf] %v4812_v58  ;;  %5855 = vst [vmem:[%s9089_s17 + $0x68] sm:$0x1] %v5059_v19  ;;  %v4794_v4 = vor.u32 %v4792_v5, %v4791_v38  ;;  %v4796_v20 = vrot.slane %v4791_v38, 4  ;;  %v4815_v54 = vshrl.u32 %v5914_v7, 16  ;;  %v5132_v9 = vadd.f32 %v5131_v48, %v4563_v60 }
 0x240   : > { %v4818_v50 = vshll.u32 %v5914_v7, 16  ;;  %v4834_v15 = vrot.slane %v4832_v52, 7  ;;  %v5171_v1 = vmul.f32 %v4563_v60, %v4563_v60  ;;  %v5201_v51 = vadd.f32 %v5200_v13, %v5170_v39  ;;  %v9373_v30 = vpop.f32.mrb[14].mxu1  ;;  %v5861_v5 = vld [vmem:[%s9089_s17 + $0x78] sm:$0xf] }
 0x241   : > { %v4795_v44 = vsel %vm9107_vm13, %v4787_v40, %v4794_v4  ;;  %v5052_v25 = vsel %vm9101_vm12, %v4796_v20, %v5849_v49  ;;  %v4817_v3 = vrot.slane %v4815_v54, 7  ;;  %v4566_v38 = vadd.f32 %v6685_v32, %v9066_v0  ;;  %v9381_v7 = vpop.f32.mrb[15].mxu1  ;;  %v5856_v39 = vld [vmem:[%s9089_s17 + $0x6c] sm:$0xf] }
 0x242   : > { %5848 = vst [vmem:[%s9089_s17 + $0x58] sm:$0xf] %v4795_v44  ;;  %5850 = vst [vmem:[%s9089_s17 + $0x5c] sm:$0x1] %v5052_v25  ;;  %v4837_v48 = vor.u32 %v4835_v24, %v4834_v15  ;;  %v5173_v60 = vmul.f32 %v9340_v43, %v9340_v43  ;;  %v5202_v13 = vadd.f32 %v5201_v51, %v5171_v1  ;;  %v4838_v58 = vrot.slane %v4834_v15, 4 }
 0x243   : > { %v6688_v40 = vadd.f32 %v9069_v47, %v9241_v28  ;;  %v4820_v19 = vor.u32 %v4818_v50, %v4817_v3  ;;  %v4821_v49 = vrot.slane %v4817_v3, 4  ;;  %v5917_v52 = vpack.c.bf16 %v4566_v38, %v4566_v38  ;;  %v5864_v25 = vld [vmem:[%s9089_s17 + $0x80] sm:$0x1] }
 0x244   : > { %v5069_v32 = vsel %vm9093_vm11, %v4837_v48, %v5861_v5  ;;  %v6690_v24 = vadd.f32 %v8924_v14, %v9233_v29  ;;  %v6413_v20 = vadd.f32 %v9255_v61, %v9243_v16  ;;  %v6693_v50 = vadd.f32 %v8914_v35, %v9156_v27 }
 0x245   : > { %v4564_v4 = vadd.f32 %v6688_v40, %v9066_v0  ;;  %5862 = vst [vmem:[%s9089_s17 + $0x78] sm:$0xf] %v5069_v32  ;;  %v5062_v47 = vsel %vm9093_vm11, %v4820_v19, %v5856_v39  ;;  %v4840_v28 = vshrl.u32 %v5917_v52, 16  ;;  %v4843_v54 = vshll.u32 %v5917_v52, 16 }
 0x246   : > { %5857 = vst [vmem:[%s9089_s17 + $0x6c] sm:$0xf] %v5062_v47  ;;  %v6691_v44 = vadd.f32 %v6690_v24, %v9271_v12  ;;  %v6694_v29 = vadd.f32 %v6693_v50, %v9273_v41  ;;  %v6696_v16 = vadd.f32 %v8929_v53, %v9253_v6  ;;  %v6416_v61 = vadd.f32 %v9263_v59, %v9259_v23 }
 0x247   : > { %v5915_v15 = vpack.c.bf16 %v4564_v4, %v4564_v4  ;;  %v5133_v1 = vadd.f32 %v5132_v9, %v4564_v4  ;;  %v5172_v51 = vmul.f32 %v4564_v4, %v4564_v4  ;;  %v4842_v14 = vrot.slane %v4840_v28, 7 }
 0x248   : > { %v9412_v48 = vadd.f32 %v6691_v44, %v9066_v0  ;;  %v4567_v41 = vadd.f32 %v6694_v29, %v9066_v0  ;;  %v6697_v23 = vadd.f32 %v6696_v16, %v9275_v2  ;;  %v5174_v40 = vmul.f32 %v4566_v38, %v4566_v38  ;;  %v9725_v16 = vld [vmem:[#allocation8_spill] sm:$0xff] }
 0x249   : > { %v4823_v5 = vshrl.u32 %v5915_v15, 16  ;;  %v4826_v3 = vshll.u32 %v5915_v15, 16  ;;  %v5134_v35 = vadd.f32 %v5133_v1, %v9340_v43  ;;  %v5203_v27 = vadd.f32 %v5202_v13, %v5172_v51  ;;  %v5859_v13 = vld [vmem:[%s9089_s17 + $0x74] sm:$0x1] }
 0x24a   : > { %v4845_v9 = vor.u32 %v4843_v54, %v4842_v14  ;;  %v4847_v12 = vrot.slane %v4842_v14, 4  ;;  %v5920_v19 = vpack.c.bf16 %v9412_v48, %v9412_v48  ;;  %v5918_v32 = vpack.c.bf16 %v4567_v41, %v4567_v41  ;;  %v5871_v14 = vld [vmem:[%s9089_s17 + $0x90] sm:$0xf] }
 0x24b   : > { %v4825_v53 = vrot.slane %v4823_v5, 7  ;;  %v5204_v6 = vadd.f32 %v5203_v27, %v5173_v60  ;;  %v5135_v39 = vadd.f32 %v5134_v35, %v4566_v38  ;;  %v4570_v51 = vadd.f32 %v6697_v23, %v9066_v0  ;;  %v9726_v5 = vld [vmem:[#allocation10_spill] sm:$0xff] }
 0x24c   : > { %v4846_v59 = vsel %vm9107_vm13, %v4838_v58, %v4845_v9  ;;  %v5073_v43 = vsel %vm9101_vm12, %v4847_v12, %v5864_v25  ;;  %v4866_v4 = vshrl.u32 %v5920_v19, 16  ;;  %v4869_v24 = vshll.u32 %v5920_v19, 16 }
 0x24d   : > { %5863 = vst [vmem:[%s9089_s17 + $0x7c] sm:$0xf] %v4846_v59  ;;  %5865 = vst [vmem:[%s9089_s17 + $0x80] sm:$0x1] %v5073_v43  ;;  %v4828_v52 = vor.u32 %v4826_v3, %v4825_v53  ;;  %v4830_v60 = vrot.slane %v4825_v53, 4  ;;  %v5136_v2 = vadd.f32 %v5135_v39, %v4567_v41  ;;  %v5175_v58 = vmul.f32 %v4567_v41, %v4567_v41 }
 0x24e   : > { %v5205_v47 = vadd.f32 %v5204_v6, %v5174_v40  ;;  %v4849_v54 = vshrl.u32 %v5918_v32, 16  ;;  %v4852_v50 = vshll.u32 %v5918_v32, 16  ;;  %v4868_v15 = vrot.slane %v4866_v4, 7  ;;  %v9728_v40 = vld [vmem:[#allocation14_spill] sm:$0xff]  ;;  %v5874_v32 = vld [vmem:[%s9089_s17 + $0x98] sm:$0x1] }
 0x24f   : > { %v4829_v38 = vsel %vm9107_vm13, %v4821_v49, %v4828_v52  ;;  %v5066_v28 = vsel %vm9101_vm12, %v4830_v60, %v5859_v13  ;;  %v6699_v44 = vadd.f32 %v8919_v63, %v9218_v21  ;;  %v6702_v49 = vadd.f32 %v8968_v10, %v6413_v20  ;;  %v5866_v63 = vld [vmem:[%s9089_s17 + $0x84] sm:$0xf]  ;;  %v9727_v10 = vld [vmem:[#allocation7_spill] sm:$0xff] }
 0x250   : > { %5858 = vst [vmem:[%s9089_s17 + $0x70] sm:$0xf] %v4829_v38  ;;  %5860 = vst [vmem:[%s9089_s17 + $0x74] sm:$0x1] %v5066_v28  ;;  %v5206_v1 = vadd.f32 %v5205_v47, %v5175_v58  ;;  %v9435_v29 = vrot.slane %v4849_v54, 7  ;;  %v9440_v25 = vadd.f32 %v9293_v55, %v9725_v16  ;;  %v6705_v3 = vadd.f32 %v9726_v5, %v9326_v11 }
 0x251   : > { %v4871_v35 = vor.u32 %v4869_v24, %v4868_v15  ;;  %v4872_v27 = vrot.slane %v4868_v15, 4  ;;  %v5177_v9 = vmul.f32 %v9412_v48, %v9412_v48  ;;  %v5921_v21 = vpack.c.bf16 %v4570_v51, %v4570_v51 }
 0x252   : > { %v4854_v12 = vor.u32 %v4852_v50, %v9435_v29  ;;  %v5178_v41 = vmul.f32 %v4570_v51, %v4570_v51  ;;  %v6700_v20 = vadd.f32 %v6699_v44, %v9727_v10  ;;  %v6703_v55 = vadd.f32 %v6702_v49, %v9320_v56 }
 0x253   : > { %v5083_v53 = vsel %vm9093_vm11, %v4871_v35, %v5871_v14  ;;  %v4874_v11 = vshrl.u32 %v5921_v21, 16  ;;  %v4877_v6 = vshll.u32 %v5921_v21, 16  ;;  %v6706_v39 = vadd.f32 %v6705_v3, %v9330_v42  ;;  %v9729_v42 = vld [vmem:[#allocation13_spill] sm:$0xff]  ;;  %v5869_v3 = vld [vmem:[%s9089_s17 + $0x8c] sm:$0x1] }
 0x254   : > { %5872 = vst [vmem:[%s9089_s17 + $0x90] sm:$0xf] %v5083_v53  ;;  %v5076_v23 = vsel %vm9093_vm11, %v4854_v12, %v5866_v63  ;;  %v4568_v59 = vadd.f32 %v6700_v20, %v9066_v0  ;;  %v9458_v43 = vadd.f32 %v6703_v55, %v9066_v0  ;;  %v6708_v13 = vadd.f32 %v9728_v40, %v6416_v61  ;;  %v5881_v12 = vld [vmem:[%s9089_s17 + $0xa8] sm:$0xf]  ;;  %v5876_v53 = vld [vmem:[%s9089_s17 + $0x9c] sm:$0xf] }
 0x255   : > { %5867 = vst [vmem:[%s9089_s17 + $0x84] sm:$0xf] %v5076_v23  ;;  %v4876_v56 = vrot.slane %v4874_v11, 7  ;;  %v4571_v19 = vadd.f32 %v6706_v39, %v9066_v0  ;;  %v6422_v52 = vadd.f32 %v9305_v31, %v9296_v34  ;;  %v6711_v60 = vadd.f32 %v9729_v42, %v9350_v17 }
 0x256   : > { %v5919_v4 = vpack.c.bf16 %v4568_v59, %v4568_v59  ;;  %v5137_v24 = vadd.f32 %v5136_v2, %v4568_v59  ;;  %v5176_v58 = vmul.f32 %v4568_v59, %v4568_v59  ;;  %v5924_v47 = vpack.c.bf16 %v9458_v43, %v9458_v43 }
 0x257   : > { %v4855_v61 = vrot.slane %v9435_v29, 4  ;;  %v4879_v38 = vor.u32 %v4877_v6, %v4876_v56  ;;  %v4881_v28 = vrot.slane %v4876_v56, 4  ;;  %v5922_v54 = vpack.c.bf16 %v4571_v19, %v4571_v19 }
 0x258   : > { %v4857_v50 = vshrl.u32 %v5919_v4, 16  ;;  %v4860_v31 = vshll.u32 %v5919_v4, 16  ;;  %v5138_v34 = vadd.f32 %v5137_v24, %v9412_v48  ;;  %v5207_v17 = vadd.f32 %v5206_v1, %v5176_v58  ;;  %v9731_v58 = vld [vmem:[#allocation4_spill] sm:$0xff] }
 0x259   : > { %v4880_v15 = vsel %vm9107_vm13, %v4872_v27, %v4879_v38  ;;  %v5087_v2 = vsel %vm9101_vm12, %v4881_v28, %v5874_v32  ;;  %v4900_v44 = vshrl.u32 %v5924_v47, 16  ;;  %v4903_v14 = vshll.u32 %v5924_v47, 16  ;;  %v9732_v28 = vld [vmem:[#allocation5_spill] sm:$0xff] }
 0x25a   : > { %5873 = vst [vmem:[%s9089_s17 + $0x94] sm:$0xf] %v4880_v15  ;;  %5875 = vst [vmem:[%s9089_s17 + $0x98] sm:$0x1] %v5087_v2  ;;  %v4859_v29 = vrot.slane %v4857_v50, 7  ;;  %v5208_v49 = vadd.f32 %v5207_v17, %v5177_v9  ;;  %v4883_v16 = vshrl.u32 %v5922_v54, 16  ;;  %v5139_v48 = vadd.f32 %v5138_v34, %v4570_v51 }
 0x25b   : > { %v4886_v5 = vshll.u32 %v5922_v54, 16  ;;  %v4902_v35 = vrot.slane %v4900_v44, 7  ;;  %v5179_v1 = vmul.f32 %v4571_v19, %v4571_v19  ;;  %v6709_v27 = vadd.f32 %v6708_v13, %v9336_v8 }
 0x25c   : > { %v4862_v63 = vor.u32 %v4860_v31, %v4859_v29  ;;  %v4864_v21 = vrot.slane %v4859_v29, 4  ;;  %v9481_v10 = vrot.slane %v4883_v16, 7  ;;  %v5209_v20 = vadd.f32 %v5208_v49, %v5178_v41  ;;  %v5884_v31 = vld [vmem:[%s9089_s17 + $0xb0] sm:$0x1] }
 0x25d   : > { %v4905_v55 = vor.u32 %v4903_v14, %v4902_v35  ;;  %v5140_v9 = vadd.f32 %v5139_v48, %v4571_v19  ;;  %v4574_v11 = vadd.f32 %v6709_v27, %v9066_v0  ;;  %v5181_v41 = vmul.f32 %v9458_v43, %v9458_v43  ;;  %v9730_v19 = vld [vmem:[#allocation3_spill] sm:$0xff] }
 0x25e   : > { %v4863_v51 = vsel %vm9107_vm13, %v4855_v61, %v4862_v63  ;;  %v5080_v6 = vsel %vm9101_vm12, %v4864_v21, %v5869_v3  ;;  %v4888_v8 = vor.u32 %v4886_v5, %v9481_v10  ;;  %v5210_v23 = vadd.f32 %v5209_v20, %v5179_v1 }
 0x25f   : > { %5868 = vst [vmem:[%s9089_s17 + $0x88] sm:$0xf] %v4863_v51  ;;  %5870 = vst [vmem:[%s9089_s17 + $0x8c] sm:$0x1] %v5080_v6  ;;  %v5097_v39 = vsel %vm9093_vm11, %v4905_v55, %v5881_v12  ;;  %v5925_v59 = vpack.c.bf16 %v4574_v11, %v4574_v11  ;;  %v6712_v13 = vadd.f32 %v6711_v60, %v9342_v45  ;;  %v4906_v32 = vrot.slane %v4902_v35, 4 }
 0x260   : > { %5882 = vst [vmem:[%s9089_s17 + $0xa8] sm:$0xf] %v5097_v39  ;;  %v5090_v40 = vsel %vm9093_vm11, %v4888_v8, %v5876_v53  ;;  %v6425_v56 = vadd.f32 %v9352_v62, %v9344_v36  ;;  %v6717_v42 = vadd.f32 %v9730_v19, %v9440_v25  ;;  %v6428_v24 = vadd.f32 %v9360_v46, %v9356_v33  ;;  %v9733_v62 = vld [vmem:[#allocation6_spill] sm:$0xff]  ;;  %v5886_v8 = vld [vmem:[%s9089_s17 + $0xb4] sm:$0xf] }
 0x261   : > { %5877 = vst [vmem:[%s9089_s17 + $0x9c] sm:$0xf] %v5090_v40  ;;  %v4908_v4 = vshrl.u32 %v5925_v59, 16  ;;  %v6723_v47 = vadd.f32 %v9731_v58, %v6422_v52  ;;  %v5182_v61 = vmul.f32 %v4574_v11, %v4574_v11  ;;  %v4572_v38 = vadd.f32 %v6712_v13, %v9066_v0 }
 0x262   : > { %v6714_v45 = vadd.f32 %v9732_v28, %v6425_v56  ;;  %v6718_v60 = vadd.f32 %v6717_v42, %v9371_v37  ;;  %v4911_v36 = vshll.u32 %v5925_v59, 16  ;;  %v6720_v50 = vadd.f32 %v9733_v62, %v6428_v24  ;;  %v5891_v56 = vld [vmem:[%s9089_s17 + $0xc0] sm:$0xf]  ;;  %v5894_v62 = vld [vmem:[%s9089_s17 + $0xc8] sm:$0x1] }
 0x263   : > { %v4910_v54 = vrot.slane %v4908_v4, 7  ;;  %v6724_v25 = vadd.f32 %v6723_v47, %v9381_v7  ;;  %v5923_v34 = vpack.c.bf16 %v4572_v38, %v4572_v38  ;;  %v5141_v17 = vadd.f32 %v5140_v9, %v4572_v38 }
 0x264   : > { %v5180_v33 = vmul.f32 %v4572_v38, %v4572_v38  ;;  %v6715_v46 = vadd.f32 %v6714_v45, %v9367_v26  ;;  %v4575_v2 = vadd.f32 %v6718_v60, %v9066_v0  ;;  %v6721_v37 = vadd.f32 %v6720_v50, %v9373_v30 }
 0x265   : > { %v4913_v52 = vor.u32 %v4911_v36, %v4910_v54  ;;  %v4915_v15 = vrot.slane %v4910_v54, 4  ;;  %v4891_v44 = vshrl.u32 %v5923_v34, 16  ;;  %v4894_v14 = vshll.u32 %v5923_v34, 16 }
 0x266   : > { %v5142_v29 = vadd.f32 %v5141_v17, %v9458_v43  ;;  %v5211_v7 = vadd.f32 %v5210_v23, %v5180_v33  ;;  %v4577_v26 = vadd.f32 %v6715_v46, %v9066_v0  ;;  %v5926_v5 = vpack.c.bf16 %v4575_v2, %v4575_v2  ;;  %v5879_v43 = vld [vmem:[%s9089_s17 + $0xa4] sm:$0x1]  ;;  %v5889_v46 = vld [vmem:[%s9089_s17 + $0xbc] sm:$0x1] }
 0x267   : > { %v4914_v49 = vsel %vm9107_vm13, %v4906_v32, %v4913_v52  ;;  %v5101_v16 = vsel %vm9101_vm12, %v4915_v15, %v5884_v31  ;;  %v4893_v3 = vrot.slane %v4891_v44, 7  ;;  %v5183_v48 = vmul.f32 %v4575_v2, %v4575_v2 }
 0x268   : > { %5883 = vst [vmem:[%s9089_s17 + $0xac] sm:$0xf] %v4914_v49  ;;  %5885 = vst [vmem:[%s9089_s17 + $0xb0] sm:$0x1] %v5101_v16  ;;  %v5212_v35 = vadd.f32 %v5211_v7, %v5181_v41  ;;  %v5143_v30 = vadd.f32 %v5142_v29, %v4574_v11  ;;  %v4889_v1 = vrot.slane %v9481_v10, 4  ;;  %v5928_v27 = vpack.c.bf16 %v4577_v26, %v4577_v26 }
 0x269   : > { %v4917_v63 = vshrl.u32 %v5926_v5, 16  ;;  %v4896_v21 = vor.u32 %v4894_v14, %v4893_v3  ;;  %v4898_v12 = vrot.slane %v4893_v3, 4  ;;  %v4920_v9 = vshll.u32 %v5926_v5, 16  ;;  %v6880_v11 = vld [vmem:[%s9577_s2] ss:$0 sm:$0xff] }
 0x26a   : > { %v5144_v20 = vadd.f32 %v5143_v30, %v4575_v2  ;;  %v5213_v55 = vadd.f32 %v5212_v35, %v5182_v61  ;;  %v4934_v0 = vshrl.u32 %v5928_v27, 16  ;;  %v4578_v51 = vadd.f32 %v6880_v11, %v6721_v37 }
 0x26b   : > { %v4919_v53 = vrot.slane %v4917_v63, 7  ;;  %v4897_v10 = vsel %vm9107_vm13, %v4889_v1, %v4896_v21  ;;  %v5094_v6 = vsel %vm9101_vm12, %v4898_v12, %v5879_v43  ;;  %v4576_v41 = vadd.f32 %v6880_v11, %v6724_v25 }
 0x26c   : > { %v5214_v39 = vadd.f32 %v5213_v55, %v5183_v48  ;;  %5878 = vst [vmem:[%s9089_s17 + $0xa0] sm:$0xf] %v4897_v10  ;;  %5880 = vst [vmem:[%s9089_s17 + $0xa4] sm:$0x1] %v5094_v6  ;;  %v4936_v23 = vrot.slane %v4934_v0, 7  ;;  %v4937_v59 = vshll.u32 %v5928_v27, 16  ;;  %v5929_v13 = vpack.c.bf16 %v4578_v51, %v4578_v51 }
 0x26d   : > { %v4922_v40 = vor.u32 %v4920_v9, %v4919_v53  ;;  %v5927_v19 = vpack.c.bf16 %v4576_v41, %v4576_v41  ;;  %v5145_v42 = vadd.f32 %v5144_v20, %v4576_v41  ;;  %v5184_v32 = vmul.f32 %v4576_v41, %v4576_v41 }
 0x26e   : > { %v4939_v4 = vor.u32 %v4937_v59, %v4936_v23  ;;  %v5185_v24 = vmul.f32 %v4577_v26, %v4577_v26  ;;  %v4942_v47 = vshrl.u32 %v5929_v13, 16  ;;  %v5186_v61 = vmul.f32 %v4578_v51, %v4578_v51 }
 0x26f   : > { %v5104_v58 = vsel %vm9093_vm11, %v4922_v40, %v5886_v8  ;;  %v4925_v38 = vshrl.u32 %v5927_v19, 16  ;;  %v5146_v28 = vadd.f32 %v5145_v42, %v4577_v26  ;;  %v4945_v54 = vshll.u32 %v5929_v13, 16 }
 0x270   : > { %5887 = vst [vmem:[%s9089_s17 + $0xb4] sm:$0xf] %v5104_v58  ;;  %v5111_v45 = vsel %vm9093_vm11, %v4939_v4, %v5891_v56  ;;  %v4944_v60 = vrot.slane %v4942_v47, 7  ;;  %v5215_v36 = vadd.f32 %v5214_v39, %v5184_v32  ;;  %v4928_v25 = vshll.u32 %v5927_v19, 16 }
 0x271   : > { %5892 = vst [vmem:[%s9089_s17 + $0xc0] sm:$0xf] %v5111_v45  ;;  %v4927_v50 = vrot.slane %v4925_v38, 7  ;;  %v5147_v31 = vadd.f32 %v5146_v28, %v4578_v51  ;;  %v4940_v34 = vrot.slane %v4936_v23, 4  ;;  %v4923_v15 = vrot.slane %v4919_v53, 4 }
 0x272   : > { %v4947_v17 = vor.u32 %v4945_v54, %v4944_v60  ;;  %v4949_v33 = vrot.slane %v4944_v60, 4  ;;  %v5216_v52 = vadd.f32 %v5215_v36, %v5185_v24 }
 0x273   : > { %v4930_v22 = vor.u32 %v4928_v25, %v4927_v50  ;;  %v4932_v2 = vrot.slane %v4927_v50, 4  ;;  %v5148_v37 = vrot.slane %v5147_v31, 4 }
 0x274   : > { %v4948_v44 = vsel %vm9107_vm13, %v4940_v34, %v4947_v17  ;;  %v5115_v14 = vsel %vm9101_vm12, %v4949_v33, %v5894_v62  ;;  %v5217_v29 = vadd.f32 %v5216_v52, %v5186_v61 }
 0x275   : > { %5893 = vst [vmem:[%s9089_s17 + $0xc4] sm:$0xf] %v4948_v44  ;;  %5895 = vst [vmem:[%s9089_s17 + $0xc8] sm:$0x1] %v5115_v14  ;;  %v4931_v7 = vsel %vm9107_vm13, %v4923_v15, %v4930_v22  ;;  %v5108_v49 = vsel %vm9101_vm12, %v4932_v2, %v5889_v46  ;;  %v5149_v16 = vadd.f32 %v5148_v37, %v5147_v31 }
 0x276   : > { %5888 = vst [vmem:[%s9089_s17 + $0xb8] sm:$0xf] %v4931_v7  ;;  %5890 = vst [vmem:[%s9089_s17 + $0xbc] sm:$0x1] %v5108_v49  ;;  %v5218_v26 = vrot.slane %v5217_v29, 4 }
 0x277   : > { %v5150_v5 = vrot.slane %v5149_v16, 2 }
 0x278   : > { %v5219_v3 = vadd.f32 %v5218_v26, %v5217_v29 }
 0x279   : > { %v5151_v35 = vadd.f32 %v5150_v5, %v5149_v16 }
 0x27a   : > { %v5220_v30 = vrot.slane %v5219_v3, 2 }
 0x27b   : > { %v5152_v48 = vrot.slane %v5151_v35, 1 }
 0x27c   : > { %v5221_v1 = vadd.f32 %v5220_v30, %v5219_v3 }
 0x27d   : > { %v5153_v57 = vadd.f32 %v5152_v48, %v5151_v35 }
 0x27e   : > { %v5222_v43 = vrot.slane %v5221_v1, 1 }
 0x27f   : > { %5154 = vst [vmem:[%s317_s22] sm:$0x1] %v5153_v57 }
 0x280   : > { %v5223_v18 = vadd.f32 %v5222_v43, %v5221_v1 }
 0x282   : > { %5224 = vst [vmem:[%s323_s29] sm:$0x1] %v5223_v18 }
 0x283 PF: > { %s18_s26 = sadd.s32 1, %s6903_s26   ;;  %s9734_s24 = smov %s6899_s25 }
 0x284   : > { %p15_p5 = scmp.ge.s32.totalorder %s18_s26, 4   ;;  %s9735_s25 = smov %s9737_s27 }
 0x286   :  { %17 = sbr.rel (!%p15_p5) target bundleno = 2 (0x2), region = 100 }

</bundles_post_ra>
